<compile_context>
chip_gen: v6e
topology: v6e:2x2x1
jax: 0.10.0
libtpu: 0.0.40
codegen_flags: <defaults>
</compile_context>

<pallas_src>
import jax
import jax.numpy as jnp
from jax.experimental import pallas as pl
from jax.experimental.pallas import tpu as pltpu

IN_DIM, H1, H2, OUT_DIM = 784, 512, 256, 10
OUT_PAD = 128          # lane-dense output tiles (real logits are columns [:10])
MAX_TB = 512           # batch-tile cap (amortizes per-step pipeline overhead)


def _round_up(x, m):
    return (x + m - 1) // m * m


def _pick_tb(batch, max_tb=MAX_TB):
    # Big enough to amortize per-step pipeline overhead, small enough to keep
    # >= 2-4 grid steps (v7x megacore sharding + input double buffering alive).
    bp = _round_up(max(batch, 1), 128)
    tb = max(128, (bp // 4) // 128 * 128)
    return min(max_tb, tb)


def mlp_kernel(x_ref, w1_ref, b1_ref, w2_ref, b2_ref, w3_ref, b3_ref, o_ref):
    # fc1 + relu: cast x to bf16 right before the dot (f32 accumulate on MXU).
    x = x_ref[...].astype(jnp.bfloat16)
    h1 = jnp.dot(x, w1_ref[...], preferred_element_type=jnp.float32)
    h1 = jnp.maximum(h1 + b1_ref[...], 0.0)
    # fc2 + relu
    h2 = jnp.dot(h1.astype(jnp.bfloat16), w2_ref[...],
                 preferred_element_type=jnp.float32)
    h2 = jnp.maximum(h2 + b2_ref[...], 0.0)
    # fc3 (no activation on the final layer), bf16 lane-dense writeback
    out = jnp.dot(h2.astype(jnp.bfloat16), w3_ref[...],
                  preferred_element_type=jnp.float32)
    o_ref[...] = (out + b3_ref[...]).astype(o_ref.dtype)


def prepare_params(w1, b1, w2, b2, w3, b3):
    """One-time bf16 cast / lane padding of the parameters (hoisted out of the
    per-call wrapper so each forward pays zero pad/convert XLA ops)."""
    w1p = w1.astype(jnp.bfloat16)                                  # (784, 512)
    w2p = w2.astype(jnp.bfloat16)                                  # (512, 256)
    w3p = jnp.zeros((H2, OUT_PAD), jnp.bfloat16).at[:, :OUT_DIM].set(
        w3.astype(jnp.bfloat16))                                   # (256, 128)
    b1p = b1.reshape(1, H1).astype(jnp.float32)
    b2p = b2.reshape(1, H2).astype(jnp.float32)
    b3p = jnp.zeros((1, OUT_PAD), jnp.float32).at[:, :OUT_DIM].set(
        b3.reshape(1, OUT_DIM).astype(jnp.float32))
    return w1p, b1p, w2p, b2p, w3p, b3p


def mlp_forward(x, params, *, max_tb=MAX_TB):
    w1p, b1p, w2p, b2p, w3p, b3p = params
    B = x.shape[0]
    tb = _pick_tb(B, max_tb)
    num_tiles = pl.cdiv(B, tb)
    Bp = num_tiles * tb
    if Bp != B:
        # Pad only the batch dimension with zero rows (bias-only logits for the
        # pad rows, sliced away below). x itself stays uncast.
        x = jnp.pad(x, ((0, Bp - B), (0, 0)))

    flops = 2 * Bp * (IN_DIM * H1 + H1 * H2 + H2 * OUT_PAD)
    bytes_accessed = (
        Bp * IN_DIM * x.dtype.itemsize                 # activations, as given
        + (w1p.size + w2p.size + w3p.size) * 2         # bf16 weights (once)
        + (b1p.size + b2p.size + b3p.size) * 4         # f32 biases (once)
        + Bp * OUT_PAD * 2)                            # bf16 output

    out = pl.pallas_call(
        mlp_kernel,
        out_shape=jax.ShapeDtypeStruct((Bp, OUT_PAD), jnp.bfloat16),
        grid_spec=pltpu.PrefetchScalarGridSpec(
            num_scalar_prefetch=0,
            grid=(num_tiles,),
            in_specs=[
                # activations: one batch tile per grid step (double-buffered);
                # full 784 last dim is allowed since it equals the array dim.
                pl.BlockSpec((tb, IN_DIM), lambda i: (i, 0)),
                # weights / biases: same block every step -> VMEM resident.
                pl.BlockSpec((IN_DIM, H1), lambda i: (0, 0)),
                pl.BlockSpec((1, H1), lambda i: (0, 0)),
                pl.BlockSpec((H1, H2), lambda i: (0, 0)),
                pl.BlockSpec((1, H2), lambda i: (0, 0)),
                pl.BlockSpec((H2, OUT_PAD), lambda i: (0, 0)),
                pl.BlockSpec((1, OUT_PAD), lambda i: (0, 0)),
            ],
            out_specs=pl.BlockSpec((tb, OUT_PAD), lambda i: (i, 0)),
        ),
        compiler_params=pltpu.CompilerParams(
            dimension_semantics=("parallel",),
        ),
        cost_estimate=pl.CostEstimate(
            flops=flops, transcendentals=0, bytes_accessed=bytes_accessed),
    )(x, w1p, b1p, w2p, b2p, w3p, b3p)

    # Strip batch and lane padding: real logits are the first OUT_DIM columns.
    return out[:B, :OUT_DIM]


def init_params(key):
    # Deterministic synthetic params (PyTorch-default-like uniform init bounds).
    ks = jax.random.split(key, 6)

    def layer(kw, kb, fan_in, fan_out):
        bound = 1.0 / jnp.sqrt(fan_in)
        w = jax.random.uniform(kw, (fan_in, fan_out), jnp.float32, -bound, bound)
        b = jax.random.uniform(kb, (1, fan_out), jnp.float32, -bound, bound)
        return w, b

    w1, b1 = layer(ks[0], ks[1], IN_DIM, H1)
    w2, b2 = layer(ks[2], ks[3], H1, H2)
    w3, b3 = layer(ks[4], ks[5], H2, OUT_DIM)
    return w1, b1, w2, b2, w3, b3


if __name__ == "__main__":
    key = jax.random.PRNGKey(0)
    kx, kp = jax.random.split(key)

    B = 256  # two 128-row batch tiles -> exercises grid + resident weights
    x = jax.random.normal(kx, (B, IN_DIM), jnp.float32)
    w1, b1, w2, b2, w3, b3 = init_params(kp)

    params = prepare_params(w1, b1, w2, b2, w3, b3)  # one-time prep
    out = mlp_forward(x, params)
    out = jax.block_until_ready(out)

    # Pure-JAX f32 reference of the same forward semantics. Kernel uses bf16
    # MXU inputs with f32 accumulation and bf16 logits -> wider tolerance.
    h1 = jnp.maximum(x @ w1 + b1, 0.0)
    h2 = jnp.maximum(h1 @ w2 + b2, 0.0)
    ref = h2 @ w3 + b3
    assert out.shape == (B, OUT_DIM)
    out_f32 = out.astype(jnp.float32)
    assert jnp.allclose(out_f32, ref, atol=5e-2, rtol=5e-2), float(
        jnp.max(jnp.abs(out_f32 - ref)))

    print("KERNEL_OK")
</pallas_src>

<mosaic_0001>
module attributes {stable_mosaic.version = 11 : i64} {
  func.func @mlp_kernel(%arg0: i32, %arg1: memref<128x784xf32, #tpu.memory_space<vmem>>, %arg2: memref<784x512xbf16, #tpu.memory_space<vmem>>, %arg3: memref<1x512xf32, #tpu.memory_space<vmem>>, %arg4: memref<512x256xbf16, #tpu.memory_space<vmem>>, %arg5: memref<1x256xf32, #tpu.memory_space<vmem>>, %arg6: memref<256x128xbf16, #tpu.memory_space<vmem>>, %arg7: memref<1x128xf32, #tpu.memory_space<vmem>>, %arg8: memref<128x128xbf16, #tpu.memory_space<vmem>>) attributes {dimension_semantics = [#tpu.dimension_semantics<parallel>], iteration_bounds = array<i64: 2>, scalar_prefetch = 0 : i64, scratch_operands = 0 : i64, tpu.core_type = #tpu.core_type<tc>, window_params = [{transform_indices = @transform_0, window_bounds = array<i64: 128, 784>}, {pipeline_mode = #tpu.pipeline_mode<synchronous>, transform_indices = @transform_1, window_bounds = array<i64: 784, 512>}, {pipeline_mode = #tpu.pipeline_mode<synchronous>, transform_indices = @transform_2, window_bounds = array<i64: 1, 512>}, {pipeline_mode = #tpu.pipeline_mode<synchronous>, transform_indices = @transform_3, window_bounds = array<i64: 512, 256>}, {pipeline_mode = #tpu.pipeline_mode<synchronous>, transform_indices = @transform_4, window_bounds = array<i64: 1, 256>}, {pipeline_mode = #tpu.pipeline_mode<synchronous>, transform_indices = @transform_5, window_bounds = array<i64: 256, 128>}, {pipeline_mode = #tpu.pipeline_mode<synchronous>, transform_indices = @transform_6, window_bounds = array<i64: 1, 128>}, {transform_indices = @transform_7, window_bounds = array<i64: 128, 128>}]} {
    %c0 = arith.constant 0 : index
    %c0_0 = arith.constant 0 : index
    %0 = vector.load %arg1[%c0, %c0_0] : memref<128x784xf32, #tpu.memory_space<vmem>>, vector<128x784xf32>
    %1 = arith.truncf %0 : vector<128x784xf32> to vector<128x784xbf16>
    %c0_1 = arith.constant 0 : index
    %c0_2 = arith.constant 0 : index
    %2 = vector.load %arg2[%c0_1, %c0_2] : memref<784x512xbf16, #tpu.memory_space<vmem>>, vector<784x512xbf16>
    %cst = arith.constant dense<0.000000e+00> : vector<128x512xf32>
    %3 = tpu.matmul %1, %2, %cst {dimension_numbers = #tpu.dot_dimension_numbers<[1], [0], [0], [1], [0, 0, 1, 1], [], []>} : vector<128x784xbf16>, vector<784x512xbf16>, vector<128x512xf32> -> vector<128x512xf32>
    %c0_3 = arith.constant 0 : index
    %c0_4 = arith.constant 0 : index
    %4 = vector.load %arg3[%c0_3, %c0_4] : memref<1x512xf32, #tpu.memory_space<vmem>>, vector<1x512xf32>
    %5 = vector.broadcast %4 : vector<1x512xf32> to vector<128x512xf32>
    %6 = arith.addf %3, %5 : vector<128x512xf32>
    %cst_5 = arith.constant 0.000000e+00 : f32
    %7 = vector.broadcast %cst_5 : f32 to vector<128x512xf32>
    %8 = arith.maximumf %6, %7 : vector<128x512xf32>
    %9 = arith.truncf %8 : vector<128x512xf32> to vector<128x512xbf16>
    %c0_6 = arith.constant 0 : index
    %c0_7 = arith.constant 0 : index
    %10 = vector.load %arg4[%c0_6, %c0_7] : memref<512x256xbf16, #tpu.memory_space<vmem>>, vector<512x256xbf16>
    %cst_8 = arith.constant dense<0.000000e+00> : vector<128x256xf32>
    %11 = tpu.matmul %9, %10, %cst_8 {dimension_numbers = #tpu.dot_dimension_numbers<[1], [0], [0], [1], [0, 0, 1, 1], [], []>} : vector<128x512xbf16>, vector<512x256xbf16>, vector<128x256xf32> -> vector<128x256xf32>
    %c0_9 = arith.constant 0 : index
    %c0_10 = arith.constant 0 : index
    %12 = vector.load %arg5[%c0_9, %c0_10] : memref<1x256xf32, #tpu.memory_space<vmem>>, vector<1x256xf32>
    %13 = vector.broadcast %12 : vector<1x256xf32> to vector<128x256xf32>
    %14 = arith.addf %11, %13 : vector<128x256xf32>
    %cst_11 = arith.constant 0.000000e+00 : f32
    %15 = vector.broadcast %cst_11 : f32 to vector<128x256xf32>
    %16 = arith.maximumf %14, %15 : vector<128x256xf32>
    %17 = arith.truncf %16 : vector<128x256xf32> to vector<128x256xbf16>
    %c0_12 = arith.constant 0 : index
    %c0_13 = arith.constant 0 : index
    %18 = vector.load %arg6[%c0_12, %c0_13] : memref<256x128xbf16, #tpu.memory_space<vmem>>, vector<256x128xbf16>
    %cst_14 = arith.constant dense<0.000000e+00> : vector<128x128xf32>
    %19 = tpu.matmul %17, %18, %cst_14 {dimension_numbers = #tpu.dot_dimension_numbers<[1], [0], [0], [1], [0, 0, 1, 1], [], []>} : vector<128x256xbf16>, vector<256x128xbf16>, vector<128x128xf32> -> vector<128x128xf32>
    %c0_15 = arith.constant 0 : index
    %c0_16 = arith.constant 0 : index
    %20 = vector.load %arg7[%c0_15, %c0_16] : memref<1x128xf32, #tpu.memory_space<vmem>>, vector<1x128xf32>
    %21 = vector.broadcast %20 : vector<1x128xf32> to vector<128x128xf32>
    %22 = arith.addf %19, %21 : vector<128x128xf32>
    %23 = arith.truncf %22 : vector<128x128xf32> to vector<128x128xbf16>
    %c0_17 = arith.constant 0 : index
    %c0_18 = arith.constant 0 : index
    %24 = vector.load %arg8[%c0_17, %c0_18] : memref<128x128xbf16, #tpu.memory_space<vmem>>, vector<128x128xbf16>
    tpu.vector_store %arg8[%c0_17, %c0_18], %23 {strides = array<i32>} : memref<128x128xbf16, #tpu.memory_space<vmem>>, vector<128x128xbf16>,
    return
  }
  func.func @transform_0(%arg0: i32) -> (i32, i32) {
    %c0_i32 = arith.constant 0 : i32
    %c0_i32_0 = arith.constant 0 : i32
    return %arg0, %c0_i32 : i32, i32
  }
  func.func @transform_1(%arg0: i32) -> (i32, i32) {
    %c0_i32 = arith.constant 0 : i32
    %c0_i32_0 = arith.constant 0 : i32
    %c0_i32_1 = arith.constant 0 : i32
    return %c0_i32, %c0_i32_0 : i32, i32
  }
  func.func @transform_2(%arg0: i32) -> (i32, i32) {
    %c0_i32 = arith.constant 0 : i32
    %c0_i32_0 = arith.constant 0 : i32
    %c0_i32_1 = arith.constant 0 : i32
    return %c0_i32, %c0_i32_0 : i32, i32
  }
  func.func @transform_3(%arg0: i32) -> (i32, i32) {
    %c0_i32 = arith.constant 0 : i32
    %c0_i32_0 = arith.constant 0 : i32
    %c0_i32_1 = arith.constant 0 : i32
    return %c0_i32, %c0_i32_0 : i32, i32
  }
  func.func @transform_4(%arg0: i32) -> (i32, i32) {
    %c0_i32 = arith.constant 0 : i32
    %c0_i32_0 = arith.constant 0 : i32
    %c0_i32_1 = arith.constant 0 : i32
    return %c0_i32, %c0_i32_0 : i32, i32
  }
  func.func @transform_5(%arg0: i32) -> (i32, i32) {
    %c0_i32 = arith.constant 0 : i32
    %c0_i32_0 = arith.constant 0 : i32
    %c0_i32_1 = arith.constant 0 : i32
    return %c0_i32, %c0_i32_0 : i32, i32
  }
  func.func @transform_6(%arg0: i32) -> (i32, i32) {
    %c0_i32 = arith.constant 0 : i32
    %c0_i32_0 = arith.constant 0 : i32
    %c0_i32_1 = arith.constant 0 : i32
    return %c0_i32, %c0_i32_0 : i32, i32
  }
  func.func @transform_7(%arg0: i32) -> (i32, i32) {
    %c0_i32 = arith.constant 0 : i32
    %c0_i32_0 = arith.constant 0 : i32
    return %arg0, %c0_i32 : i32, i32
  }
}

</mosaic_0001>

<bundles_post_ra>
// kernel: tpu_custom_call.1
= control target key start
LH: loop header
LB: loop body
LE: loop exit
PB: predicated region body
PF: predicated region fallthrough
CT: control target
= control target key end

     0   :  { %12 = vsyncpa [#allocation3], 0  ;;  %s6540_s0 = inlined_call_operand.vmem [shape: f32[256,784], index: 0, kind: input, shape index: {}]   ;;  %s6541_s1 = inlined_call_operand.vmem [shape: bf16[784,512], index: 1, kind: input, shape index: {}]   ;;  %s6542_s2 = inlined_call_operand.vmem [shape: f32[1,512], index: 2, kind: input, shape index: {}]   ;;  %s6543_s3 = inlined_call_operand.vmem [shape: bf16[512,256], index: 3, kind: input, shape index: {}]   ;;  %s6544_s4 = inlined_call_operand.vmem [shape: f32[1,256], index: 4, kind: input, shape index: {}]   ;;  %s6545_s5 = inlined_call_operand.vmem [shape: bf16[256,128], index: 5, kind: input, shape index: {}]   ;;  %s6546_s6 = inlined_call_operand.vmem [shape: f32[1,128], index: 6, kind: input, shape index: {}]   ;;  %s6547_s7 = inlined_call_operand.hbm [shape: bf16[256,128], index: 7, kind: output, shape index: {}]  }
   0x1   :  { %14 = vsyncpa [#allocation3 + $0x1], 0  ;;  %s4753_s24 = smov 0   ;;  %s4755_s25 = smov 0  }
   0x2   :  { %s4757_s26 = smov 0   ;;  %s4759_s27 = smov 0  }
   0x3 LB: > { %s4774_s28 = sadd.s32 4294967295, %s4707_s27   ;;  %s3733_s29 = sadd.s32 4294967294, %s4707_s27   ;;  %s4707_s27 = sphi %s4759_s27, %s6606_s27   ;;  %s4703_s26 = sphi %s4757_s26, %s6605_s26   ;;  %s4699_s25 = sphi %s4755_s25, %s6604_s25   ;;  %s4695_s24 = sphi %s4753_s24, %s6603_s24  }
   0x4   : > { %s4778_s30 = sadd.s32 1, %s4707_s27   ;;  %s179_s8 = sadd.s32 1, %s4703_s26 }
   0x5   : > { %s176_s9 = ssub.s32 %s4707_s27, %s4778_s30  ;;  %p189_p0 = scmp.ne.s32.totalorder %s4703_s26, %s4699_s25 }
   0x6   : > { %p177_p1 = scmp.eq.s32.totalorder %s176_s9, 0  ;;  %p190_p2 = scmp.eq.s32.totalorder %s4774_s28, 1 }
   0x7   : > { %p195_p3 = scmp.ne.s32.totalorder %s4699_s25, %s4695_s24  ;;  %p196_p4 = scmp.eq.s32.totalorder %s3733_s29, 1 }
   0x8   : > { %s4789_s10 = scalar_select %p177_p1, %s4703_s26, %s179_s8  }
   0x9   : > { %p4791_p5 = por %p190_p2, %p189_p0  ;;  %p4795_p6 = por %p196_p4, %p195_p3 }
   0xa   : > { %p3736_p7 = scmp.ge.s32.totalorder %s4707_s27, 1  ;;  %p242_p8 = scmp.lt.s32.totalorder %s4707_s27, 3 }
   0xc   : > { %p243_p9 = pnand %p3736_p7, %p242_p8 }
   0xe   : > { %246 = sbr.rel (%p243_p9) target bundleno = 965 (0x3c5), region = 48 }
  0x13   : > { %v4241_v0 = vld [vmem:[%s6541_s1 + $0xe4] ss:$16 sps:$4 sm:$0xff]   ;;  %v4245_v2 = vld [vmem:[%s6541_s1 + $0xe0] ss:$16 sps:$4 sm:$0xff]   ;;  %s3738_s15 = sshll.u32 %s4774_s28, 4  ;;  %vm1650_vm0 = vcmask 130048  }
  0x14   : > { %v4243_v1 = vld [vmem:[%s6541_s1 + $0x2e4] ss:$16 sps:$4 sm:$0xff]   ;;  %1675 = vmatprep.subr.bf16.mxu0 %v4241_v0  ;;  %v4246_v3 = vld [vmem:[%s6541_s1 + $0x2e0] ss:$16 sps:$4 sm:$0xff]   ;;  %p276_p10 = scmp.lt.s32.totalorder %s3738_s15, 31  ;;  %s272_s18 = sand.u32 1, %s4699_s25  }
  0x15   : > { %1788 = vmatprep.subr.bf16.mxu1 %v4243_v1  ;;  %v4247_v4 = vld [vmem:[%s6541_s1 + $0xc4] ss:$16 sps:$4 sm:$0xff]   ;;  %1676 = vmatpush1.bf16.msra.mxu0 %v4245_v2  ;;  %v4251_v6 = vld [vmem:[%s6541_s1 + $0xc0] ss:$16 sps:$4 sm:$0xff]   ;;  %s3737_s20 = sshll.u32 %s272_s18, 6  ;;  %s4070_s29 = sshll.u32 %s4774_s28, 10 }
  0x16   : > { %1789 = vmatpush1.bf16.msra.mxu1 %v4246_v3  ;;  %v4249_v5 = vld [vmem:[%s6541_s1 + $0x2c4] ss:$16 sps:$4 sm:$0xff]   ;;  %1677 = vmatprep.subr.bf16.mxu0 %v4247_v4  ;;  %v4252_v7 = vld [vmem:[%s6541_s1 + $0x2c0] ss:$16 sps:$4 sm:$0xff]   ;;  %s6608_s15 = smov (!%p276_p10, %s3738_s15), 31  ;;  %s6465_s21 = scalar_lea.vmem [#allocation2], %s3737_s20 }
  0x17   : > { %1790 = vmatprep.subr.bf16.mxu1 %v4249_v5  ;;  %v4253_v8 = vld [vmem:[%s6541_s1 + $0xa4] ss:$16 sps:$4 sm:$0xff]   ;;  %v4257_v10 = vld [vmem:[%s6541_s1 + $0xa0] ss:$16 sps:$4 sm:$0xff]   ;;  %s4198_s23 = smul.u32 56, %s6608_s15  ;;  %s3671_s8 = sshll.u32 %s6465_s21, 4  ;;  %s6495_s8 = int_to_ptr.vmem [resolvable:$true] %s3671_s8 }
  0x18   : > { %v4255_v9 = vld [vmem:[%s6541_s1 + $0x2a4] ss:$16 sps:$4 sm:$0xff]   ;;  %v4258_v11 = vld [vmem:[%s6541_s1 + $0x2a0] ss:$16 sps:$4 sm:$0xff]   ;;  %s4647_s28 = scalar_lea.vmem %s6495_s8, 1024  ;;  %s4710_s14 = smov [#allocation2]  }
  0x19   : > { %1678 = vmatpush1.bf16.msra.mxu0 %v4251_v6  ;;  %v4259_v12 = vld [vmem:[%s6541_s1 + $0x84] ss:$16 sps:$4 sm:$0xff]   ;;  %v4263_v14 = vld [vmem:[%s6541_s1 + $0x80] ss:$16 sps:$4 sm:$0xff]   ;;  %s4937_s22 = scalar_lea.vmem %s6540_s0, %s4198_s23  ;;  %s6493_s23 = scalar_lea.hbm %s6547_s7, %s4070_s29 }
  0x1a   : > { %1791 = vmatpush1.bf16.msra.mxu1 %v4252_v7  ;;  %1679 = vmatprep.subr.bf16.mxu0 %v4253_v8  ;;  %v4261_v13 = vld [vmem:[%s6541_s1 + $0x284] ss:$16 sps:$4 sm:$0xff]   ;;  %v4264_v15 = vld [vmem:[%s6541_s1 + $0x280] ss:$16 sps:$4 sm:$0xff]   ;;  %v285_v46 = vld [vmem:[%s4937_s22 + $0x8] sm:$0xff]  ;;  %p4648_p11 = scmp.ne.s32.totalorder %s6495_s8, %s4647_s28  ;;  %s4651_s16 = sshll.u32 %s4710_s14, 4  ;;  %s4652_s16 = int_to_ptr.vmem [resolvable:$false] %s4651_s16 }
  0x1b   : > { %1792 = vmatprep.subr.bf16.mxu1 %v4255_v9  ;;  %v4265_v16 = vld [vmem:[%s6541_s1 + $0x64] ss:$16 sps:$4 sm:$0xff]   ;;  %v4269_v18 = vld [vmem:[%s6541_s1 + $0x60] ss:$16 sps:$4 sm:$0xff]   ;;  %v287_v48 = vld [vmem:[%s4937_s22 + $0x18] sm:$0xff]  ;;  %s4653_s17 = scalar_lea.vmem %s4652_s16, 2048  ;;  %p4654_p0 = scmp.lt.s32.totalorder %s6495_s8, %s4652_s16 }
  0x1c   : > { %v4267_v17 = vld [vmem:[%s6541_s1 + $0x264] ss:$16 sps:$4 sm:$0xff]   ;;  %v4270_v19 = vld [vmem:[%s6541_s1 + $0x260] ss:$16 sps:$4 sm:$0xff]   ;;  %v291_v7 = vld [vmem:[%s4937_s22 + $0x38] sm:$0xff]  ;;  %p4649_p12 = pnand %p4648_p11, %p4791_p5  ;;  %p4655_p1 = scmp.lt.s32.totalorder %s4653_s17, %s4647_s28 }
  0x1d   : > { %1680 = vmatpush1.bf16.msra.mxu0 %v4257_v10  ;;  %v4271_v20 = vld [vmem:[%s6541_s1 + $0x44] ss:$16 sps:$4 sm:$0xff]   ;;  %v4275_v22 = vld [vmem:[%s6541_s1 + $0x40] ss:$16 sps:$4 sm:$0xff]   ;;  %v293_v9 = vld [vmem:[%s4937_s22 + $0x48] sm:$0xff] }
  0x1e   : > { %1793 = vmatpush1.bf16.msra.mxu1 %v4258_v11  ;;  %1681 = vmatprep.subr.bf16.mxu0 %v4259_v12  ;;  %v4273_v21 = vld [vmem:[%s6541_s1 + $0x244] ss:$16 sps:$4 sm:$0xff]   ;;  %v4276_v23 = vld [vmem:[%s6541_s1 + $0x240] ss:$16 sps:$4 sm:$0xff]   ;;  %p4650_p13 = pneg %p4649_p12  ;;  %p4656_p2 = por %p4655_p1, %p4654_p0 }
  0x1f   : > { %1794 = vmatprep.subr.bf16.mxu1 %v4261_v13  ;;  %v4277_v24 = vld [vmem:[%s6541_s1 + $0x24] ss:$16 sps:$4 sm:$0xff]   ;;  %v4281_v26 = vld [vmem:[%s6541_s1 + $0x20] ss:$16 sps:$4 sm:$0xff]   ;;  %v299_v13 = vld [vmem:[%s4937_s22 + $0x78] sm:$0xff] }
  0x20   : > { %v4279_v25 = vld [vmem:[%s6541_s1 + $0x224] ss:$16 sps:$4 sm:$0xff]   ;;  %v4282_v27 = vld [vmem:[%s6541_s1 + $0x220] ss:$16 sps:$4 sm:$0xff]   ;;  %p4657_p3 = pnand %p4656_p2, %p4650_p13 }
  0x21   : > { %1682 = vmatpush1.bf16.msra.mxu0 %v4263_v14  ;;  %v4283_v28 = vld [vmem:[%s6541_s1 + $0x4] ss:$16 sps:$4 sm:$0xff]   ;;  %v4287_v30 = vld [vmem:[%s6541_s1] ss:$16 sps:$4 sm:$0xff]  }
  0x22   : > { %1795 = vmatpush1.bf16.msra.mxu1 %v4264_v15  ;;  %1683 = vmatprep.subr.bf16.mxu0 %v4265_v16  ;;  %v4285_v29 = vld [vmem:[%s6541_s1 + $0x204] ss:$16 sps:$4 sm:$0xff]   ;;  %v4288_v31 = vld [vmem:[%s6541_s1 + $0x200] ss:$16 sps:$4 sm:$0xff]  }
  0x23   : > { %1796 = vmatprep.subr.bf16.mxu1 %v4267_v17  ;;  %v4289_v32 = vld [vmem:[%s6541_s1 + $0x1e4] ss:$16 sps:$4 sm:$0xff]   ;;  %v4293_v34 = vld [vmem:[%s6541_s1 + $0x1e0] ss:$16 sps:$4 sm:$0xff]   ;;  %v301_v17 = vld [vmem:[%s4937_s22 + $0x88] sm:$0xff] }
  0x24   : > { %v4291_v33 = vld [vmem:[%s6541_s1 + $0x3e4] ss:$16 sps:$4 sm:$0xff]   ;;  %v4294_v35 = vld [vmem:[%s6541_s1 + $0x3e0] ss:$16 sps:$4 sm:$0xff]  }
  0x25   : > { %1684 = vmatpush1.bf16.msra.mxu0 %v4269_v18  ;;  %v4295_v36 = vld [vmem:[%s6541_s1 + $0x1c4] ss:$16 sps:$4 sm:$0xff]   ;;  %v4299_v38 = vld [vmem:[%s6541_s1 + $0x1c0] ss:$16 sps:$4 sm:$0xff]  }
  0x26   : > { %1797 = vmatpush1.bf16.msra.mxu1 %v4270_v19  ;;  %1685 = vmatprep.subr.bf16.mxu0 %v4271_v20  ;;  %v4297_v37 = vld [vmem:[%s6541_s1 + $0x3c4] ss:$16 sps:$4 sm:$0xff]   ;;  %v4300_v39 = vld [vmem:[%s6541_s1 + $0x3c0] ss:$16 sps:$4 sm:$0xff]  }
  0x27   : > { %1798 = vmatprep.subr.bf16.mxu1 %v4273_v21  ;;  %v4301_v40 = vld [vmem:[%s6541_s1 + $0x1a4] ss:$16 sps:$4 sm:$0xff]   ;;  %v4305_v42 = vld [vmem:[%s6541_s1 + $0x1a0] ss:$16 sps:$4 sm:$0xff]  }
  0x28   : > { %v4303_v41 = vld [vmem:[%s6541_s1 + $0x3a4] ss:$16 sps:$4 sm:$0xff]   ;;  %v4306_v43 = vld [vmem:[%s6541_s1 + $0x3a0] ss:$16 sps:$4 sm:$0xff]  }
  0x29   : > { %1686 = vmatpush1.bf16.msra.mxu0 %v4275_v22  ;;  %v4307_v44 = vld [vmem:[%s6541_s1 + $0x184] ss:$16 sps:$4 sm:$0xff]   ;;  %v4311_v50 = vld [vmem:[%s6541_s1 + $0x180] ss:$16 sps:$4 sm:$0xff]  }
  0x2a   : > { %1799 = vmatpush1.bf16.msra.mxu1 %v4276_v23  ;;  %1687 = vmatprep.subr.bf16.mxu0 %v4277_v24  ;;  %v4309_v45 = vld [vmem:[%s6541_s1 + $0x384] ss:$16 sps:$4 sm:$0xff]   ;;  %v4312_v51 = vld [vmem:[%s6541_s1 + $0x380] ss:$16 sps:$4 sm:$0xff]  }
  0x2b   : > { %1800 = vmatprep.subr.bf16.mxu1 %v4279_v25  ;;  %v292_v47 = vld [vmem:[%s4937_s22 + $0x40] sm:$0xff]  ;;  %v294_v49 = vld [vmem:[%s4937_s22 + $0x50] sm:$0xff]  ;;  %v305_v25 = vld [vmem:[%s4937_s22 + $0xa8] sm:$0xff] }
  0x2c   : > { %v4313_v52 = vld [vmem:[%s6541_s1 + $0x164] ss:$16 sps:$4 sm:$0xff]   ;;  %v4958_v53 = vpack.c.bf16 %v292_v47, %v285_v46  ;;  %v4960_v54 = vpack.c.bf16 %v294_v49, %v287_v48  ;;  %v4317_v56 = vld [vmem:[%s6541_s1 + $0x160] ss:$16 sps:$4 sm:$0xff]   ;;  %v329_v47 = vld [vmem:[%s4937_s22 + $0x168] sm:$0xff] }
  0x2d   : > { %1688 = vmatpush1.bf16.msra.mxu0 %v4281_v26  ;;  %v4315_v55 = vld [vmem:[%s6541_s1 + $0x364] ss:$16 sps:$4 sm:$0xff]   ;;  %v4318_v57 = vld [vmem:[%s6541_s1 + $0x360] ss:$16 sps:$4 sm:$0xff]  }
  0x2e   : > { %1801 = vmatpush1.bf16.msra.mxu1 %v4282_v27  ;;  %1689 = vmatprep.subr.bf16.mxu0 %v4283_v28  ;;  %v4319_v58 = vld [vmem:[%s6541_s1 + $0x144] ss:$16 sps:$4 sm:$0xff]   ;;  %v4323_v60 = vld [vmem:[%s6541_s1 + $0x140] ss:$16 sps:$4 sm:$0xff]   ;;  %v307_v27 = vld [vmem:[%s4937_s22 + $0xb8] sm:$0xff] }
  0x2f   : > { %1802 = vmatprep.subr.bf16.mxu1 %v4285_v29  ;;  %1707 = vmatprep.mubr.bf16.mxu0 %v4958_v53  ;;  %v4321_v59 = vld [vmem:[%s6541_s1 + $0x344] ss:$16 sps:$4 sm:$0xff]   ;;  %v4324_v61 = vld [vmem:[%s6541_s1 + $0x340] ss:$16 sps:$4 sm:$0xff]   ;;  %v313_v29 = vld [vmem:[%s4937_s22 + $0xe8] sm:$0xff] }
  0x30   : > { %1820 = vmatprep.mubr.bf16.mxu1 %v4960_v54  ;;  %v4325_v62 = vld [vmem:[%s6541_s1 + $0x124] ss:$16 sps:$4 sm:$0xff]   ;;  %v4329_v0 = vld [vmem:[%s6541_s1 + $0x120] ss:$16 sps:$4 sm:$0xff]  }
  0x31   : > { %1690 = vmatpush1.bf16.msra.mxu0 %v4287_v30  ;;  %v4327_v63 = vld [vmem:[%s6541_s1 + $0x324] ss:$16 sps:$4 sm:$0xff]   ;;  %v4330_v1 = vld [vmem:[%s6541_s1 + $0x320] ss:$16 sps:$4 sm:$0xff]  }
  0x32   : > { %1803 = vmatpush1.bf16.msra.mxu1 %v4288_v31  ;;  %1691 = vmatprep.subr.bf16.mxu0 %v4289_v32  ;;  %v4331_v2 = vld [vmem:[%s6541_s1 + $0x104] ss:$16 sps:$4 sm:$0xff]   ;;  %v4335_v4 = vld [vmem:[%s6541_s1 + $0x100] ss:$16 sps:$4 sm:$0xff]   ;;  %v315_v31 = vld [vmem:[%s4937_s22 + $0xf8] sm:$0xff] }
  0x33   : > { %1804 = vmatprep.subr.bf16.mxu1 %v4291_v33  ;;  %v4333_v3 = vld [vmem:[%s6541_s1 + $0x304] ss:$16 sps:$4 sm:$0xff]   ;;  %v4336_v5 = vld [vmem:[%s6541_s1 + $0x300] ss:$16 sps:$4 sm:$0xff]  }
  0x34   : > { %v284_v6 = vld [vmem:[%s4937_s22] sm:$0xff]  ;;  %v286_v8 = vld [vmem:[%s4937_s22 + $0x10] sm:$0xff] }
  0x35   : > { %1692 = vmatpush2.bf16.msra.mxu0 %v4293_v34  ;;  %v4339_v10 = vld [vmem:[%s6541_s1 + $0x4e4] ss:$16 sps:$4 sm:$0xff]   ;;  %v4337_v12 = vld [vmem:[%s6541_s1 + $0x4e0] ss:$16 sps:$4 sm:$0xff]   ;;  %v5024_v15 = vpack.c.bf16 %v291_v7, %v284_v6  ;;  %v5026_v16 = vpack.c.bf16 %v293_v9, %v286_v8 }
  0x36   : > { %1805 = vmatpush2.bf16.msra.mxu1 %v4294_v35  ;;  %1693 = vmatprep.subr.bf16.mxu0 %v4295_v36  ;;  %v4342_v11 = vld [vmem:[%s6541_s1 + $0x604] ss:$16 sps:$4 sm:$0xff]   ;;  %v4340_v19 = vld [vmem:[%s6541_s1 + $0x600] ss:$16 sps:$4 sm:$0xff]  }
  0x37   : > { %1806 = vmatprep.subr.bf16.mxu1 %v4297_v37  ;;  %v306_v14 = vld [vmem:[%s4937_s22 + $0xb0] sm:$0xff]  ;;  %v308_v18 = vld [vmem:[%s4937_s22 + $0xc0] sm:$0xff] }
  0x38   : > { %v4345_v20 = vld [vmem:[%s6541_s1 + $0x4c4] ss:$16 sps:$4 sm:$0xff]   ;;  %v5036_v21 = vpack.c.bf16 %v306_v14, %v299_v13  ;;  %v4343_v22 = vld [vmem:[%s6541_s1 + $0x4c0] ss:$16 sps:$4 sm:$0xff]   ;;  %v5041_v23 = vpack.c.bf16 %v308_v18, %v301_v17  ;;  %v4393_v13 = vld [vmem:[%s6541_s1 + $0x2ec] ss:$16 sps:$4 sm:$0xff]  }
  0x39   : > { %1694 = vmatpush2.bf16.msra.mxu0 %v4299_v38  ;;  %v298_v24 = vld [vmem:[%s4937_s22 + $0x70] sm:$0xff]  ;;  %v300_v26 = vld [vmem:[%s4937_s22 + $0x80] sm:$0xff]  ;;  %v349_v14 = vld [vmem:[%s4937_s22 + $0x208] sm:$0xff] }
  0x3a   : > { %1807 = vmatpush2.bf16.msra.mxu1 %v4300_v39  ;;  %1695 = vmatprep.subr.bf16.mxu0 %v4301_v40  ;;  %v4348_v28 = vld [vmem:[%s6541_s1 + $0x4a4] ss:$16 sps:$4 sm:$0xff]   ;;  %v5058_v33 = vpack.c.bf16 %v305_v25, %v298_v24  ;;  %v5060_v34 = vpack.c.bf16 %v307_v27, %v300_v26  ;;  %v4346_v35 = vld [vmem:[%s6541_s1 + $0x4a0] ss:$16 sps:$4 sm:$0xff]   ;;  %v355_v18 = vld [vmem:[%s4937_s22 + $0x238] sm:$0xff] }
  0x3b   : > { %1808 = vmatprep.subr.bf16.mxu1 %v4303_v41  ;;  %v320_v30 = vld [vmem:[%s4937_s22 + $0x120] sm:$0xff]  ;;  %v322_v32 = vld [vmem:[%s4937_s22 + $0x130] sm:$0xff]  ;;  %v319_v41 = vld [vmem:[%s4937_s22 + $0x118] sm:$0xff] }
  0x3c   : > { %v5065_v36 = vpack.c.bf16 %v320_v30, %v313_v29  ;;  %v4351_v37 = vld [vmem:[%s6541_s1 + $0x484] ss:$16 sps:$4 sm:$0xff]   ;;  %v5070_v38 = vpack.c.bf16 %v322_v32, %v315_v31  ;;  %v4349_v39 = vld [vmem:[%s6541_s1 + $0x480] ss:$16 sps:$4 sm:$0xff]   ;;  %v361_v32 = vld [vmem:[%s4937_s22 + $0x268] sm:$0xff] }
  0x3d   : > { %1696 = vmatpush2.bf16.msra.mxu0 %v4305_v42  ;;  %v312_v40 = vld [vmem:[%s4937_s22 + $0xe0] sm:$0xff]  ;;  %v314_v42 = vld [vmem:[%s4937_s22 + $0xf0] sm:$0xff] }
  0x3e   : > { %1809 = vmatpush2.bf16.msra.mxu1 %v4306_v43  ;;  %1697 = vmatprep.subr.bf16.mxu0 %v4307_v44  ;;  %v321_v43 = vld [vmem:[%s4937_s22 + $0x128] sm:$0xff]  ;;  %v4354_v44 = vld [vmem:[%s6541_s1 + $0x464] ss:$16 sps:$4 sm:$0xff]   ;;  %v5090_v49 = vpack.c.bf16 %v319_v41, %v312_v40  ;;  %v4361_v9 = vld [vmem:[%s6541_s1 + $0x400] ss:$16 sps:$4 sm:$0xff]  }
  0x3f   : > { %1810 = vmatprep.subr.bf16.mxu1 %v4309_v45  ;;  %v327_v45 = vld [vmem:[%s4937_s22 + $0x158] sm:$0xff]  ;;  %v334_v46 = vld [vmem:[%s4937_s22 + $0x190] sm:$0xff]  ;;  %v336_v48 = vld [vmem:[%s4937_s22 + $0x1a0] sm:$0xff] }
  0x40   : > { %v4363_v7 = vld [vmem:[%s6541_s1 + $0x404] ss:$16 sps:$4 sm:$0xff]   ;;  %v4364_v26 = vld [vmem:[%s6541_s1 + $0x5e0] ss:$16 sps:$4 sm:$0xff]   ;;  %v369_v40 = vld [vmem:[%s4937_s22 + $0x2a8] sm:$0xff] }
  0x41   : > { %1698 = vmatpush2.bf16.msra.mxu0 %v4311_v50  ;;  %v5092_v50 = vpack.c.bf16 %v321_v43, %v314_v42  ;;  %v4366_v17 = vld [vmem:[%s6541_s1 + $0x5e4] ss:$16 sps:$4 sm:$0xff]   ;;  %v4367_v30 = vld [vmem:[%s6541_s1 + $0x5c0] ss:$16 sps:$4 sm:$0xff]   ;;  %v371_v42 = vld [vmem:[%s4937_s22 + $0x2b8] sm:$0xff] }
  0x42   : > { %1811 = vmatpush2.bf16.msra.mxu1 %v4312_v51  ;;  %1699 = vmatprep.subr.bf16.mxu0 %v4313_v52  ;;  %v4352_v51 = vld [vmem:[%s6541_s1 + $0x460] ss:$16 sps:$4 sm:$0xff]   ;;  %v5097_v52 = vpack.c.bf16 %v334_v46, %v327_v45 }
  0x43   : > { %1812 = vmatprep.subr.bf16.mxu1 %v4315_v55  ;;  %v4357_v55 = vld [vmem:[%s6541_s1 + $0x444] ss:$16 sps:$4 sm:$0xff]   ;;  %v4370_v46 = vld [vmem:[%s6541_s1 + $0x5a0] ss:$16 sps:$4 sm:$0xff]  }
  0x44   : > { %v354_v31 = vld [vmem:[%s4937_s22 + $0x230] sm:$0xff]  ;;  %v376_v41 = vld [vmem:[%s4937_s22 + $0x2e0] sm:$0xff] }
  0x45   : > { %1700 = vmatpush2.bf16.msra.mxu0 %v4317_v56  ;;  %v5102_v56 = vpack.c.bf16 %v336_v48, %v329_v47  ;;  %v378_v43 = vld [vmem:[%s4937_s22 + $0x2f0] sm:$0xff]  ;;  %v5196_v47 = vpack.c.bf16 %v376_v41, %v369_v40  ;;  %v297_v41 = vld [vmem:[%s4937_s22 + $0x68] sm:$0xff] }
  0x46   : > { %1813 = vmatpush2.bf16.msra.mxu1 %v4318_v57  ;;  %1701 = vmatprep.subr.bf16.mxu0 %v4319_v58  ;;  %v4355_v57 = vld [vmem:[%s6541_s1 + $0x440] ss:$16 sps:$4 sm:$0xff]   ;;  %v4375_v48 = vld [vmem:[%s6541_s1 + $0x584] ss:$16 sps:$4 sm:$0xff]  }
  0x47   : > { %1814 = vmatprep.subr.bf16.mxu1 %v4321_v59  ;;  %v326_v58 = vld [vmem:[%s4937_s22 + $0x150] sm:$0xff]  ;;  %v333_v59 = vld [vmem:[%s4937_s22 + $0x188] sm:$0xff] }
  0x48   : > { %v290_v40 = vld [vmem:[%s4937_s22 + $0x30] sm:$0xff] }
  0x49   : > { %1702 = vmatpush2.bf16.msra.mxu0 %v4323_v60  ;;  %v328_v60 = vld [vmem:[%s4937_s22 + $0x160] sm:$0xff] }
  0x4a   : > { %1815 = vmatpush2.bf16.msra.mxu1 %v4324_v61  ;;  %1703 = vmatprep.subr.bf16.mxu0 %v4325_v62  ;;  %v335_v61 = vld [vmem:[%s4937_s22 + $0x198] sm:$0xff]  ;;  %v4360_v62 = vld [vmem:[%s6541_s1 + $0x424] ss:$16 sps:$4 sm:$0xff]  }
  0x4b   : > { %1816 = vmatprep.subr.bf16.mxu1 %v4327_v63  ;;  %v341_v63 = vld [vmem:[%s4937_s22 + $0x1c8] sm:$0xff] }
  0x4d   : > { %1704 = vmatpush2.bf16.msra.mxu0 %v4329_v0  ;;  %v348_v0 = vld [vmem:[%s4937_s22 + $0x200] sm:$0xff] }
  0x4e   : > { %1817 = vmatpush2.bf16.msra.mxu1 %v4330_v1  ;;  %1705 = vmatprep.subr.bf16.mxu0 %v4331_v2  ;;  %v343_v1 = vld [vmem:[%s4937_s22 + $0x1d8] sm:$0xff]  ;;  %v350_v2 = vld [vmem:[%s4937_s22 + $0x210] sm:$0xff]  ;;  %v5129_v6 = vpack.c.bf16 %v348_v0, %v341_v63  ;;  %v385_v0 = vld [vmem:[%s4937_s22 + $0x328] sm:$0xff] }
  0x4f   : > { %1818 = vmatprep.subr.bf16.mxu1 %v4333_v3  ;;  %v5122_v3 = vpack.c.bf16 %v333_v59, %v326_v58  ;;  %v5134_v8 = vpack.c.bf16 %v350_v2, %v343_v1  ;;  %v375_v58 = vld [vmem:[%s4937_s22 + $0x2d8] sm:$0xff]  ;;  %v370_v59 = vld [vmem:[%s4937_s22 + $0x2b0] sm:$0xff]  ;;  %v392_v1 = vld [vmem:[%s4937_s22 + $0x360] sm:$0xff] }
  0x50   : > { %v390_v63 = vld [vmem:[%s4937_s22 + $0x350] sm:$0xff] }
  0x51   : > { %1706 = vmatpush2.bf16.msra.mxu0 %v4335_v4  ;;  %v5124_v4 = vpack.c.bf16 %v335_v61, %v328_v60  ;;  %v377_v60 = vld [vmem:[%s4937_s22 + $0x2e8] sm:$0xff]  ;;  %v4378_v61 = vld [vmem:[%s6541_s1 + $0x564] ss:$16 sps:$4 sm:$0xff]  }
  0x52   : > { %1819 = vmatpush2.bf16.msra.mxu1 %v4336_v5  ;;  %1901 = vmatprep.subr.bf16.mxu0 %v4339_v10  ;;  %v4358_v5 = vld [vmem:[%s6541_s1 + $0x420] ss:$16 sps:$4 sm:$0xff]  }
  0x53   : > { %2028 = vmatprep.subr.bf16.mxu1 %v4342_v11  ;;  %v340_v10 = vld [vmem:[%s4937_s22 + $0x1c0] sm:$0xff]  ;;  %v347_v11 = vld [vmem:[%s4937_s22 + $0x1f8] sm:$0xff] }
  0x54   : > { %1708 = vmatmul.mubr.bf16.vlgmr.msra.gmra.mxu0 %v5024_v15  ;;  %v5157_v24 = vpack.c.bf16 %v347_v11, %v340_v10  ;;  %v4381_v10 = vld [vmem:[%s6541_s1 + $0x544] ss:$16 sps:$4 sm:$0xff]   ;;  %v5233_v11 = vpack.c.bf16 %v392_v1, %v385_v0  ;;  %v4397_v0 = vld [vmem:[%s6541_s1 + $0x2c8] ss:$16 sps:$4 sm:$0xff]  }
  0x55   : > { %1821 = vmatmul.mubr.bf16.vlgmr.msra.gmra.mxu1 %v5026_v16  ;;  %1902 = vmatpush1.bf16.msra.mxu0 %v4337_v12  ;;  %v342_v12 = vld [vmem:[%s4937_s22 + $0x1d0] sm:$0xff] }
  0x56   : > { %2029 = vmatpush1.bf16.msra.mxu1 %v4340_v19  ;;  %1903 = vmatprep.subr.bf16.mxu0 %v4345_v20  ;;  %v362_v19 = vld [vmem:[%s4937_s22 + $0x270] sm:$0xff]  ;;  %v357_v20 = vld [vmem:[%s4937_s22 + $0x248] sm:$0xff]  ;;  %v5159_v25 = vpack.c.bf16 %v349_v14, %v342_v12 }
  0x57   : > { %1717 = vmatprep.mubr.bf16.mxu0 %v5036_v21  ;;  %1830 = vmatprep.mubr.bf16.mxu1 %v5041_v23  ;;  %v5164_v27 = vpack.c.bf16 %v362_v19, %v355_v18  ;;  %v4379_v12 = vld [vmem:[%s6541_s1 + $0x540] ss:$16 sps:$4 sm:$0xff]   ;;  %v389_v14 = vld [vmem:[%s4937_s22 + $0x348] sm:$0xff]  ;;  %v391_v18 = vld [vmem:[%s4937_s22 + $0x358] sm:$0xff] }
  0x58   : > { %2240 = vmatprep.subr.bf16.mxu1 %v4393_v13  ;;  %v382_v13 = vld [vmem:[%s4937_s22 + $0x310] sm:$0xff] }
  0x59   : > { %1904 = vmatpush1.bf16.msra.mxu0 %v4343_v22  ;;  %v364_v22 = vld [vmem:[%s4937_s22 + $0x280] sm:$0xff]  ;;  %v302_v1 = vld [vmem:[%s4937_s22 + $0x90] sm:$0xff] }
  0x5a   : > { %1905 = vmatprep.subr.bf16.mxu0 %v4348_v28  ;;  %v4369_v28 = vld [vmem:[%s6541_s1 + $0x5c4] ss:$16 sps:$4 sm:$0xff]   ;;  %v5169_v29 = vpack.c.bf16 %v364_v22, %v357_v20  ;;  %v289_v20 = vld [vmem:[%s4937_s22 + $0x28] sm:$0xff] }
  0x5b   : > { %v4384_v19 = vld [vmem:[%s6541_s1 + $0x524] ss:$16 sps:$4 sm:$0xff]  }
  0x5c   : > { %1718 = vmatmul.mubr.bf16.gmra.mxu0 %v5058_v33  ;;  %v296_v22 = vld [vmem:[%s4937_s22 + $0x60] sm:$0xff] }
  0x5d   : > { %1831 = vmatmul.mubr.bf16.gmra.mxu1 %v5060_v34  ;;  %1906 = vmatpush1.bf16.msra.mxu0 %v4346_v35  ;;  %v356_v35 = vld [vmem:[%s4937_s22 + $0x240] sm:$0xff] }
  0x5e   : > { %1727 = vmatprep.mubr.bf16.mxu0 %v5065_v36  ;;  %1907 = vmatprep.subr.bf16.mxu0 %v4351_v37  ;;  %v363_v37 = vld [vmem:[%s4937_s22 + $0x278] sm:$0xff] }
  0x5f   : > { %1840 = vmatprep.mubr.bf16.mxu1 %v5070_v38  ;;  %v5191_v45 = vpack.c.bf16 %v363_v37, %v356_v35  ;;  %v4385_v35 = vld [vmem:[%s6541_s1 + $0x500] ss:$16 sps:$4 sm:$0xff]  }
  0x60   : > { %v288_v37 = vld [vmem:[%s4937_s22 + $0x20] sm:$0xff] }
  0x61   : > { %1908 = vmatpush1.bf16.msra.mxu0 %v4349_v39  ;;  %v4372_v39 = vld [vmem:[%s6541_s1 + $0x5a4] ss:$16 sps:$4 sm:$0xff]  }
  0x62   : > { %1909 = vmatprep.subr.bf16.mxu0 %v4354_v44  ;;  %v5189_v44 = vpack.c.bf16 %v361_v32, %v354_v31  ;;  %v5258_v31 = vpack.c.bf16 %v296_v22, %v289_v20  ;;  %v4387_v32 = vld [vmem:[%s6541_s1 + $0x504] ss:$16 sps:$4 sm:$0xff]   ;;  %v4400_v22 = vld [vmem:[%s6541_s1 + $0xa8] ss:$16 sps:$4 sm:$0xff]  }
  0x63   : > { %v324_v20 = vld [vmem:[%s4937_s22 + $0x140] sm:$0xff] }
  0x64   : > { %1728 = vmatmul.mubr.bf16.gmra.mxu0 %v5090_v49 }
  0x65   : > { %1841 = vmatmul.mubr.bf16.gmra.mxu1 %v5092_v50  ;;  %1910 = vmatpush1.bf16.msra.mxu0 %v4352_v51  ;;  %v5201_v51 = vpack.c.bf16 %v378_v43, %v371_v42  ;;  %v6549_v42 = vmov 0   ;;  %v4390_v43 = vld [vmem:[%s6541_s1 + $0xec] ss:$16 sps:$4 sm:$0xff]  }
  0x66   : > { %1737 = vmatprep.mubr.bf16.mxu0 %v5097_v52  ;;  %1911 = vmatprep.subr.bf16.mxu0 %v4357_v55  ;;  %v4373_v55 = vld [vmem:[%s6541_s1 + $0x580] ss:$16 sps:$4 sm:$0xff]  }
  0x67   : > { %1850 = vmatprep.mubr.bf16.mxu1 %v5102_v56 }
  0x69   : > { %1912 = vmatpush1.bf16.msra.mxu0 %v4355_v57  ;;  %v368_v57 = vld [vmem:[%s4937_s22 + $0x2a0] sm:$0xff] }
  0x6a   : > { %1913 = vmatprep.subr.bf16.mxu0 %v4360_v62  ;;  %v383_v62 = vld [vmem:[%s4937_s22 + $0x318] sm:$0xff]  ;;  %v5221_v2 = vpack.c.bf16 %v375_v58, %v368_v57  ;;  %v5285_v57 = vpack.c.bf16 %v297_v41, %v290_v40  ;;  %v316_v41 = vld [vmem:[%s4937_s22 + $0x100] sm:$0xff] }
  0x6b   : > { %v303_v58 = vld [vmem:[%s4937_s22 + $0x98] sm:$0xff] }
  0x6c   : > { %1738 = vmatmul.mubr.bf16.gmra.mxu0 %v5122_v3 }
  0x6d   : > { %1851 = vmatmul.mubr.bf16.gmra.mxu1 %v5124_v4  ;;  %1914 = vmatpush1.bf16.msra.mxu0 %v4358_v5  ;;  %v5223_v5 = vpack.c.bf16 %v377_v60, %v370_v59  ;;  %v310_v59 = vld [vmem:[%s4937_s22 + $0xd0] sm:$0xff]  ;;  %v4396_v60 = vld [vmem:[%s6541_s1 + $0xcc] ss:$16 sps:$4 sm:$0xff]  }
  0x6e   : > { %1747 = vmatprep.mubr.bf16.mxu0 %v5129_v6  ;;  %1915 = vmatprep.subr.bf16.mxu0 %v4363_v7  ;;  %v4376_v7 = vld [vmem:[%s6541_s1 + $0x560] ss:$16 sps:$4 sm:$0xff]  }
  0x6f   : > { %1860 = vmatprep.mubr.bf16.mxu1 %v5134_v8 }
  0x71   : > { %1916 = vmatpush1.bf16.msra.mxu0 %v4361_v9  ;;  %v5228_v9 = vpack.c.bf16 %v390_v63, %v383_v62  ;;  %v4394_v62 = vld [vmem:[%s6541_s1 + $0xc8] ss:$16 sps:$4 sm:$0xff]   ;;  %v5298_v63 = vpack.c.bf16 %v310_v59, %v303_v58  ;;  %v4414_v58 = vld [vmem:[%s6541_s1 + $0x6c] ss:$16 sps:$4 sm:$0xff]  }
  0x72   : > { %1917 = vmatprep.subr.bf16.mxu0 %v4366_v17  ;;  %v384_v17 = vld [vmem:[%s4937_s22 + $0x320] sm:$0xff]  ;;  %v4417_v59 = vld [vmem:[%s6541_s1 + $0x26c] ss:$16 sps:$4 sm:$0xff]  }
  0x74   : > { %1748 = vmatmul.mubr.bf16.gmra.mxu0 %v5157_v24 }
  0x75   : > { %1861 = vmatmul.mubr.bf16.gmra.mxu1 %v5159_v25  ;;  %1918 = vmatpush2.bf16.msra.mxu0 %v4364_v26  ;;  %v5251_v26 = vpack.c.bf16 %v389_v14, %v382_v13  ;;  %v4402_v13 = vld [vmem:[%s6541_s1 + $0xac] ss:$16 sps:$4 sm:$0xff]  }
  0x76   : > { %1757 = vmatprep.mubr.bf16.mxu0 %v5164_v27  ;;  %1919 = vmatprep.subr.bf16.mxu0 %v4369_v28  ;;  %v5253_v28 = vpack.c.bf16 %v391_v18, %v384_v17  ;;  %v4405_v14 = vld [vmem:[%s6541_s1 + $0x2ac] ss:$16 sps:$4 sm:$0xff]  }
  0x77   : > { %1870 = vmatprep.mubr.bf16.mxu1 %v5169_v29  ;;  %v317_v17 = vld [vmem:[%s4937_s22 + $0x108] sm:$0xff] }
  0x78   : > { %v5342_v40 = vpack.c.bf16 %v324_v20, %v317_v17  ;;  %v330_v20 = vld [vmem:[%s4937_s22 + $0x170] sm:$0xff] }
  0x79   : > { %1920 = vmatpush2.bf16.msra.mxu0 %v4367_v30  ;;  %v4382_v30 = vld [vmem:[%s6541_s1 + $0x520] ss:$16 sps:$4 sm:$0xff]  }
  0x7a   : > { %1921 = vmatprep.subr.bf16.mxu0 %v4372_v39  ;;  %v295_v39 = vld [vmem:[%s4937_s22 + $0x58] sm:$0xff] }
  0x7c   : > { %1758 = vmatmul.mubr.bf16.gmra.mxu0 %v5189_v44 }
  0x7d   : > { %1871 = vmatmul.mubr.bf16.gmra.mxu1 %v5191_v45  ;;  %1922 = vmatpush2.bf16.msra.mxu0 %v4370_v46  ;;  %v4388_v46 = vld [vmem:[%s6541_s1 + $0xe8] ss:$16 sps:$4 sm:$0xff]  }
  0x7e   : > { %1767 = vmatprep.mubr.bf16.mxu0 %v5196_v47  ;;  %1923 = vmatprep.subr.bf16.mxu0 %v4375_v48  ;;  %v4391_v48 = vld [vmem:[%s6541_s1 + $0x2e8] ss:$16 sps:$4 sm:$0xff]  }
  0x7f   : > { %1880 = vmatprep.mubr.bf16.mxu1 %v5201_v51 }
  0x81   : > { %1924 = vmatpush2.bf16.msra.mxu0 %v4373_v55  ;;  %v5283_v55 = vpack.c.bf16 %v295_v39, %v288_v37  ;;  %v4406_v37 = vld [vmem:[%s6541_s1 + $0x88] ss:$16 sps:$4 sm:$0xff]  }
  0x82   : > { %1925 = vmatprep.subr.bf16.mxu0 %v4378_v61  ;;  %v4399_v61 = vld [vmem:[%s6541_s1 + $0x2cc] ss:$16 sps:$4 sm:$0xff]   ;;  %v4409_v39 = vld [vmem:[%s6541_s1 + $0x288] ss:$16 sps:$4 sm:$0xff]  }
  0x84   : > { %1768 = vmatmul.mubr.bf16.gmra.mxu0 %v5221_v2 }
  0x85   : > { %1881 = vmatmul.mubr.bf16.gmra.mxu1 %v5223_v5  ;;  %1926 = vmatpush2.bf16.msra.mxu0 %v4376_v7  ;;  %v309_v7 = vld [vmem:[%s4937_s22 + $0xc8] sm:$0xff] }
  0x86   : > { %1777 = vmatprep.mubr.bf16.mxu0 %v5228_v9  ;;  %1927 = vmatprep.subr.bf16.mxu0 %v4381_v10  ;;  %v304_v10 = vld [vmem:[%s4937_s22 + $0xa0] sm:$0xff]  ;;  %v5319_v18 = vpack.c.bf16 %v309_v7, %v302_v1  ;;  %v331_v1 = vld [vmem:[%s4937_s22 + $0x178] sm:$0xff]  ;;  %v338_v7 = vld [vmem:[%s4937_s22 + $0x1b0] sm:$0xff] }
  0x87   : > { %1890 = vmatprep.mubr.bf16.mxu1 %v5233_v11  ;;  %v5383_v17 = vpack.c.bf16 %v338_v7, %v331_v1  ;;  %v4433_v1 = vld [vmem:[%s6541_s1 + $0x208] ss:$16 sps:$4 sm:$0xff]  }
  0x89   : > { %1928 = vmatpush2.bf16.msra.mxu0 %v4379_v12  ;;  %v311_v12 = vld [vmem:[%s4937_s22 + $0xd8] sm:$0xff] }
  0x8a   : > { %1929 = vmatprep.subr.bf16.mxu0 %v4384_v19  ;;  %v5321_v19 = vpack.c.bf16 %v311_v12, %v304_v10  ;;  %v4420_v10 = vld [vmem:[%s6541_s1 + $0x4c] ss:$16 sps:$4 sm:$0xff]  }
  0x8b   : > { %v4423_v12 = vld [vmem:[%s6541_s1 + $0x24c] ss:$16 sps:$4 sm:$0xff]  }
  0x8c   : > { %1778 = vmatmul.mubr.bf16.gmra.mxu0 %v5251_v26 }
  0x8d   : > { %1891 = vmatmul.mubr.bf16.gmra.mxu1 %v5253_v28  ;;  %1930 = vmatpush2.bf16.msra.mxu0 %v4382_v30  ;;  %v4403_v30 = vld [vmem:[%s6541_s1 + $0x2a8] ss:$16 sps:$4 sm:$0xff]  }
  0x8e   : > { %1933 = vmatprep.mubr.bf16.mxu0 %v5258_v31  ;;  %1931 = vmatprep.subr.bf16.mxu0 %v4387_v32  ;;  %v4408_v32 = vld [vmem:[%s6541_s1 + $0x8c] ss:$16 sps:$4 sm:$0xff]  }
  0x8f   : > { %2046 = vmatprep.mubr.bf16.mxu1 %v6549_v42 }
  0x91   : > { %1932 = vmatpush2.bf16.msra.mxu0 %v4385_v35  ;;  %v4411_v35 = vld [vmem:[%s6541_s1 + $0x28c] ss:$16 sps:$4 sm:$0xff]  }
  0x92   : > { %2127 = vmatprep.subr.bf16.mxu0 %v4390_v43  ;;  %v323_v43 = vld [vmem:[%s4937_s22 + $0x138] sm:$0xff] }
  0x94   : > { %1934 = vmatmul.mubr.bf16.vlgmr.msra.gmra.mxu0 %v5283_v55 }
  0x95   : > { %3936 = vmatmul.mubr.msk.bf16.vlgmr.msra.gmra.mxu1 %vm1650_vm0, %v5285_v57  ;;  %2128 = vmatpush1.bf16.msra.mxu0 %v4388_v46  ;;  %v318_v46 = vld [vmem:[%s4937_s22 + $0x110] sm:$0xff] }
  0x96   : > { %2241 = vmatpush1.bf16.msra.mxu1 %v4391_v48  ;;  %2129 = vmatprep.subr.bf16.mxu0 %v4396_v60  ;;  %v325_v48 = vld [vmem:[%s4937_s22 + $0x148] sm:$0xff] }
  0x97   : > { %2242 = vmatprep.subr.bf16.mxu1 %v4399_v61  ;;  %1943 = vmatprep.mubr.bf16.mxu0 %v5298_v63  ;;  %v4412_v60 = vld [vmem:[%s6541_s1 + $0x68] ss:$16 sps:$4 sm:$0xff]  }
  0x98   : > { %2056 = vmatprep.mubr.bf16.mxu1 %v6549_v42  ;;  %v4415_v61 = vld [vmem:[%s6541_s1 + $0x268] ss:$16 sps:$4 sm:$0xff]  }
  0x99   : > { %2130 = vmatpush1.bf16.msra.mxu0 %v4394_v62  ;;  %v5365_v62 = vpack.c.bf16 %v323_v43, %v316_v41  ;;  %v4427_v41 = vld [vmem:[%s6541_s1 + $0x228] ss:$16 sps:$4 sm:$0xff]  }
  0x9a   : > { %2243 = vmatpush1.bf16.msra.mxu1 %v4397_v0  ;;  %2131 = vmatprep.subr.bf16.mxu0 %v4402_v13  ;;  %v5367_v0 = vpack.c.bf16 %v325_v48, %v318_v46  ;;  %v4418_v13 = vld [vmem:[%s6541_s1 + $0x48] ss:$16 sps:$4 sm:$0xff]  }
  0x9b   : > { %2244 = vmatprep.subr.bf16.mxu1 %v4405_v14  ;;  %v4421_v14 = vld [vmem:[%s6541_s1 + $0x248] ss:$16 sps:$4 sm:$0xff]  }
  0x9c   : > { %1944 = vmatmul.mubr.bf16.gmra.mxu0 %v5319_v18  ;;  %v345_v48 = vld [vmem:[%s4937_s22 + $0x1e8] sm:$0xff] }
  0x9d   : > { %3937 = vmatmul.mubr.msk.bf16.gmra.mxu1 %vm1650_vm0, %v5321_v19  ;;  %2132 = vmatpush1.bf16.msra.mxu0 %v4400_v22  ;;  %v337_v22 = vld [vmem:[%s4937_s22 + $0x1a8] sm:$0xff] }
  0x9e   : > { %2245 = vmatpush1.bf16.msra.mxu1 %v4403_v30  ;;  %2133 = vmatprep.subr.bf16.mxu0 %v4408_v32  ;;  %v332_v30 = vld [vmem:[%s4937_s22 + $0x180] sm:$0xff]  ;;  %v339_v32 = vld [vmem:[%s4937_s22 + $0x1b8] sm:$0xff]  ;;  %v5406_v43 = vpack.c.bf16 %v337_v22, %v330_v20 }
  0x9f   : > { %2246 = vmatprep.subr.bf16.mxu1 %v4411_v35  ;;  %1953 = vmatprep.mubr.bf16.mxu0 %v5342_v40  ;;  %v4426_v35 = vld [vmem:[%s6541_s1 + $0x2c] ss:$16 sps:$4 sm:$0xff]   ;;  %v5408_v46 = vpack.c.bf16 %v339_v32, %v332_v30  ;;  %v4436_v30 = vld [vmem:[%s6541_s1 + $0x1e8] ss:$16 sps:$4 sm:$0xff]  }
  0xa0   : > { %2066 = vmatprep.mubr.bf16.mxu1 %v6549_v42  ;;  %v4438_v20 = vld [vmem:[%s6541_s1 + $0x1ec] ss:$16 sps:$4 sm:$0xff]   ;;  %v4439_v32 = vld [vmem:[%s6541_s1 + $0x3e8] ss:$16 sps:$4 sm:$0xff]  }
  0xa1   : > { %2134 = vmatpush1.bf16.msra.mxu0 %v4406_v37  ;;  %v4429_v37 = vld [vmem:[%s6541_s1 + $0x22c] ss:$16 sps:$4 sm:$0xff]  }
  0xa2   : > { %2247 = vmatpush1.bf16.msra.mxu1 %v4409_v39  ;;  %2135 = vmatprep.subr.bf16.mxu0 %v4414_v58  ;;  %v4424_v39 = vld [vmem:[%s6541_s1 + $0x28] ss:$16 sps:$4 sm:$0xff]   ;;  %v352_v58 = vld [vmem:[%s4937_s22 + $0x220] sm:$0xff]  ;;  %v4441_v22 = vld [vmem:[%s6541_s1 + $0x3ec] ss:$16 sps:$4 sm:$0xff]  }
  0xa3   : > { %2248 = vmatprep.subr.bf16.mxu1 %v4417_v59  ;;  %v4432_v59 = vld [vmem:[%s6541_s1 + $0xc] ss:$16 sps:$4 sm:$0xff]   ;;  %v5424_v7 = vpack.c.bf16 %v352_v58, %v345_v48 }
  0xa4   : > { %1954 = vmatmul.mubr.bf16.gmra.mxu0 %v5365_v62  ;;  %v4444_v48 = vld [vmem:[%s6541_s1 + $0x1cc] ss:$16 sps:$4 sm:$0xff]  }
  0xa5   : > { %3938 = vmatmul.mubr.msk.bf16.gmra.mxu1 %vm1650_vm0, %v5367_v0  ;;  %2136 = vmatpush1.bf16.msra.mxu0 %v4412_v60  ;;  %v4435_v60 = vld [vmem:[%s6541_s1 + $0x20c] ss:$16 sps:$4 sm:$0xff]  }
  0xa6   : > { %2249 = vmatpush1.bf16.msra.mxu1 %v4415_v61  ;;  %2137 = vmatprep.subr.bf16.mxu0 %v4420_v10  ;;  %v4430_v61 = vld [vmem:[%s6541_s1 + $0x8] ss:$16 sps:$4 sm:$0xff]   ;;  %v344_v10 = vld [vmem:[%s4937_s22 + $0x1e0] sm:$0xff]  ;;  %v4447_v58 = vld [vmem:[%s6541_s1 + $0x3cc] ss:$16 sps:$4 sm:$0xff]  }
  0xa7   : > { %2250 = vmatprep.subr.bf16.mxu1 %v4423_v12  ;;  %1963 = vmatprep.mubr.bf16.mxu0 %v5383_v17  ;;  %v351_v12 = vld [vmem:[%s4937_s22 + $0x218] sm:$0xff] }
  0xa8   : > { %2076 = vmatprep.mubr.bf16.mxu1 %v6549_v42 }
  0xa9   : > { %2138 = vmatpush1.bf16.msra.mxu0 %v4418_v13  ;;  %v346_v13 = vld [vmem:[%s4937_s22 + $0x1f0] sm:$0xff] }
  0xaa   : > { %2251 = vmatpush1.bf16.msra.mxu1 %v4421_v14  ;;  %2139 = vmatprep.subr.bf16.mxu0 %v4426_v35  ;;  %v353_v14 = vld [vmem:[%s4937_s22 + $0x228] sm:$0xff]  ;;  %v5447_v35 = vpack.c.bf16 %v351_v12, %v344_v10  ;;  %v360_v12 = vld [vmem:[%s4937_s22 + $0x260] sm:$0xff] }
  0xab   : > { %2252 = vmatprep.subr.bf16.mxu1 %v4429_v37  ;;  %v5449_v37 = vpack.c.bf16 %v353_v14, %v346_v13  ;;  %v365_v10 = vld [vmem:[%s4937_s22 + $0x288] sm:$0xff]  ;;  %v367_v13 = vld [vmem:[%s4937_s22 + $0x298] sm:$0xff] }
  0xac   : > { %1964 = vmatmul.mubr.bf16.gmra.mxu0 %v5406_v43  ;;  %v4450_v14 = vld [vmem:[%s6541_s1 + $0x1ac] ss:$16 sps:$4 sm:$0xff]  }
  0xad   : > { %3939 = vmatmul.mubr.msk.bf16.gmra.mxu1 %vm1650_vm0, %v5408_v46  ;;  %2140 = vmatpush1.bf16.msra.mxu0 %v4424_v39  ;;  %v359_v39 = vld [vmem:[%s4937_s22 + $0x258] sm:$0xff] }
  0xae   : > { %2253 = vmatpush1.bf16.msra.mxu1 %v4427_v41  ;;  %2141 = vmatprep.subr.bf16.mxu0 %v4432_v59  ;;  %v366_v41 = vld [vmem:[%s4937_s22 + $0x290] sm:$0xff]  ;;  %v4442_v59 = vld [vmem:[%s6541_s1 + $0x1c8] ss:$16 sps:$4 sm:$0xff]  }
  0xaf   : > { %2254 = vmatprep.subr.bf16.mxu1 %v4435_v60  ;;  %1973 = vmatprep.mubr.bf16.mxu0 %v5424_v7  ;;  %v4445_v60 = vld [vmem:[%s6541_s1 + $0x3c8] ss:$16 sps:$4 sm:$0xff]  }
  0xb0   : > { %2086 = vmatprep.mubr.bf16.mxu1 %v6549_v42 }
  0xb1   : > { %2142 = vmatpush1.bf16.msra.mxu0 %v4430_v61  ;;  %v5465_v61 = vpack.c.bf16 %v366_v41, %v359_v39  ;;  %v373_v39 = vld [vmem:[%s4937_s22 + $0x2c8] sm:$0xff]  ;;  %v380_v41 = vld [vmem:[%s4937_s22 + $0x300] sm:$0xff] }
  0xb2   : > { %2255 = vmatpush1.bf16.msra.mxu1 %v4433_v1  ;;  %2143 = vmatprep.subr.bf16.mxu0 %v4438_v20  ;;  %v358_v1 = vld [vmem:[%s4937_s22 + $0x250] sm:$0xff]  ;;  %v4453_v20 = vld [vmem:[%s6541_s1 + $0x3ac] ss:$16 sps:$4 sm:$0xff]  }
  0xb3   : > { %2256 = vmatprep.subr.bf16.mxu1 %v4441_v22  ;;  %v4448_v22 = vld [vmem:[%s6541_s1 + $0x1a8] ss:$16 sps:$4 sm:$0xff]  }
  0xb4   : > { %1974 = vmatmul.mubr.bf16.gmra.mxu0 %v5447_v35 }
  0xb5   : > { %3940 = vmatmul.mubr.msk.bf16.gmra.mxu1 %vm1650_vm0, %v5449_v37  ;;  %2144 = vmatpush2.bf16.msra.mxu0 %v4436_v30  ;;  %v5485_v30 = vpack.c.bf16 %v365_v10, %v358_v1  ;;  %v4459_v1 = vld [vmem:[%s6541_s1 + $0x38c] ss:$16 sps:$4 sm:$0xff]   ;;  %v5506_v10 = vpack.c.bf16 %v380_v41, %v373_v39 }
  0xb6   : > { %2257 = vmatpush2.bf16.msra.mxu1 %v4439_v32  ;;  %2145 = vmatprep.subr.bf16.mxu0 %v4444_v48  ;;  %v5487_v32 = vpack.c.bf16 %v367_v13, %v360_v12  ;;  %v4451_v48 = vld [vmem:[%s6541_s1 + $0x3a8] ss:$16 sps:$4 sm:$0xff]   ;;  %v372_v12 = vld [vmem:[%s4937_s22 + $0x2c0] sm:$0xff]  ;;  %v4462_v39 = vld [vmem:[%s6541_s1 + $0x16c] ss:$16 sps:$4 sm:$0xff]  }
  0xb7   : > { %2258 = vmatprep.subr.bf16.mxu1 %v4447_v58  ;;  %1983 = vmatprep.mubr.bf16.mxu0 %v5465_v61  ;;  %6565 = vst [vmem:[#allocation5_spill] sm:$0xff] %v5485_v30  ;;  %v4456_v58 = vld [vmem:[%s6541_s1 + $0x18c] ss:$16 sps:$4 sm:$0xff]   ;;  %6567 = vst [vmem:[#allocation7_spill] sm:$0xff] %v5506_v10 }
  0xb8   : > { %2096 = vmatprep.mubr.bf16.mxu1 %v6549_v42  ;;  %6566 = vst [vmem:[#allocation6_spill] sm:$0xff] %v5487_v32  ;;  %v379_v13 = vld [vmem:[%s4937_s22 + $0x2f8] sm:$0xff] }
  0xb9   : > { %2146 = vmatpush2.bf16.msra.mxu0 %v4442_v59  ;;  %v4454_v59 = vld [vmem:[%s6541_s1 + $0x188] ss:$16 sps:$4 sm:$0xff]   ;;  %v4465_v41 = vld [vmem:[%s6541_s1 + $0x36c] ss:$16 sps:$4 sm:$0xff]  }
  0xba   : > { %2259 = vmatpush2.bf16.msra.mxu1 %v4445_v60  ;;  %2147 = vmatprep.subr.bf16.mxu0 %v4450_v14  ;;  %v4457_v60 = vld [vmem:[%s6541_s1 + $0x388] ss:$16 sps:$4 sm:$0xff]   ;;  %v374_v14 = vld [vmem:[%s4937_s22 + $0x2d0] sm:$0xff] }
  0xbb   : > { %2260 = vmatprep.subr.bf16.mxu1 %v4453_v20  ;;  %v381_v20 = vld [vmem:[%s4937_s22 + $0x308] sm:$0xff] }
  0xbc   : > { %1984 = vmatmul.mubr.bf16.gmra.mxu0 %v5485_v30  ;;  %v4474_v30 = vld [vmem:[%s6541_s1 + $0x12c] ss:$16 sps:$4 sm:$0xff]  }
  0xbd   : > { %3941 = vmatmul.mubr.msk.bf16.gmra.mxu1 %vm1650_vm0, %v5487_v32  ;;  %2148 = vmatpush2.bf16.msra.mxu0 %v4448_v22  ;;  %v4460_v22 = vld [vmem:[%s6541_s1 + $0x168] ss:$16 sps:$4 sm:$0xff]   ;;  %v394_v32 = vld [vmem:[%s4937_s22 + $0x370] sm:$0xff] }
  0xbe   : > { %2261 = vmatpush2.bf16.msra.mxu1 %v4451_v48  ;;  %2149 = vmatprep.subr.bf16.mxu0 %v4456_v58  ;;  %v387_v48 = vld [vmem:[%s4937_s22 + $0x338] sm:$0xff]  ;;  %v5527_v58 = vpack.c.bf16 %v379_v13, %v372_v12 }
  0xbf   : > { %2262 = vmatprep.subr.bf16.mxu1 %v4459_v1  ;;  %1993 = vmatprep.mubr.bf16.mxu0 %v5506_v10  ;;  %v5529_v1 = vpack.c.bf16 %v381_v20, %v374_v14  ;;  %v4468_v10 = vld [vmem:[%s6541_s1 + $0x14c] ss:$16 sps:$4 sm:$0xff]   ;;  %v4466_v13 = vld [vmem:[%s6541_s1 + $0x148] ss:$16 sps:$4 sm:$0xff]   ;;  %v386_v14 = vld [vmem:[%s4937_s22 + $0x330] sm:$0xff] }
  0xc0   : > { %2106 = vmatprep.mubr.bf16.mxu1 %v6549_v42  ;;  %6568 = vst [vmem:[#allocation8_spill] sm:$0xff] %v5527_v58  ;;  %v4463_v42 = vld [vmem:[%s6541_s1 + $0x368] ss:$16 sps:$4 sm:$0xff]   ;;  %v4471_v12 = vld [vmem:[%s6541_s1 + $0x34c] ss:$16 sps:$4 sm:$0xff]  }
  0xc1   : > { %6569 = vst [vmem:[#allocation9_spill] sm:$0xff] %v5529_v1  ;;  %2150 = vmatpush2.bf16.msra.mxu0 %v4454_v59  ;;  %v4469_v59 = vld [vmem:[%s6541_s1 + $0x348] ss:$16 sps:$4 sm:$0xff]  }
  0xc2   : > { %2263 = vmatpush2.bf16.msra.mxu1 %v4457_v60  ;;  %2151 = vmatprep.subr.bf16.mxu0 %v4462_v39  ;;  %v5547_v60 = vpack.c.bf16 %v394_v32, %v387_v48  ;;  %v393_v20 = vld [vmem:[%s4937_s22 + $0x368] sm:$0xff]  ;;  %v388_v39 = vld [vmem:[%s4937_s22 + $0x340] sm:$0xff]  ;;  %v6571_v48 = vmov 0  }
  0xc3   : > { %2264 = vmatprep.subr.bf16.mxu1 %v4465_v41  ;;  %v395_v41 = vld [vmem:[%s4937_s22 + $0x378] sm:$0xff]  ;;  %s6500_s22 = scalar_lea.sflag [#allocation3], %s272_s18 }
  0xc4   : > { %6570 = vst [vmem:[#allocation10_spill] sm:$0xff] %v5547_v60  ;;  %1994 = vmatmul.mubr.bf16.gmra.mxu0 %v5527_v58  ;;  %v4477_v32 = vld [vmem:[%s6541_s1 + $0x32c] ss:$16 sps:$4 sm:$0xff]   ;;  %v4478_v58 = vld [vmem:[%s6541_s1 + $0x108] ss:$16 sps:$4 sm:$0xff]  }
  0xc5   : > { %3942 = vmatmul.mubr.msk.bf16.gmra.mxu1 %vm1650_vm0, %v5529_v1  ;;  %2152 = vmatpush2.bf16.msra.mxu0 %v4460_v22  ;;  %v4472_v1 = vld [vmem:[%s6541_s1 + $0x128] ss:$16 sps:$4 sm:$0xff]   ;;  %v5570_v22 = vpack.c.bf16 %v393_v20, %v386_v14 }
  0xc6   : > { %2265 = vmatpush2.bf16.msra.mxu1 %v4463_v42  ;;  %2153 = vmatprep.subr.bf16.mxu0 %v4468_v10  ;;  %v4475_v42 = vld [vmem:[%s6541_s1 + $0x328] ss:$16 sps:$4 sm:$0xff]   ;;  %v5572_v10 = vpack.c.bf16 %v395_v41, %v388_v39  ;;  %v5731_v39 = vld [vmem:[%s6542_s2] sm:$0xf] }
  0xc7   : > { %2266 = vmatprep.subr.bf16.mxu1 %v4471_v12  ;;  %2003 = vmatprep.mubr.bf16.mxu0 %v5547_v60  ;;  %v4480_v12 = vld [vmem:[%s6541_s1 + $0x10c] ss:$16 sps:$4 sm:$0xff]   ;;  %v4481_v14 = vld [vmem:[%s6541_s1 + $0x308] ss:$16 sps:$4 sm:$0xff]   ;;  %6573 = vst [vmem:[#allocation12_spill] sm:$0xff] %v5731_v39 }
  0xc8   : > { %2116 = vmatprep.mubr.bf16.mxu1 %v6571_v48  ;;  %v4483_v60 = vld [vmem:[%s6541_s1 + $0x30c] ss:$16 sps:$4 sm:$0xff]   ;;  %v4487_v20 = vld [vmem:[%s6541_s1 + $0x608] ss:$16 sps:$4 sm:$0xff]  }
  0xc9   : > { %2154 = vmatpush2.bf16.msra.mxu0 %v4466_v13  ;;  %v4489_v13 = vld [vmem:[%s6541_s1 + $0x60c] ss:$16 sps:$4 sm:$0xff]   ;;  %v4535_v41 = vld [vmem:[%s6543_s3 + $0x70] ss:$8 sps:$4 sm:$0xff]  }
  0xca   : > { %2267 = vmatpush2.bf16.msra.mxu1 %v4469_v59  ;;  %2155 = vmatprep.subr.bf16.mxu0 %v4474_v30  ;;  %v4486_v30 = vld [vmem:[%s6541_s1 + $0x4ec] ss:$16 sps:$4 sm:$0xff]   ;;  %v4484_v59 = vld [vmem:[%s6541_s1 + $0x4e8] ss:$16 sps:$4 sm:$0xff]  }
  0xcb   : > { %2268 = vmatprep.subr.bf16.mxu1 %v4477_v32 }
  0xcc   : > { %2004 = vmatmul.mubr.bf16.gmra.mxu0 %v5570_v22 }
  0xcd   : > { %3943 = vmatmul.mubr.msk.bf16.gmra.mxu1 %vm1650_vm0, %v5572_v10  ;;  %2156 = vmatpush2.bf16.msra.mxu0 %v4472_v1  ;;  %v4492_v1 = vld [vmem:[%s6541_s1 + $0x4cc] ss:$16 sps:$4 sm:$0xff]  }
  0xce   : > { %2269 = vmatpush2.bf16.msra.mxu1 %v4475_v42  ;;  %2157 = vmatprep.subr.bf16.mxu0 %v4480_v12  ;;  %v4540_v42 = vld [vmem:[%s6543_s3 + $0x64] ss:$8 sps:$4 sm:$0xff]  }
  0xcf   : > { %2270 = vmatprep.subr.bf16.mxu1 %v4483_v60  ;;  %2159 = vmatprep.mubr.bf16.mxu0 %v4958_v53  ;;  %v4490_v53 = vld [vmem:[%s6541_s1 + $0x4c8] ss:$16 sps:$4 sm:$0xff]  }
  0xd0   : > { %2272 = vmatprep.mubr.bf16.mxu1 %v4960_v54  ;;  %v4495_v54 = vld [vmem:[%s6541_s1 + $0x4ac] ss:$16 sps:$4 sm:$0xff]  }
  0xd1   : > { %2158 = vmatpush2.bf16.msra.mxu0 %v4478_v58  ;;  %v4493_v58 = vld [vmem:[%s6541_s1 + $0x4a8] ss:$16 sps:$4 sm:$0xff]  }
  0xd2   : > { %2271 = vmatpush2.bf16.msra.mxu1 %v4481_v14  ;;  %2353 = vmatprep.subr.bf16.mxu0 %v4486_v30 }
  0xd3   : > { %2480 = vmatprep.subr.bf16.mxu1 %v4489_v13 }
  0xd4   : > { %2160 = vmatmul.mubr.bf16.vlgmr.msra.gmra.mxu0 %v5024_v15  ;;  %v4498_v15 = vld [vmem:[%s6541_s1 + $0x48c] ss:$16 sps:$4 sm:$0xff]  }
  0xd5   : > { %2273 = vmatmul.mubr.bf16.vlgmr.msra.gmra.mxu1 %v5026_v16  ;;  %2354 = vmatpush1.bf16.msra.mxu0 %v4484_v59  ;;  %v4496_v16 = vld [vmem:[%s6541_s1 + $0x488] ss:$16 sps:$4 sm:$0xff]  }
  0xd6   : > { %2481 = vmatpush1.bf16.msra.mxu1 %v4487_v20  ;;  %2355 = vmatprep.subr.bf16.mxu0 %v4492_v1  ;;  %v4538_v20 = vld [vmem:[%s6543_s3 + $0x60] ss:$8 sps:$4 sm:$0xff]  }
  0xd7   : > { %2169 = vmatprep.mubr.bf16.mxu0 %v5036_v21  ;;  %2282 = vmatprep.mubr.bf16.mxu1 %v5041_v23  ;;  %v4501_v21 = vld [vmem:[%s6541_s1 + $0x46c] ss:$16 sps:$4 sm:$0xff]   ;;  %v4499_v23 = vld [vmem:[%s6541_s1 + $0x468] ss:$16 sps:$4 sm:$0xff]  }
  0xd9   : > { %2356 = vmatpush1.bf16.msra.mxu0 %v4490_v53 }
  0xda   : > { %2357 = vmatprep.subr.bf16.mxu0 %v4495_v54 }
  0xdc   : > { %2170 = vmatmul.mubr.bf16.gmra.mxu0 %v5058_v33  ;;  %v4504_v33 = vld [vmem:[%s6541_s1 + $0x44c] ss:$16 sps:$4 sm:$0xff]  }
  0xdd   : > { %2283 = vmatmul.mubr.bf16.gmra.mxu1 %v5060_v34  ;;  %2358 = vmatpush1.bf16.msra.mxu0 %v4493_v58  ;;  %v4502_v34 = vld [vmem:[%s6541_s1 + $0x448] ss:$16 sps:$4 sm:$0xff]  }
  0xde   : > { %2179 = vmatprep.mubr.bf16.mxu0 %v5065_v36  ;;  %2359 = vmatprep.subr.bf16.mxu0 %v4498_v15  ;;  %v4507_v36 = vld [vmem:[%s6541_s1 + $0x42c] ss:$16 sps:$4 sm:$0xff]  }
  0xdf   : > { %2292 = vmatprep.mubr.bf16.mxu1 %v5070_v38  ;;  %v4505_v38 = vld [vmem:[%s6541_s1 + $0x428] ss:$16 sps:$4 sm:$0xff]  }
  0xe1   : > { %2360 = vmatpush1.bf16.msra.mxu0 %v4496_v16  ;;  %v4541_v16 = vld [vmem:[%s6543_s3 + $0x50] ss:$8 sps:$4 sm:$0xff]  }
  0xe2   : > { %2361 = vmatprep.subr.bf16.mxu0 %v4501_v21  ;;  %v4546_v21 = vld [vmem:[%s6543_s3 + $0x44] ss:$8 sps:$4 sm:$0xff]  }
  0xe4   : > { %2180 = vmatmul.mubr.bf16.gmra.mxu0 %v5090_v49  ;;  %v4510_v49 = vld [vmem:[%s6541_s1 + $0x40c] ss:$16 sps:$4 sm:$0xff]  }
  0xe5   : > { %2293 = vmatmul.mubr.bf16.gmra.mxu1 %v5092_v50  ;;  %2362 = vmatpush1.bf16.msra.mxu0 %v4499_v23  ;;  %v4508_v50 = vld [vmem:[%s6541_s1 + $0x408] ss:$16 sps:$4 sm:$0xff]  }
  0xe6   : > { %2189 = vmatprep.mubr.bf16.mxu0 %v5097_v52  ;;  %2363 = vmatprep.subr.bf16.mxu0 %v4504_v33  ;;  %v4513_v52 = vld [vmem:[%s6541_s1 + $0x5ec] ss:$16 sps:$4 sm:$0xff]  }
  0xe7   : > { %2302 = vmatprep.mubr.bf16.mxu1 %v5102_v56  ;;  %v4511_v56 = vld [vmem:[%s6541_s1 + $0x5e8] ss:$16 sps:$4 sm:$0xff]  }
  0xe9   : > { %2364 = vmatpush1.bf16.msra.mxu0 %v4502_v34 }
  0xea   : > { %2365 = vmatprep.subr.bf16.mxu0 %v4507_v36 }
  0xec   : > { %2190 = vmatmul.mubr.bf16.gmra.mxu0 %v5122_v3  ;;  %v4516_v3 = vld [vmem:[%s6541_s1 + $0x5cc] ss:$16 sps:$4 sm:$0xff]  }
  0xed   : > { %2303 = vmatmul.mubr.bf16.gmra.mxu1 %v5124_v4  ;;  %2366 = vmatpush1.bf16.msra.mxu0 %v4505_v38  ;;  %v4514_v4 = vld [vmem:[%s6541_s1 + $0x5c8] ss:$16 sps:$4 sm:$0xff]  }
  0xee   : > { %2199 = vmatprep.mubr.bf16.mxu0 %v5129_v6  ;;  %2367 = vmatprep.subr.bf16.mxu0 %v4510_v49  ;;  %v4519_v6 = vld [vmem:[%s6541_s1 + $0x5ac] ss:$16 sps:$4 sm:$0xff]   ;;  %v4544_v49 = vld [vmem:[%s6543_s3 + $0x40] ss:$8 sps:$4 sm:$0xff]  }
  0xef   : > { %2312 = vmatprep.mubr.bf16.mxu1 %v5134_v8  ;;  %v4517_v8 = vld [vmem:[%s6541_s1 + $0x5a8] ss:$16 sps:$4 sm:$0xff]  }
  0xf1   : > { %2368 = vmatpush1.bf16.msra.mxu0 %v4508_v50 }
  0xf2   : > { %2369 = vmatprep.subr.bf16.mxu0 %v4513_v52 }
  0xf4   : > { %2200 = vmatmul.mubr.bf16.gmra.mxu0 %v5157_v24  ;;  %v4522_v24 = vld [vmem:[%s6541_s1 + $0x58c] ss:$16 sps:$4 sm:$0xff]  }
  0xf5   : > { %2313 = vmatmul.mubr.bf16.gmra.mxu1 %v5159_v25  ;;  %2370 = vmatpush2.bf16.msra.mxu0 %v4511_v56  ;;  %v4520_v25 = vld [vmem:[%s6541_s1 + $0x588] ss:$16 sps:$4 sm:$0xff]  }
  0xf6   : > { %2209 = vmatprep.mubr.bf16.mxu0 %v5164_v27  ;;  %2371 = vmatprep.subr.bf16.mxu0 %v4516_v3  ;;  %v4525_v27 = vld [vmem:[%s6541_s1 + $0x56c] ss:$16 sps:$4 sm:$0xff]  }
  0xf7   : > { %2322 = vmatprep.mubr.bf16.mxu1 %v5169_v29  ;;  %v4523_v29 = vld [vmem:[%s6541_s1 + $0x568] ss:$16 sps:$4 sm:$0xff]  }
  0xf9   : > { %2372 = vmatpush2.bf16.msra.mxu0 %v4514_v4 }
  0xfa   : > { %2373 = vmatprep.subr.bf16.mxu0 %v4519_v6  ;;  %v4547_v6 = vld [vmem:[%s6543_s3 + $0x30] ss:$8 sps:$4 sm:$0xff]  }
  0xfc   : > { %2210 = vmatmul.mubr.bf16.gmra.mxu0 %v5189_v44  ;;  %v4528_v44 = vld [vmem:[%s6541_s1 + $0x54c] ss:$16 sps:$4 sm:$0xff]  }
  0xfd   : > { %2323 = vmatmul.mubr.bf16.gmra.mxu1 %v5191_v45  ;;  %2374 = vmatpush2.bf16.msra.mxu0 %v4517_v8  ;;  %v4526_v45 = vld [vmem:[%s6541_s1 + $0x548] ss:$16 sps:$4 sm:$0xff]   ;;  %v4585_v8 = vld [vmem:[%s6543_s3 + $0x174] ss:$8 sps:$4 sm:$0xff]  }
  0xfe   : > { %2219 = vmatprep.mubr.bf16.mxu0 %v5196_v47  ;;  %2375 = vmatprep.subr.bf16.mxu0 %v4522_v24  ;;  %v650_v47 = vlaneseq  ;;  %v4552_v24 = vld [vmem:[%s6543_s3 + $0x24] ss:$8 sps:$4 sm:$0xff]  }
  0xff   : > { %2332 = vmatprep.mubr.bf16.mxu1 %v5201_v51  ;;  %v4531_v51 = vld [vmem:[%s6541_s1 + $0x52c] ss:$16 sps:$4 sm:$0xff]   ;;  %3184 = vmatprep.subr.bf16.mxu1 %v4585_v8 }
 0x100   : > { %v4597_v8 = vld [vmem:[%s6543_s3 + $0x134] ss:$8 sps:$4 sm:$0xff]  }
 0x101   : > { %2376 = vmatpush2.bf16.msra.mxu0 %v4520_v25  ;;  %v4583_v25 = vld [vmem:[%s6543_s3 + $0x170] ss:$8 sps:$4 sm:$0xff]  }
 0x102   : > { %2377 = vmatprep.subr.bf16.mxu0 %v4525_v27 }
 0x104   : > { %2220 = vmatmul.mubr.bf16.gmra.mxu0 %v5221_v2  ;;  %v4529_v2 = vld [vmem:[%s6541_s1 + $0x528] ss:$16 sps:$4 sm:$0xff]  }
 0x105   : > { %2333 = vmatmul.mubr.bf16.gmra.mxu1 %v5223_v5  ;;  %2378 = vmatpush2.bf16.msra.mxu0 %v4523_v29  ;;  %v5715_v5 = vshrl.u32 %v650_v47, 7 }
 0x106   : > { %2229 = vmatprep.mubr.bf16.mxu0 %v5228_v9  ;;  %2379 = vmatprep.subr.bf16.mxu0 %v4528_v44  ;;  %v4534_v9 = vld [vmem:[%s6541_s1 + $0x50c] ss:$16 sps:$4 sm:$0xff]  }
 0x107   : > { %2342 = vmatprep.mubr.bf16.mxu1 %v5233_v11  ;;  %6572 = vst [vmem:[#allocation11_spill] sm:$0xff] %v5715_v5  ;;  %v4532_v11 = vld [vmem:[%s6541_s1 + $0x508] ss:$16 sps:$4 sm:$0xff]   ;;  %v6556_v60 = vsub.s32 0, %v5715_v5 }
 0x109   : > { %2380 = vmatpush2.bf16.msra.mxu0 %v4526_v45 }
 0x10a   : > { %2381 = vmatprep.subr.bf16.mxu0 %v4531_v51  ;;  %v4550_v51 = vld [vmem:[%s6543_s3 + $0x20] ss:$8 sps:$4 sm:$0xff]  }
 0x10c   : > { %2230 = vmatmul.mubr.bf16.gmra.mxu0 %v5251_v26  ;;  %v4537_v26 = vld [vmem:[%s6543_s3 + $0x74] ss:$8 sps:$4 sm:$0xff]  }
 0x10d   : > { %2343 = vmatmul.mubr.bf16.gmra.mxu1 %v5253_v28  ;;  %2382 = vmatpush2.bf16.msra.mxu0 %v4529_v2  ;;  %v6557_v28 = vsub.s32 1, %v5715_v5 }
 0x10e   : > { %2385 = vmatprep.mubr.bf16.mxu0 %v5258_v31  ;;  %2383 = vmatprep.subr.bf16.mxu0 %v4534_v9  ;;  %v5740_v31 = vrot.slane %v5731_v39, %v6556_v60  ;;  %v4586_v9 = vld [vmem:[%s6543_s3 + $0x160] ss:$8 sps:$4 sm:$0xff]  }
 0x10f   : > { %2498 = vmatprep.mubr.bf16.mxu1 %v6571_v48  ;;  %v5748_v32 = vrot.slane %v5731_v39, %v6557_v28 }
 0x111   : > { %2384 = vmatpush2.bf16.msra.mxu0 %v4532_v11 }
 0x112   : > { %3071 = vmatprep.subr.bf16.mxu0 %v4537_v26 }
 0x114   : > { %v1709_v12 = vpop.f32.mrf.mxu0  ;;  %2386 = vmatmul.mubr.bf16.vlgmr.msra.gmra.mxu0 %v5283_v55 }
 0x115   : > { %v1822_v14 = vpop.f32.mrf.mxu1  ;;  %3944 = vmatmul.mubr.msk.bf16.vlgmr.msra.gmra.mxu1 %vm1650_vm0, %v5285_v57  ;;  %v1710_v30 = vadd.f32 %v1709_v12, %v5740_v31  ;;  %2395 = vmatprep.mubr.bf16.mxu0 %v5298_v63  ;;  %v4543_v57 = vld [vmem:[%s6543_s3 + $0x54] ss:$8 sps:$4 sm:$0xff]  }
 0x116   : > { %2508 = vmatprep.mubr.bf16.mxu1 %v6571_v48  ;;  %v1711_v13 = vpop.f32.mrf.mxu0  ;;  %3072 = vmatpush1.bf16.msra.mxu0 %v4535_v41 }
 0x117   : > { %v1824_v59 = vpop.f32.mrf.mxu1  ;;  %v5762_v1 = vadd.f32 %v1822_v14, %v1710_v30  ;;  %v1712_v55 = vadd.f32 %v1711_v13, %v5748_v32  ;;  %3073 = vmatprep.subr.bf16.mxu0 %v4540_v42  ;;  %3185 = vmatpush1.bf16.msra.mxu1 %v4583_v25  ;;  %v4553_v14 = vld [vmem:[%s6543_s3 + $0x10] ss:$8 sps:$4 sm:$0xff]   ;;  %v4591_v30 = vld [vmem:[%s6543_s3 + $0x154] ss:$8 sps:$4 sm:$0xff]   ;;  %v4558_v13 = vld [vmem:[%s6543_s3 + $0x4] ss:$8 sps:$4 sm:$0xff]  }
 0x118   : > { %v5768_v53 = vpop.f32.mrf.mxu0  ;;  %v4595_v25 = vld [vmem:[%s6543_s3 + $0x130] ss:$8 sps:$4 sm:$0xff]  }
 0x119   : > { %v5770_v63 = vpop.f32.mrf.mxu1  ;;  %v5772_v54 = vadd.f32 %v1824_v59, %v1712_v55  ;;  %v4589_v59 = vld [vmem:[%s6543_s3 + $0x150] ss:$8 sps:$4 sm:$0xff]  }
 0x11a   : > { %v5774_v58 = vpop.f32.mrf.mxu0  ;;  %3074 = vmatpush1.bf16.msra.mxu0 %v4538_v20 }
 0x11b   : > { %v5776_v15 = vpop.f32.mrf.mxu1  ;;  %3075 = vmatprep.subr.bf16.mxu0 %v4543_v57 }
 0x11c   : > { %v1719_v23 = vpop.f32.mrf.mxu0  ;;  %2396 = vmatmul.mubr.bf16.gmra.mxu0 %v5319_v18 }
 0x11d   : > { %v1832_v33 = vpop.f32.mrf.mxu1  ;;  %3945 = vmatmul.mubr.msk.bf16.gmra.mxu1 %vm1650_vm0, %v5321_v19  ;;  %v1720_v34 = vadd.f32 %v1719_v23, %v5740_v31  ;;  %2405 = vmatprep.mubr.bf16.mxu0 %v5342_v40  ;;  %v4549_v19 = vld [vmem:[%s6543_s3 + $0x34] ss:$8 sps:$4 sm:$0xff]   ;;  %v4556_v23 = vld [vmem:[%s6543_s3] ss:$8 sps:$4 sm:$0xff]  }
 0x11e   : > { %2518 = vmatprep.mubr.bf16.mxu1 %v6571_v48  ;;  %v1721_v36 = vpop.f32.mrf.mxu0  ;;  %3076 = vmatpush1.bf16.msra.mxu0 %v4541_v16 }
 0x11f   : > { %v1834_v38 = vpop.f32.mrf.mxu1  ;;  %v5793_v50 = vadd.f32 %v1832_v33, %v1720_v34  ;;  %v1722_v18 = vadd.f32 %v1721_v36, %v5748_v32  ;;  %3077 = vmatprep.subr.bf16.mxu0 %v4546_v21  ;;  %v4592_v34 = vld [vmem:[%s6543_s3 + $0x140] ss:$8 sps:$4 sm:$0xff]  }
 0x120   : > { %v5799_v52 = vpop.f32.mrf.mxu0 }
 0x121   : > { %v5801_v40 = vpop.f32.mrf.mxu1  ;;  %v5803_v56 = vadd.f32 %v1834_v38, %v1722_v18 }
 0x122   : > { %v5805_v3 = vpop.f32.mrf.mxu0  ;;  %3078 = vmatpush1.bf16.msra.mxu0 %v4544_v49 }
 0x123   : > { %v5807_v4 = vpop.f32.mrf.mxu1  ;;  %3079 = vmatprep.subr.bf16.mxu0 %v4549_v19 }
 0x124   : > { %v1729_v27 = vpop.f32.mrf.mxu0  ;;  %2406 = vmatmul.mubr.bf16.gmra.mxu0 %v5365_v62  ;;  %v4588_v62 = vld [vmem:[%s6543_s3 + $0x164] ss:$8 sps:$4 sm:$0xff]  }
 0x125   : > { %v1842_v29 = vpop.f32.mrf.mxu1  ;;  %3946 = vmatmul.mubr.msk.bf16.gmra.mxu1 %vm1650_vm0, %v5367_v0  ;;  %v1730_v44 = vadd.f32 %v1729_v27, %v5740_v31  ;;  %2415 = vmatprep.mubr.bf16.mxu0 %v5383_v17  ;;  %v4555_v17 = vld [vmem:[%s6543_s3 + $0x14] ss:$8 sps:$4 sm:$0xff]  }
 0x126   : > { %2528 = vmatprep.mubr.bf16.mxu1 %v6571_v48  ;;  %v1731_v45 = vpop.f32.mrf.mxu0  ;;  %3080 = vmatpush1.bf16.msra.mxu0 %v4547_v6  ;;  %v4559_v6 = vld [vmem:[%s6543_s3 + $0xf0] ss:$8 sps:$4 sm:$0xff]  }
 0x127   : > { %v1844_v47 = vpop.f32.mrf.mxu1  ;;  %v5833_v2 = vadd.f32 %v1842_v29, %v1730_v44  ;;  %v1732_v0 = vadd.f32 %v1731_v45, %v5748_v32  ;;  %3081 = vmatprep.subr.bf16.mxu0 %v4552_v24  ;;  %3186 = vmatprep.subr.bf16.mxu1 %v4588_v62  ;;  %v4564_v24 = vld [vmem:[%s6543_s3 + $0xe4] ss:$8 sps:$4 sm:$0xff]  }
 0x128   : > { %v5842_v11 = vpop.f32.mrf.mxu0  ;;  %3187 = vmatpush1.bf16.msra.mxu1 %v4586_v9 }
 0x129   : > { %v5844_v26 = vpop.f32.mrf.mxu1  ;;  %v5846_v41 = vadd.f32 %v1844_v47, %v1732_v0  ;;  %3188 = vmatprep.subr.bf16.mxu1 %v4591_v30  ;;  %v4598_v0 = vld [vmem:[%s6543_s3 + $0x120] ss:$8 sps:$4 sm:$0xff]  }
 0x12a   : > { %v5848_v42 = vpop.f32.mrf.mxu0  ;;  %3082 = vmatpush1.bf16.msra.mxu0 %v4550_v51  ;;  %v4562_v51 = vld [vmem:[%s6543_s3 + $0xe0] ss:$8 sps:$4 sm:$0xff]  }
 0x12b   : > { %v5850_v12 = vpop.f32.mrf.mxu1  ;;  %3083 = vmatprep.subr.bf16.mxu0 %v4555_v17 }
 0x12c   : > { %v1739_v20 = vpop.f32.mrf.mxu0  ;;  %2416 = vmatmul.mubr.bf16.gmra.mxu0 %v5406_v43  ;;  %v4594_v43 = vld [vmem:[%s6543_s3 + $0x144] ss:$8 sps:$4 sm:$0xff]   ;;  %3189 = vmatpush1.bf16.msra.mxu1 %v4589_v59  ;;  %v4565_v59 = vld [vmem:[%s6543_s3 + $0xd0] ss:$8 sps:$4 sm:$0xff]  }
 0x12d   : > { %v1852_v55 = vpop.f32.mrf.mxu1  ;;  %3947 = vmatmul.mubr.msk.bf16.gmra.mxu1 %vm1650_vm0, %v5408_v46  ;;  %v1740_v57 = vadd.f32 %v1739_v20, %v5740_v31  ;;  %2425 = vmatprep.mubr.bf16.mxu0 %v5424_v7  ;;  %v4561_v7 = vld [vmem:[%s6543_s3 + $0xf4] ss:$8 sps:$4 sm:$0xff]  }
 0x12e   : > { %2538 = vmatprep.mubr.bf16.mxu1 %v6571_v48  ;;  %v1741_v16 = vpop.f32.mrf.mxu0  ;;  %3084 = vmatpush1.bf16.msra.mxu0 %v4553_v14  ;;  %v4603_v20 = vld [vmem:[%s6543_s3 + $0x114] ss:$8 sps:$4 sm:$0xff]  }
 0x12f   : > { %v1854_v21 = vpop.f32.mrf.mxu1  ;;  %v5876_v33 = vadd.f32 %v1852_v55, %v1740_v57  ;;  %v1742_v46 = vadd.f32 %v1741_v16, %v5748_v32  ;;  %3085 = vmatprep.subr.bf16.mxu0 %v4558_v13  ;;  %3190 = vmatprep.subr.bf16.mxu1 %v4594_v43  ;;  %v4570_v55 = vld [vmem:[%s6543_s3 + $0xc4] ss:$8 sps:$4 sm:$0xff]   ;;  %v4601_v57 = vld [vmem:[%s6543_s3 + $0x110] ss:$8 sps:$4 sm:$0xff]  }
 0x130   : > { %v5885_v36 = vpop.f32.mrf.mxu0  ;;  %3191 = vmatpush1.bf16.msra.mxu1 %v4592_v34  ;;  %v6575_v43 = vld [vmem:[#allocation6_spill] sm:$0xff] }
 0x131   : > { %v5887_v38 = vpop.f32.mrf.mxu1  ;;  %v5889_v49 = vadd.f32 %v1854_v21, %v1742_v46  ;;  %3192 = vmatprep.subr.bf16.mxu1 %v4597_v8  ;;  %v4568_v8 = vld [vmem:[%s6543_s3 + $0xc0] ss:$8 sps:$4 sm:$0xff]  }
 0x132   : > { %v5891_v18 = vpop.f32.mrf.mxu0  ;;  %3086 = vmatpush1.bf16.msra.mxu0 %v4556_v23  ;;  %v6574_v23 = vld [vmem:[#allocation5_spill] sm:$0xff] }
 0x133   : > { %v5893_v19 = vpop.f32.mrf.mxu1  ;;  %3087 = vmatprep.subr.bf16.mxu0 %v4561_v7  ;;  %v6576_v7 = vld [vmem:[#allocation7_spill] sm:$0xff] }
 0x134   : > { %v1749_v27 = vpop.f32.mrf.mxu0  ;;  %2426 = vmatmul.mubr.bf16.gmra.mxu0 %v5447_v35  ;;  %v4600_v35 = vld [vmem:[%s6543_s3 + $0x124] ss:$8 sps:$4 sm:$0xff]   ;;  %3193 = vmatpush1.bf16.msra.mxu1 %v4595_v25 }
 0x135   : > { %v1862_v29 = vpop.f32.mrf.mxu1  ;;  %3948 = vmatmul.mubr.msk.bf16.gmra.mxu1 %vm1650_vm0, %v5449_v37  ;;  %v1750_v44 = vadd.f32 %v1749_v27, %v5740_v31  ;;  %2435 = vmatprep.mubr.bf16.mxu0 %v5465_v61  ;;  %v4567_v61 = vld [vmem:[%s6543_s3 + $0xd4] ss:$8 sps:$4 sm:$0xff]  }
 0x136   : > { %2548 = vmatprep.mubr.bf16.mxu1 %v6571_v48  ;;  %v1751_v45 = vpop.f32.mrf.mxu0  ;;  %3088 = vmatpush2.bf16.msra.mxu0 %v4559_v6 }
 0x137   : > { %v1864_v47 = vpop.f32.mrf.mxu1  ;;  %v5919_v62 = vadd.f32 %v1862_v29, %v1750_v44  ;;  %v1752_v37 = vadd.f32 %v1751_v45, %v5748_v32  ;;  %3089 = vmatprep.subr.bf16.mxu0 %v4564_v24  ;;  %3194 = vmatprep.subr.bf16.mxu1 %v4600_v35  ;;  %v4606_v24 = vld [vmem:[%s6543_s3 + $0x104] ss:$8 sps:$4 sm:$0xff]   ;;  %v4573_v29 = vld [vmem:[%s6543_s3 + $0xb4] ss:$8 sps:$4 sm:$0xff]   ;;  %v4604_v44 = vld [vmem:[%s6543_s3 + $0x100] ss:$8 sps:$4 sm:$0xff]  }
 0x138   : > { %v5928_v17 = vpop.f32.mrf.mxu0  ;;  %3195 = vmatpush1.bf16.msra.mxu1 %v4598_v0  ;;  %v4609_v0 = vld [vmem:[%s6543_s3 + $0x1f4] ss:$8 sps:$4 sm:$0xff]  }
 0x139   : > { %v5930_v9 = vpop.f32.mrf.mxu1  ;;  %v5932_v14 = vadd.f32 %v1864_v47, %v1752_v37  ;;  %3196 = vmatprep.subr.bf16.mxu1 %v4603_v20  ;;  %v4607_v20 = vld [vmem:[%s6543_s3 + $0x1f0] ss:$8 sps:$4 sm:$0xff]  }
 0x13a   : > { %v5934_v30 = vpop.f32.mrf.mxu0  ;;  %3090 = vmatpush2.bf16.msra.mxu0 %v4562_v51 }
 0x13b   : > { %v5936_v13 = vpop.f32.mrf.mxu1  ;;  %3091 = vmatprep.subr.bf16.mxu0 %v4567_v61  ;;  %v4571_v61 = vld [vmem:[%s6543_s3 + $0xb0] ss:$8 sps:$4 sm:$0xff]  }
 0x13c   : > { %v1759_v16 = vpop.f32.mrf.mxu0  ;;  %2436 = vmatmul.mubr.bf16.gmra.mxu0 %v6574_v23  ;;  %3197 = vmatpush1.bf16.msra.mxu1 %v4601_v57 }
 0x13d   : > { %v1872_v21 = vpop.f32.mrf.mxu1  ;;  %3949 = vmatmul.mubr.msk.bf16.gmra.mxu1 %vm1650_vm0, %v6575_v43  ;;  %v1760_v46 = vadd.f32 %v1759_v16, %v5740_v31  ;;  %2445 = vmatprep.mubr.bf16.mxu0 %v6576_v7  ;;  %v6577_v16 = vld [vmem:[#allocation8_spill] sm:$0xff]  ;;  %v6579_v43 = vld [vmem:[#allocation10_spill] sm:$0xff] }
 0x13e   : > { %2558 = vmatprep.mubr.bf16.mxu1 %v6571_v48  ;;  %v1761_v34 = vpop.f32.mrf.mxu0  ;;  %3092 = vmatpush2.bf16.msra.mxu0 %v4565_v59  ;;  %v4576_v59 = vld [vmem:[%s6543_s3 + $0xa4] ss:$8 sps:$4 sm:$0xff]  }
 0x13f   : > { %v1874_v6 = vpop.f32.mrf.mxu1  ;;  %v5962_v25 = vadd.f32 %v1872_v21, %v1760_v46  ;;  %v1762_v27 = vadd.f32 %v1761_v34, %v5748_v32  ;;  %3093 = vmatprep.subr.bf16.mxu0 %v4570_v55  ;;  %3198 = vmatprep.subr.bf16.mxu1 %v4606_v24  ;;  %v6578_v21 = vld [vmem:[#allocation9_spill] sm:$0xff] }
 0x140   : > { %v5971_v45 = vpop.f32.mrf.mxu0  ;;  %3199 = vmatpush1.bf16.msra.mxu1 %v4604_v44  ;;  %v4574_v34 = vld [vmem:[%s6543_s3 + $0xa0] ss:$8 sps:$4 sm:$0xff]  }
 0x141   : > { %v5973_v47 = vpop.f32.mrf.mxu1  ;;  %v5975_v51 = vadd.f32 %v1874_v6, %v1762_v27  ;;  %3200 = vmatprep.subr.bf16.mxu1 %v4609_v0  ;;  %v4612_v6 = vld [vmem:[%s6543_s3 + $0x1e4] ss:$8 sps:$4 sm:$0xff]   ;;  %v4610_v27 = vld [vmem:[%s6543_s3 + $0x1e0] ss:$8 sps:$4 sm:$0xff]  }
 0x142   : > { %v5977_v35 = vpop.f32.mrf.mxu0  ;;  %3094 = vmatpush2.bf16.msra.mxu0 %v4568_v8 }
 0x143   : > { %v5979_v37 = vpop.f32.mrf.mxu1  ;;  %3095 = vmatprep.subr.bf16.mxu0 %v4573_v29 }
 0x144   : > { %v1769_v55 = vpop.f32.mrf.mxu0  ;;  %2446 = vmatmul.mubr.bf16.gmra.mxu0 %v6577_v16  ;;  %3201 = vmatpush2.bf16.msra.mxu1 %v4607_v20  ;;  %v4615_v20 = vld [vmem:[%s6543_s3 + $0x1d4] ss:$8 sps:$4 sm:$0xff]   ;;  %v4613_v16 = vld [vmem:[%s6543_s3 + $0x1d0] ss:$8 sps:$4 sm:$0xff]  }
 0x145   : > { %v1882_v57 = vpop.f32.mrf.mxu1  ;;  %3950 = vmatmul.mubr.msk.bf16.gmra.mxu1 %vm1650_vm0, %v6578_v21  ;;  %v1770_v23 = vadd.f32 %v1769_v55, %v5740_v31  ;;  %2455 = vmatprep.mubr.bf16.mxu0 %v6579_v43 }
 0x146   : > { %2568 = vmatprep.mubr.bf16.mxu1 %v6571_v48  ;;  %v1771_v46 = vpop.f32.mrf.mxu0  ;;  %3096 = vmatpush2.bf16.msra.mxu0 %v4571_v61  ;;  %v4579_v48 = vld [vmem:[%s6543_s3 + $0x94] ss:$8 sps:$4 sm:$0xff]  }
 0x147   : > { %v1884_v7 = vpop.f32.mrf.mxu1  ;;  %v6005_v8 = vadd.f32 %v1882_v57, %v1770_v23  ;;  %v1772_v24 = vadd.f32 %v1771_v46, %v5748_v32  ;;  %3097 = vmatprep.subr.bf16.mxu0 %v4576_v59  ;;  %3202 = vmatprep.subr.bf16.mxu1 %v4612_v6  ;;  %v4577_v59 = vld [vmem:[%s6543_s3 + $0x90] ss:$8 sps:$4 sm:$0xff]   ;;  %v4582_v57 = vld [vmem:[%s6543_s3 + $0x84] ss:$8 sps:$4 sm:$0xff]  }
 0x148   : > { %v6014_v29 = vpop.f32.mrf.mxu0  ;;  %3203 = vmatpush2.bf16.msra.mxu1 %v4610_v27  ;;  %v4618_v6 = vld [vmem:[%s6543_s3 + $0x1c4] ss:$8 sps:$4 sm:$0xff]  }
 0x149   : > { %v6016_v44 = vpop.f32.mrf.mxu1  ;;  %v6018_v61 = vadd.f32 %v1884_v7, %v1772_v24  ;;  %3204 = vmatprep.subr.bf16.mxu1 %v4615_v20 }
 0x14a   : > { %v6020_v0 = vpop.f32.mrf.mxu0  ;;  %3098 = vmatpush2.bf16.msra.mxu0 %v4574_v34  ;;  %v4580_v34 = vld [vmem:[%s6543_s3 + $0x80] ss:$8 sps:$4 sm:$0xff]  }
 0x14b   : > { %v6022_v55 = vpop.f32.mrf.mxu1  ;;  %3099 = vmatprep.subr.bf16.mxu0 %v4579_v48 }
 0x14c   : > { %v1779_v21 = vpop.f32.mrf.mxu0  ;;  %2456 = vmatmul.mubr.bf16.gmra.mxu0 %v5570_v22  ;;  %3205 = vmatpush2.bf16.msra.mxu1 %v4613_v16  ;;  %v1714_v16 = vadd.f32 %v5768_v53, %v5740_v31 }
 0x14d   : > { %v1892_v23 = vpop.f32.mrf.mxu1  ;;  %3951 = vmatmul.mubr.msk.bf16.gmra.mxu1 %vm1650_vm0, %v5572_v10  ;;  %v1780_v43 = vadd.f32 %v1779_v21, %v5740_v31  ;;  %v4616_v10 = vld [vmem:[%s6543_s3 + $0x1c0] ss:$8 sps:$4 sm:$0xff]   ;;  %3206 = vmatprep.subr.bf16.mxu1 %v4618_v6 }
 0x14e   : > { %v1781_v46 = vpop.f32.mrf.mxu0  ;;  %3100 = vmatpush2.bf16.msra.mxu0 %v4577_v59  ;;  %v1827_v60 = vadd.f32 %v5770_v63, %v1714_v16  ;;  %v4627_v63 = vld [vmem:[%s6543_s3 + $0x194] ss:$8 sps:$4 sm:$0xff]  }
 0x14f   : > { %v1894_v7 = vpop.f32.mrf.mxu1  ;;  %v6046_v24 = vadd.f32 %v1892_v23, %v1780_v43  ;;  %v1782_v22 = vadd.f32 %v1781_v46, %v5748_v32  ;;  %3101 = vmatprep.subr.bf16.mxu0 %v4582_v57  ;;  %v4621_v57 = vld [vmem:[%s6543_s3 + $0x1b4] ss:$8 sps:$4 sm:$0xff]   ;;  %v4619_v23 = vld [vmem:[%s6543_s3 + $0x1b0] ss:$8 sps:$4 sm:$0xff]  }
 0x150   : > { %v6052_v48 = vpop.f32.mrf.mxu0  ;;  %3207 = vmatpush2.bf16.msra.mxu1 %v4616_v10  ;;  %v4622_v10 = vld [vmem:[%s6543_s3 + $0x1a0] ss:$8 sps:$4 sm:$0xff]  }
 0x151   : > { %6580 = vst [vmem:[#allocation5_spill] sm:$0xff] %v6046_v24  ;;  %v6054_v27 = vpop.f32.mrf.mxu1  ;;  %v6056_v59 = vadd.f32 %v1894_v7, %v1782_v22  ;;  %3208 = vmatprep.subr.bf16.mxu1 %v4621_v57  ;;  %v1716_v7 = vadd.f32 %v5774_v58, %v5748_v32  ;;  %v4624_v22 = vld [vmem:[%s6543_s3 + $0x1a4] ss:$8 sps:$4 sm:$0xff]  }
 0x152   : > { %6581 = vst [vmem:[#allocation6_spill] sm:$0xff] %v6054_v27  ;;  %v6058_v20 = vpop.f32.mrf.mxu0  ;;  %3102 = vmatpush2.bf16.msra.mxu0 %v4580_v34 }
 0x153   : > { %6582 = vst [vmem:[#allocation7_spill] sm:$0xff] %v6056_v59  ;;  %v6060_v21 = vpop.f32.mrf.mxu1  ;;  %v1829_v58 = vadd.f32 %v5776_v15, %v1716_v7 }
 0x154   : > { %6583 = vst [vmem:[#allocation8_spill] sm:$0xff] %v6060_v21  ;;  %v1935_v43 = vpop.f32.mrf.mxu0  ;;  %3209 = vmatpush2.bf16.msra.mxu1 %v4619_v23 }
 0x155   : > { %v2048_v46 = vpop.f32.mrf.mxu1  ;;  %v1936_v57 = vadd.f32 %v1935_v43, %v5762_v1  ;;  %3210 = vmatprep.subr.bf16.mxu1 %v4624_v22  ;;  %v4625_v1 = vld [vmem:[%s6543_s3 + $0x190] ss:$8 sps:$4 sm:$0xff]  }
 0x156   : > { %v1937_v6 = vpop.f32.mrf.mxu0 }
 0x157   : > { %v2050_v34 = vpop.f32.mrf.mxu1  ;;  %v1938_v53 = vadd.f32 %v1937_v6, %v5772_v54  ;;  %v1724_v54 = vadd.f32 %v5799_v52, %v5740_v31  ;;  %v2049_v43 = vadd.f32 %v2048_v46, %v1936_v57 }
 0x158   : > { %v1939_v28 = vpop.f32.mrf.mxu0  ;;  %3211 = vmatpush2.bf16.msra.mxu1 %v4622_v10 }
 0x159   : > { %v2052_v39 = vpop.f32.mrf.mxu1  ;;  %v1940_v21 = vadd.f32 %v1939_v28, %v1827_v60  ;;  %v2051_v16 = vadd.f32 %v2050_v34, %v1938_v53  ;;  %3212 = vmatprep.subr.bf16.mxu1 %v4627_v63  ;;  %v1726_v28 = vadd.f32 %v5805_v3, %v5748_v32  ;;  %v1837_v52 = vadd.f32 %v5801_v40, %v1724_v54  ;;  %v4628_v34 = vld [vmem:[%s6543_s3 + $0x180] ss:$8 sps:$4 sm:$0xff]  }
 0x15a   : > { %v1941_v24 = vpop.f32.mrf.mxu0  ;;  %v2579_v3 = vmax.f32 %v2049_v43, 0.0  ;;  %v1734_v40 = vadd.f32 %v5842_v11, %v5740_v31 }
 0x15b   : > { %v2054_v59 = vpop.f32.mrf.mxu1  ;;  %v2053_v23 = vadd.f32 %v2052_v39, %v1940_v21  ;;  %v1942_v6 = vadd.f32 %v1941_v24, %v1829_v58  ;;  %v4630_v39 = vld [vmem:[%s6543_s3 + $0x184] ss:$8 sps:$4 sm:$0xff]   ;;  %v2580_v24 = vmax.f32 %v2051_v16, 0.0  ;;  %v1839_v57 = vadd.f32 %v5807_v4, %v1726_v28 }
 0x15c   : > { %v1945_v15 = vpop.f32.mrf.mxu0  ;;  %3213 = vmatpush2.bf16.msra.mxu1 %v4625_v1  ;;  %v1736_v4 = vadd.f32 %v5848_v42, %v5748_v32  ;;  %v1847_v11 = vadd.f32 %v5844_v26, %v1734_v40 }
 0x15d   : > { %v2058_v60 = vpop.f32.mrf.mxu1  ;;  %v2055_v7 = vadd.f32 %v2054_v59, %v1942_v6  ;;  %v2583_v22 = vmax.f32 %v2053_v23, 0.0  ;;  %v1946_v59 = vadd.f32 %v1945_v15, %v5793_v50  ;;  %3214 = vmatprep.subr.bf16.mxu1 %v4630_v39 }
 0x15e   : > { %v1947_v27 = vpop.f32.mrf.mxu0 }
 0x15f   : > { %v2060_v5 = vpop.f32.mrf.mxu1  ;;  %v2584_v21 = vmax.f32 %v2055_v7, 0.0  ;;  %v1948_v46 = vadd.f32 %v1947_v27, %v5803_v56  ;;  %v2643_v54 = vpack.c.bf16 %v2583_v22, %v2579_v3  ;;  %v2059_v1 = vadd.f32 %v2058_v60, %v1946_v59 }
 0x160   : > { %v1949_v53 = vpop.f32.mrf.mxu0  ;;  %3215 = vmatpush2.bf16.msra.mxu1 %v4628_v34  ;;  %v1849_v34 = vadd.f32 %v5850_v12, %v1736_v4 }
 0x161   : > { %v2062_v10 = vpop.f32.mrf.mxu1  ;;  %v1950_v58 = vadd.f32 %v1949_v53, %v1837_v52  ;;  %v2644_v63 = vpack.c.bf16 %v2584_v21, %v2580_v24  ;;  %v2061_v16 = vadd.f32 %v2060_v5, %v1948_v46  ;;  %v2587_v24 = vmax.f32 %v2059_v1, 0.0 }
 0x162   : > { %v1951_v56 = vpop.f32.mrf.mxu0 }
 0x163   : > { %v2064_v27 = vpop.f32.mrf.mxu1  ;;  %v2063_v23 = vadd.f32 %v2062_v10, %v1950_v58  ;;  %v1952_v6 = vadd.f32 %v1951_v56, %v1839_v57  ;;  %3103 = vmatprep.mubr.bf16.mxu0 %v2644_v63  ;;  %v2588_v22 = vmax.f32 %v2061_v16, 0.0  ;;  %v1744_v57 = vadd.f32 %v5885_v36, %v5740_v31 }
 0x164   : > { %v1955_v50 = vpop.f32.mrf.mxu0  ;;  %3104 = vmatmul.mubr.bf16.vlgmr.msra.gmra.mxu0 %v2643_v54 }
 0x165   : > { %v2068_v43 = vpop.f32.mrf.mxu1  ;;  %v2065_v15 = vadd.f32 %v2064_v27, %v1952_v6  ;;  %v2591_v28 = vmax.f32 %v2063_v23, 0.0  ;;  %v1956_v21 = vadd.f32 %v1955_v50, %v5833_v2  ;;  %v1746_v2 = vadd.f32 %v5891_v18, %v5748_v32 }
 0x166   : > { %v1957_v7 = vpop.f32.mrf.mxu0  ;;  %v1857_v23 = vadd.f32 %v5887_v38, %v1744_v57 }
 0x167   : > { %v2070_v39 = vpop.f32.mrf.mxu1  ;;  %v2592_v52 = vmax.f32 %v2065_v15, 0.0  ;;  %v1958_v5 = vadd.f32 %v1957_v7, %v5846_v41  ;;  %v2647_v42 = vpack.c.bf16 %v2591_v28, %v2587_v24  ;;  %v2069_v41 = vadd.f32 %v2068_v43, %v1956_v21 }
 0x168   : > { %v1959_v60 = vpop.f32.mrf.mxu0  ;;  %v1859_v28 = vadd.f32 %v5893_v19, %v1746_v2 }
 0x169   : > { %v2072_v46 = vpop.f32.mrf.mxu1  ;;  %v1960_v3 = vadd.f32 %v1959_v60, %v1847_v11  ;;  %v2648_v59 = vpack.c.bf16 %v2592_v52, %v2588_v22  ;;  %v2071_v26 = vadd.f32 %v2070_v39, %v1958_v5  ;;  %v2595_v50 = vmax.f32 %v2069_v41, 0.0 }
 0x16a   : > { %v1961_v53 = vpop.f32.mrf.mxu0  ;;  %v1754_v52 = vadd.f32 %v5928_v17, %v5740_v31 }
 0x16b   : > { %v2074_v10 = vpop.f32.mrf.mxu1  ;;  %v2073_v58 = vadd.f32 %v2072_v46, %v1960_v3  ;;  %v1962_v63 = vadd.f32 %v1961_v53, %v1849_v34  ;;  %3113 = vmatprep.mubr.bf16.mxu0 %v2648_v59  ;;  %v2596_v6 = vmax.f32 %v2071_v26, 0.0 }
 0x16c   : > { %v1965_v40 = vpop.f32.mrf.mxu0  ;;  %3114 = vmatmul.mubr.bf16.gmra.mxu0 %v2647_v42  ;;  %v1867_v59 = vadd.f32 %v5930_v9, %v1754_v52 }
 0x16d   : > { %v2078_v54 = vpop.f32.mrf.mxu1  ;;  %v2075_v12 = vadd.f32 %v2074_v10, %v1962_v63  ;;  %v2599_v56 = vmax.f32 %v2073_v58, 0.0  ;;  %v1966_v4 = vadd.f32 %v1965_v40, %v5876_v33  ;;  %v1756_v33 = vadd.f32 %v5934_v30, %v5748_v32 }
 0x16e   : > { %v1967_v27 = vpop.f32.mrf.mxu0 }
 0x16f   : > { %v2080_v16 = vpop.f32.mrf.mxu1  ;;  %v2600_v1 = vmax.f32 %v2075_v12, 0.0  ;;  %v1968_v36 = vadd.f32 %v1967_v27, %v5889_v49  ;;  %v2651_v18 = vpack.c.bf16 %v2599_v56, %v2595_v50  ;;  %v2079_v49 = vadd.f32 %v2078_v54, %v1966_v4 }
 0x170   : > { %v1969_v43 = vpop.f32.mrf.mxu0  ;;  %v1869_v63 = vadd.f32 %v5936_v13, %v1756_v33  ;;  %v1764_v12 = vadd.f32 %v5971_v45, %v5740_v31 }
 0x171   : > { %v2082_v15 = vpop.f32.mrf.mxu1  ;;  %v1970_v7 = vadd.f32 %v1969_v43, %v1857_v23  ;;  %v2652_v39 = vpack.c.bf16 %v2600_v1, %v2596_v6  ;;  %v2081_v38 = vadd.f32 %v2080_v16, %v1968_v36  ;;  %v2603_v10 = vmax.f32 %v2079_v49, 0.0 }
 0x172   : > { %v1971_v11 = vpop.f32.mrf.mxu0  ;;  %v1877_v50 = vadd.f32 %v5973_v47, %v1764_v12 }
 0x173   : > { %v2084_v22 = vpop.f32.mrf.mxu1  ;;  %v2083_v5 = vadd.f32 %v2082_v15, %v1970_v7  ;;  %v1972_v24 = vadd.f32 %v1971_v11, %v1859_v28  ;;  %3123 = vmatprep.mubr.bf16.mxu0 %v2652_v39  ;;  %v2604_v42 = vmax.f32 %v2081_v38, 0.0 }
 0x174   : > { %v1975_v21 = vpop.f32.mrf.mxu0  ;;  %3124 = vmatmul.mubr.bf16.gmra.mxu0 %v2651_v18 }
 0x175   : > { %v2088_v60 = vpop.f32.mrf.mxu1  ;;  %v2085_v19 = vadd.f32 %v2084_v22, %v1972_v24  ;;  %v2607_v46 = vmax.f32 %v2083_v5, 0.0  ;;  %v1976_v57 = vadd.f32 %v1975_v21, %v5919_v62  ;;  %v1766_v62 = vadd.f32 %v5977_v35, %v5748_v32 }
 0x176   : > { %v1977_v34 = vpop.f32.mrf.mxu0  ;;  %v1774_v5 = vadd.f32 %v6014_v29, %v5740_v31 }
 0x177   : > { %v2090_v3 = vpop.f32.mrf.mxu1  ;;  %v2608_v53 = vmax.f32 %v2085_v19, 0.0  ;;  %v1978_v17 = vadd.f32 %v1977_v34, %v5932_v14  ;;  %v2655_v30 = vpack.c.bf16 %v2607_v46, %v2603_v10  ;;  %v2089_v14 = vadd.f32 %v2088_v60, %v1976_v57 }
 0x178   : > { %v1979_v26 = vpop.f32.mrf.mxu0  ;;  %v1879_v18 = vadd.f32 %v5979_v37, %v1766_v62  ;;  %v1887_v34 = vadd.f32 %v6016_v44, %v1774_v5 }
 0x179   : > { %v2092_v58 = vpop.f32.mrf.mxu1  ;;  %v1980_v41 = vadd.f32 %v1979_v26, %v1867_v59  ;;  %v2656_v40 = vpack.c.bf16 %v2608_v53, %v2604_v42  ;;  %v2091_v9 = vadd.f32 %v2090_v3, %v1978_v17  ;;  %v2611_v15 = vmax.f32 %v2089_v14, 0.0 }
 0x17a   : > { %v1981_v54 = vpop.f32.mrf.mxu0 }
 0x17b   : > { %v2094_v2 = vpop.f32.mrf.mxu1  ;;  %v2093_v56 = vadd.f32 %v2092_v58, %v1980_v41  ;;  %v1982_v27 = vadd.f32 %v1981_v54, %v1869_v63  ;;  %3133 = vmatprep.mubr.bf16.mxu0 %v2656_v40  ;;  %v2612_v4 = vmax.f32 %v2091_v9, 0.0  ;;  %v1784_v40 = vadd.f32 %v6052_v48, %v5740_v31  ;;  %v6584_v9 = vld [vmem:[#allocation11_spill] sm:$0xff]  ;;  %v6585_v31 = vld [vmem:[#allocation6_spill] sm:$0xff] }
 0x17c   : > { %v1985_v16 = vpop.f32.mrf.mxu0  ;;  %3134 = vmatmul.mubr.bf16.gmra.mxu0 %v2655_v30 }
 0x17d   : > { %v2098_v23 = vpop.f32.mrf.mxu1  ;;  %v2095_v13 = vadd.f32 %v2094_v2, %v1982_v27  ;;  %v2615_v6 = vmax.f32 %v2093_v56, 0.0  ;;  %v1986_v28 = vadd.f32 %v1985_v16, %v5962_v25  ;;  %v1776_v25 = vadd.f32 %v6020_v0, %v5748_v32 }
 0x17e   : > { %v1987_v1 = vpop.f32.mrf.mxu0  ;;  %v660_v56 = vsub.s32 2, %v6584_v9  ;;  %v1897_v48 = vadd.f32 %v6585_v31, %v1784_v40 }
 0x17f   : > { %v2100_v36 = vpop.f32.mrf.mxu1  ;;  %v2616_v43 = vmax.f32 %v2095_v13, 0.0  ;;  %v1988_v45 = vadd.f32 %v1987_v1, %v5975_v51  ;;  %v2659_v35 = vpack.c.bf16 %v2615_v6, %v2611_v15  ;;  %v2099_v51 = vadd.f32 %v2098_v23, %v1986_v28  ;;  %v6586_v6 = vld [vmem:[#allocation7_spill] sm:$0xff] }
 0x180   : > { %v1989_v7 = vpop.f32.mrf.mxu0  ;;  %v1889_v57 = vadd.f32 %v6022_v55, %v1776_v25  ;;  %v664_v23 = vsub.s32 3, %v6584_v9 }
 0x181   : > { %v2102_v39 = vpop.f32.mrf.mxu1  ;;  %v1990_v11 = vadd.f32 %v1989_v7, %v1877_v50  ;;  %v2660_v22 = vpack.c.bf16 %v2616_v43, %v2612_v4  ;;  %v2101_v47 = vadd.f32 %v2100_v36, %v1988_v45  ;;  %v2619_v42 = vmax.f32 %v2099_v51, 0.0  ;;  %v6587_v50 = vld [vmem:[#allocation5_spill] sm:$0xff]  ;;  %v6589_v7 = vld [vmem:[#allocation12_spill] sm:$0xff] }
 0x182   : > { %v1991_v52 = vpop.f32.mrf.mxu0  ;;  %v6156_v5 = vrot.slane %v6589_v7, %v664_v23 }
 0x183   : > { %v2104_v38 = vpop.f32.mrf.mxu1  ;;  %v2103_v24 = vadd.f32 %v2102_v39, %v1990_v11  ;;  %v1992_v49 = vadd.f32 %v1991_v52, %v1879_v18  ;;  %3143 = vmatprep.mubr.bf16.mxu0 %v2660_v22  ;;  %v2620_v3 = vmax.f32 %v2101_v47, 0.0  ;;  %v6153_v39 = vrot.slane %v6589_v7, %v660_v56 }
 0x184   : > { %v1995_v21 = vpop.f32.mrf.mxu0  ;;  %3144 = vmatmul.mubr.bf16.gmra.mxu0 %v2659_v35 }
 0x185   : > { %v2108_v60 = vpop.f32.mrf.mxu1  ;;  %v2105_v37 = vadd.f32 %v2104_v38, %v1992_v49  ;;  %v2623_v33 = vmax.f32 %v2103_v24, 0.0  ;;  %v1996_v53 = vadd.f32 %v1995_v21, %v6005_v8  ;;  %v1786_v8 = vadd.f32 %v6058_v20, %v5748_v32  ;;  %v6588_v32 = vld [vmem:[#allocation8_spill] sm:$0xff] }
 0x186   : > { %v1997_v19 = vpop.f32.mrf.mxu0 }
 0x187   : > { %v2110_v46 = vpop.f32.mrf.mxu1  ;;  %v2624_v59 = vmax.f32 %v2105_v37, 0.0  ;;  %v1998_v29 = vadd.f32 %v1997_v19, %v6018_v61  ;;  %v2663_v0 = vpack.c.bf16 %v2623_v33, %v2619_v42  ;;  %v2109_v61 = vadd.f32 %v2108_v60, %v1996_v53 }
 0x188   : > { %v1999_v17 = vpop.f32.mrf.mxu0  ;;  %v1899_v20 = vadd.f32 %v6588_v32, %v1786_v8 }
 0x189   : > { %v2112_v10 = vpop.f32.mrf.mxu1  ;;  %v2000_v26 = vadd.f32 %v1999_v17, %v1887_v34  ;;  %v2664_v58 = vpack.c.bf16 %v2624_v59, %v2620_v3  ;;  %v2111_v44 = vadd.f32 %v2110_v46, %v1998_v29  ;;  %v2627_v36 = vmax.f32 %v2109_v61, 0.0 }
 0x18a   : > { %v2001_v63 = vpop.f32.mrf.mxu0 }
 0x18b   : > { %v2114_v41 = vpop.f32.mrf.mxu1  ;;  %v2113_v30 = vadd.f32 %v2112_v10, %v2000_v26  ;;  %v2002_v54 = vadd.f32 %v2001_v63, %v1889_v57  ;;  %3153 = vmatprep.mubr.bf16.mxu0 %v2664_v58  ;;  %v2628_v62 = vmax.f32 %v2111_v44, 0.0 }
 0x18c   : > { %v2005_v2 = vpop.f32.mrf.mxu0  ;;  %3154 = vmatmul.mubr.bf16.gmra.mxu0 %v2663_v0 }
 0x18d   : > { %v2118_v12 = vpop.f32.mrf.mxu1  ;;  %v2115_v55 = vadd.f32 %v2114_v41, %v2002_v54  ;;  %v2631_v27 = vmax.f32 %v2113_v30, 0.0  ;;  %v2006_v4 = vadd.f32 %v2005_v2, %v6587_v50 }
 0x18e   : > { %v2007_v14 = vpop.f32.mrf.mxu0 }
 0x18f   : > { %v2120_v16 = vpop.f32.mrf.mxu1  ;;  %v2632_v13 = vmax.f32 %v2115_v55, 0.0  ;;  %v2008_v1 = vadd.f32 %v2007_v14, %v6586_v6  ;;  %v2667_v18 = vpack.c.bf16 %v2631_v27, %v2627_v36  ;;  %v2119_v47 = vadd.f32 %v2118_v12, %v2006_v4 }
 0x190   : > { %v2009_v43 = vpop.f32.mrf.mxu0 }
 0x191   : > { %v2122_v45 = vpop.f32.mrf.mxu1  ;;  %v2010_v15 = vadd.f32 %v2009_v43, %v1897_v48  ;;  %v2668_v28 = vpack.c.bf16 %v2632_v13, %v2628_v62  ;;  %v2121_v35 = vadd.f32 %v2120_v16, %v2008_v1  ;;  %v2635_v3 = vmax.f32 %v2119_v47, 0.0 }
 0x192   : > { %v2011_v11 = vpop.f32.mrf.mxu0 }
 0x193   : > { %v2124_v22 = vpop.f32.mrf.mxu1  ;;  %v2123_v52 = vadd.f32 %v2122_v45, %v2010_v15  ;;  %v2012_v38 = vadd.f32 %v2011_v11, %v1899_v20  ;;  %3163 = vmatprep.mubr.bf16.mxu0 %v2668_v28  ;;  %v2636_v33 = vmax.f32 %v2121_v35, 0.0 }
 0x194   : > { %v2161_v24 = vpop.f32.mrf.mxu0  ;;  %3164 = vmatmul.mubr.bf16.gmra.mxu0 %v2667_v18 }
 0x195   : > { %v2274_v49 = vpop.f32.mrf.mxu1  ;;  %v2125_v51 = vadd.f32 %v2124_v22, %v2012_v38  ;;  %v2162_v21 = vadd.f32 %v2161_v24, %v6153_v39  ;;  %v2639_v60 = vmax.f32 %v2123_v52, 0.0 }
 0x196   : > { %v2163_v25 = vpop.f32.mrf.mxu0 }
 0x197   : > { %v2276_v37 = vpop.f32.mrf.mxu1  ;;  %v2640_v19 = vmax.f32 %v2125_v51, 0.0  ;;  %v6159_v46 = vadd.f32 %v2274_v49, %v2162_v21  ;;  %v2164_v34 = vadd.f32 %v2163_v25, %v6156_v5  ;;  %v2671_v17 = vpack.c.bf16 %v2639_v60, %v2635_v3 }
 0x198   : > { %v6162_v59 = vpop.f32.mrf.mxu0 }
 0x199   : > { %v6164_v29 = vpop.f32.mrf.mxu1  ;;  %v6166_v42 = vadd.f32 %v2276_v37, %v2164_v34  ;;  %v2672_v53 = vpack.c.bf16 %v2640_v19, %v2636_v33 }
 0x19a   : > { %v6168_v10 = vpop.f32.mrf.mxu0 }
 0x19b   : > { %v6170_v57 = vpop.f32.mrf.mxu1  ;;  %3173 = vmatprep.mubr.bf16.mxu0 %v2672_v53 }
 0x19c   : > { %v2171_v26 = vpop.f32.mrf.mxu0  ;;  %3174 = vmatmul.mubr.bf16.gmra.mxu0 %v2671_v17 }
 0x19d   : > { %v2284_v58 = vpop.f32.mrf.mxu1  ;;  %v2172_v0 = vadd.f32 %v2171_v26, %v6153_v39 }
 0x19e   : > { %v2173_v63 = vpop.f32.mrf.mxu0 }
 0x19f   : > { %v2286_v41 = vpop.f32.mrf.mxu1  ;;  %v6173_v40 = vadd.f32 %v2284_v58, %v2172_v0  ;;  %v2174_v44 = vadd.f32 %v2173_v63, %v6156_v5 }
 0x1a0   : > { %v6176_v30 = vpop.f32.mrf.mxu0 }
 0x1a1   : > { %v6178_v54 = vpop.f32.mrf.mxu1  ;;  %v6180_v61 = vadd.f32 %v2286_v41, %v2174_v44 }
 0x1a2   : > { %v6182_v2 = vpop.f32.mrf.mxu0 }
 0x1a3   : > { %v6184_v12 = vpop.f32.mrf.mxu1 }
 0x1a4   : > { %v2181_v8 = vpop.f32.mrf.mxu0 }
 0x1a5   : > { %v2294_v55 = vpop.f32.mrf.mxu1  ;;  %v2182_v56 = vadd.f32 %v2181_v8, %v6153_v39 }
 0x1a6   : > { %v2183_v27 = vpop.f32.mrf.mxu0 }
 0x1a7   : > { %v2296_v14 = vpop.f32.mrf.mxu1  ;;  %v6187_v16 = vadd.f32 %v2294_v55, %v2182_v56  ;;  %v2184_v23 = vadd.f32 %v2183_v27, %v6156_v5 }
 0x1a8   : > { %v6190_v31 = vpop.f32.mrf.mxu0 }
 0x1a9   : > { %v6192_v48 = vpop.f32.mrf.mxu1  ;;  %v6194_v62 = vadd.f32 %v2296_v14, %v2184_v23 }
 0x1aa   : > { %v6196_v13 = vpop.f32.mrf.mxu0 }
 0x1ab   : > { %v6198_v6 = vpop.f32.mrf.mxu1 }
 0x1ac   : > { %v2191_v1 = vpop.f32.mrf.mxu0 }
 0x1ad   : > { %v2304_v36 = vpop.f32.mrf.mxu1  ;;  %v2192_v50 = vadd.f32 %v2191_v1, %v6153_v39 }
 0x1ae   : > { %v2193_v4 = vpop.f32.mrf.mxu0 }
 0x1af   : > { %v2306_v43 = vpop.f32.mrf.mxu1  ;;  %v6201_v45 = vadd.f32 %v2304_v36, %v2192_v50  ;;  %v2194_v32 = vadd.f32 %v2193_v4, %v6156_v5 }
 0x1b0   : > { %v6204_v20 = vpop.f32.mrf.mxu0 }
 0x1b1   : > { %v6206_v15 = vpop.f32.mrf.mxu1  ;;  %v6208_v28 = vadd.f32 %v2306_v43, %v2194_v32 }
 0x1b2   : > { %v6210_v7 = vpop.f32.mrf.mxu0 }
 0x1b3   : > { %v6212_v18 = vpop.f32.mrf.mxu1 }
 0x1b4   : > { %v2201_v11 = vpop.f32.mrf.mxu0 }
 0x1b5   : > { %v2314_v22 = vpop.f32.mrf.mxu1  ;;  %v2202_v35 = vadd.f32 %v2201_v11, %v6153_v39 }
 0x1b6   : > { %v2203_v52 = vpop.f32.mrf.mxu0 }
 0x1b7   : > { %v2316_v38 = vpop.f32.mrf.mxu1  ;;  %v6215_v47 = vadd.f32 %v2314_v22, %v2202_v35  ;;  %v2204_v24 = vadd.f32 %v2203_v52, %v6156_v5 }
 0x1b8   : > { %v6218_v49 = vpop.f32.mrf.mxu0 }
 0x1b9   : > { %v6220_v51 = vpop.f32.mrf.mxu1  ;;  %v6222_v21 = vadd.f32 %v2316_v38, %v2204_v24 }
 0x1ba   : > { %v6224_v60 = vpop.f32.mrf.mxu0 }
 0x1bb   : > { %v6226_v25 = vpop.f32.mrf.mxu1 }
 0x1bc   : > { %v2211_v37 = vpop.f32.mrf.mxu0 }
 0x1bd   : > { %v2324_v33 = vpop.f32.mrf.mxu1  ;;  %v2212_v19 = vadd.f32 %v2211_v37, %v6153_v39 }
 0x1be   : > { %v2213_v34 = vpop.f32.mrf.mxu0 }
 0x1bf   : > { %v2326_v3 = vpop.f32.mrf.mxu1  ;;  %v6229_v53 = vadd.f32 %v2324_v33, %v2212_v19  ;;  %v2214_v17 = vadd.f32 %v2213_v34, %v6156_v5 }
 0x1c0   : > { %v6232_v26 = vpop.f32.mrf.mxu0 }
 0x1c1   : > { %v6234_v58 = vpop.f32.mrf.mxu1  ;;  %v6236_v0 = vadd.f32 %v2326_v3, %v2214_v17  ;;  %v2166_v17 = vadd.f32 %v6162_v59, %v6153_v39 }
 0x1c2   : > { %v6238_v63 = vpop.f32.mrf.mxu0 }
 0x1c3   : > { %v6240_v41 = vpop.f32.mrf.mxu1 }
 0x1c4   : > { %v2221_v44 = vpop.f32.mrf.mxu0 }
 0x1c5   : > { %v2334_v8 = vpop.f32.mrf.mxu1  ;;  %v2222_v55 = vadd.f32 %v2221_v44, %v6153_v39 }
 0x1c6   : > { %v2223_v56 = vpop.f32.mrf.mxu0 }
 0x1c7   : > { %v2336_v27 = vpop.f32.mrf.mxu1  ;;  %v6243_v14 = vadd.f32 %v2334_v8, %v2222_v55  ;;  %v2224_v23 = vadd.f32 %v2223_v56, %v6156_v5  ;;  %v2168_v55 = vadd.f32 %v6168_v10, %v6156_v5 }
 0x1c8   : > { %v6246_v1 = vpop.f32.mrf.mxu0 }
 0x1c9   : > { %v6248_v36 = vpop.f32.mrf.mxu1  ;;  %v6250_v50 = vadd.f32 %v2336_v27, %v2224_v23  ;;  %v2279_v23 = vadd.f32 %v6164_v29, %v2166_v17 }
 0x1ca   : > { %v6252_v4 = vpop.f32.mrf.mxu0 }
 0x1cb   : > { %v6254_v43 = vpop.f32.mrf.mxu1 }
 0x1cc   : > { %v2231_v32 = vpop.f32.mrf.mxu0 }
 0x1cd   : > { %v2344_v11 = vpop.f32.mrf.mxu1  ;;  %v2232_v22 = vadd.f32 %v2231_v32, %v6153_v39 }
 0x1ce   : > { %v2233_v35 = vpop.f32.mrf.mxu0 }
 0x1cf   : > { %v2346_v52 = vpop.f32.mrf.mxu1  ;;  %v6257_v38 = vadd.f32 %v2344_v11, %v2232_v22  ;;  %v2234_v24 = vadd.f32 %v2233_v35, %v6156_v5 }
 0x1d0   : > { %v6260_v37 = vpop.f32.mrf.mxu0 }
 0x1d1   : > { %6590 = vst [vmem:[#allocation9_spill] sm:$0xff] %v6257_v38  ;;  %v6262_v33 = vpop.f32.mrf.mxu1  ;;  %v6264_v19 = vadd.f32 %v2346_v52, %v2234_v24  ;;  %v2281_v52 = vadd.f32 %v6170_v57, %v2168_v55 }
 0x1d2   : > { %6591 = vst [vmem:[#allocation10_spill] sm:$0xff] %v6262_v33  ;;  %v6266_v34 = vpop.f32.mrf.mxu0 }
 0x1d3   : > { %6592 = vst [vmem:[#allocation6_spill] sm:$0xff] %v6264_v19  ;;  %6593 = vst [vmem:[#allocation7_spill] sm:$0xff] %v6266_v34  ;;  %v6268_v3 = vpop.f32.mrf.mxu1 }
 0x1d4   : > { %6594 = vst [vmem:[#allocation5_spill] sm:$0xff] %v6268_v3  ;;  %v2387_v44 = vpop.f32.mrf.mxu0  ;;  %v2176_v3 = vadd.f32 %v6176_v30, %v6153_v39 }
 0x1d5   : > { %v2500_v8 = vpop.f32.mrf.mxu1  ;;  %v2388_v11 = vadd.f32 %v2387_v44, %v6159_v46 }
 0x1d6   : > { %v2389_v56 = vpop.f32.mrf.mxu0  ;;  %v2289_v57 = vadd.f32 %v6178_v54, %v2176_v3 }
 0x1d7   : > { %v2502_v27 = vpop.f32.mrf.mxu1  ;;  %v2390_v32 = vadd.f32 %v2389_v56, %v6166_v42  ;;  %v2501_v33 = vadd.f32 %v2500_v8, %v2388_v11  ;;  %v2178_v42 = vadd.f32 %v6182_v2, %v6156_v5 }
 0x1d8   : > { %v2391_v22 = vpop.f32.mrf.mxu0 }
 0x1d9   : > { %v2504_v35 = vpop.f32.mrf.mxu1  ;;  %v2392_v24 = vadd.f32 %v2391_v22, %v2279_v23  ;;  %v2503_v38 = vadd.f32 %v2502_v27, %v2390_v32  ;;  %v2581_v30 = vmax.f32 %v2501_v33, 0.0  ;;  %v2291_v32 = vadd.f32 %v6184_v12, %v2178_v42  ;;  %v4633_v12 = vld [vmem:[%s6545_s5 + $0x70] sm:$0xff]  }
 0x1da   : > { %v2393_v9 = vpop.f32.mrf.mxu0 }
 0x1db   : > { %v2506_v59 = vpop.f32.mrf.mxu1  ;;  %v2505_v10 = vadd.f32 %v2504_v35, %v2392_v24  ;;  %v2394_v19 = vadd.f32 %v2393_v9, %v2281_v52  ;;  %v2582_v55 = vmax.f32 %v2503_v38, 0.0  ;;  %v2186_v24 = vadd.f32 %v6190_v31, %v6153_v39 }
 0x1dc   : > { %v2397_v34 = vpop.f32.mrf.mxu0  ;;  %v2188_v31 = vadd.f32 %v6196_v13, %v6156_v5  ;;  %v4635_v13 = vld [vmem:[%s6545_s5 + $0x68] sm:$0xff]  }
 0x1dd   : > { %v2510_v29 = vpop.f32.mrf.mxu1  ;;  %v2507_v46 = vadd.f32 %v2506_v59, %v2394_v19  ;;  %v2585_v17 = vmax.f32 %v2505_v10, 0.0  ;;  %v2398_v27 = vadd.f32 %v2397_v34, %v6173_v40  ;;  %v4631_v40 = vld [vmem:[%s6545_s5 + $0x78] sm:$0xff]  }
 0x1de   : > { %v2399_v44 = vpop.f32.mrf.mxu0  ;;  %4118 = vmatprep.subr.bf16.mxu0 %v4631_v40  ;;  %4182 = vmatprep.subr.bf16.mxu1 %v4631_v40 }
 0x1df   : > { %v2512_v56 = vpop.f32.mrf.mxu1  ;;  %v2586_v23 = vmax.f32 %v2507_v46, 0.0  ;;  %v2400_v22 = vadd.f32 %v2399_v44, %v6180_v61  ;;  %v2645_v2 = vpack.c.bf16 %v2585_v17, %v2581_v30  ;;  %v4632_v61 = vld [vmem:[%s6545_s5 + $0x38] sm:$0xff]   ;;  %v2511_v33 = vadd.f32 %v2510_v29, %v2398_v27  ;;  %v4634_v44 = vld [vmem:[%s6545_s5 + $0x30] sm:$0xff]  }
 0x1e0   : > { %v2401_v9 = vpop.f32.mrf.mxu0  ;;  %4119 = vmatpush3.bf16.msra.mxu0 %v4632_v61  ;;  %v2299_v29 = vadd.f32 %v6192_v48, %v2186_v24  ;;  %v2196_v48 = vadd.f32 %v6204_v20, %v6153_v39 }
 0x1e1   : > { %v2514_v8 = vpop.f32.mrf.mxu1  ;;  %v2646_v11 = vpack.c.bf16 %v2586_v23, %v2582_v55  ;;  %v2402_v35 = vadd.f32 %v2401_v9, %v2289_v57  ;;  %v2513_v54 = vadd.f32 %v2512_v56, %v2400_v22  ;;  %4120 = vmatprep.subr.bf16.mxu0 %v4633_v12  ;;  %v2589_v23 = vmax.f32 %v2511_v33, 0.0  ;;  %v4638_v33 = vld [vmem:[%s6545_s5 + $0x20] sm:$0xff]  }
 0x1e2   : > { %v2403_v19 = vpop.f32.mrf.mxu0  ;;  %v2301_v9 = vadd.f32 %v6198_v6, %v2188_v31  ;;  %v4637_v6 = vld [vmem:[%s6545_s5 + $0x60] sm:$0xff]  }
 0x1e3   : > { %v2516_v52 = vpop.f32.mrf.mxu1  ;;  %v2515_v38 = vadd.f32 %v2514_v8, %v2402_v35  ;;  %v2404_v3 = vadd.f32 %v2403_v19, %v2291_v32  ;;  %3216 = vmatprep.mubr.bf16.mxu1 %v2646_v11  ;;  %v2590_v56 = vmax.f32 %v2513_v54, 0.0 }
 0x1e4   : > { %v2407_v34 = vpop.f32.mrf.mxu0  ;;  %3217 = vmatmul.mubr.bf16.vlgmr.msra.gmra.mxu1 %v2645_v2  ;;  %4121 = vmatpush3.bf16.msra.mxu0 %v4634_v44  ;;  %v4636_v2 = vld [vmem:[%s6545_s5 + $0x28] sm:$0xff]  }
 0x1e5   : > { %v2520_v59 = vpop.f32.mrf.mxu1  ;;  %v2517_v10 = vadd.f32 %v2516_v52, %v2404_v3  ;;  %v2593_v42 = vmax.f32 %v2515_v38, 0.0  ;;  %4190 = vmatpush3.bf16.msra.mxu1 %v4632_v61  ;;  %v2408_v22 = vadd.f32 %v2407_v34, %v6187_v16  ;;  %4122 = vmatprep.subr.bf16.mxu0 %v4635_v13  ;;  %v2198_v38 = vadd.f32 %v6210_v7, %v6156_v5  ;;  %v4639_v7 = vld [vmem:[%s6545_s5 + $0x58] sm:$0xff]  }
 0x1e6   : > { %v2409_v46 = vpop.f32.mrf.mxu0  ;;  %4183 = vmatprep.subr.bf16.mxu1 %v4633_v12  ;;  %v2309_v34 = vadd.f32 %v6206_v15, %v2196_v48  ;;  %v2206_v15 = vadd.f32 %v6218_v49, %v6153_v39  ;;  %v2208_v49 = vadd.f32 %v6224_v60, %v6156_v5 }
 0x1e7   : > { %v2522_v17 = vpop.f32.mrf.mxu1  ;;  %v2594_v57 = vmax.f32 %v2517_v10, 0.0  ;;  %v2410_v55 = vadd.f32 %v2409_v46, %v6194_v62  ;;  %v2649_v11 = vpack.c.bf16 %v2593_v42, %v2589_v23  ;;  %v2521_v24 = vadd.f32 %v2520_v59, %v2408_v22  ;;  %v4640_v23 = vld [vmem:[%s6545_s5 + $0x18] sm:$0xff]  }
 0x1e8   : > { %v2411_v30 = vpop.f32.mrf.mxu0  ;;  %4123 = vmatpush3.bf16.msra.mxu0 %v4636_v2 }
 0x1e9   : > { %v2524_v27 = vpop.f32.mrf.mxu1  ;;  %v2650_v8 = vpack.c.bf16 %v2594_v57, %v2590_v56  ;;  %v2412_v32 = vadd.f32 %v2411_v30, %v2299_v29  ;;  %4191 = vmatpush3.bf16.msra.mxu1 %v4634_v44  ;;  %v2523_v19 = vadd.f32 %v2522_v17, %v2410_v55  ;;  %4124 = vmatprep.subr.bf16.mxu0 %v4637_v6  ;;  %v2597_v42 = vmax.f32 %v2521_v24, 0.0 }
 0x1ea   : > { %v2413_v62 = vpop.f32.mrf.mxu0  ;;  %4184 = vmatprep.subr.bf16.mxu1 %v4635_v13  ;;  %v2311_v29 = vadd.f32 %v6212_v18, %v2198_v38 }
 0x1eb   : > { %v2526_v35 = vpop.f32.mrf.mxu1  ;;  %v2525_v16 = vadd.f32 %v2524_v27, %v2412_v32  ;;  %v2414_v52 = vadd.f32 %v2413_v62, %v2301_v9  ;;  %3226 = vmatprep.mubr.bf16.mxu1 %v2650_v8  ;;  %v2598_v59 = vmax.f32 %v2523_v19, 0.0  ;;  %v2319_v62 = vadd.f32 %v6220_v51, %v2206_v15 }
 0x1ec   : > { %v2417_v20 = vpop.f32.mrf.mxu0  ;;  %3227 = vmatmul.mubr.bf16.gmra.mxu1 %v2649_v11  ;;  %4125 = vmatpush3.bf16.msra.mxu0 %v4638_v33 }
 0x1ed   : > { %v2530_v54 = vpop.f32.mrf.mxu1  ;;  %v2527_v3 = vadd.f32 %v2526_v35, %v2414_v52  ;;  %v2601_v40 = vmax.f32 %v2525_v16, 0.0  ;;  %4192 = vmatpush3.bf16.msra.mxu1 %v4636_v2  ;;  %v2418_v46 = vadd.f32 %v2417_v20, %v6201_v45  ;;  %4126 = vmatprep.subr.bf16.mxu0 %v4639_v7  ;;  %v2321_v20 = vadd.f32 %v6226_v25, %v2208_v49 }
 0x1ee   : > { %v2419_v61 = vpop.f32.mrf.mxu0  ;;  %4185 = vmatprep.subr.bf16.mxu1 %v4637_v6 }
 0x1ef   : > { %v2532_v12 = vpop.f32.mrf.mxu1  ;;  %v2602_v31 = vmax.f32 %v2527_v3, 0.0  ;;  %v2420_v10 = vadd.f32 %v2419_v61, %v6208_v28  ;;  %v2653_v55 = vpack.c.bf16 %v2601_v40, %v2597_v42  ;;  %v2531_v18 = vadd.f32 %v2530_v54, %v2418_v46 }
 0x1f0   : > { %v2421_v17 = vpop.f32.mrf.mxu0  ;;  %4127 = vmatpush3.bf16.msra.mxu0 %v4640_v23  ;;  %v2216_v61 = vadd.f32 %v6232_v26, %v6153_v39 }
 0x1f1   : > { %v2534_v44 = vpop.f32.mrf.mxu1  ;;  %v2654_v56 = vpack.c.bf16 %v2602_v31, %v2598_v59  ;;  %v2422_v57 = vadd.f32 %v2421_v17, %v2309_v34  ;;  %4193 = vmatpush3.bf16.msra.mxu1 %v4638_v33  ;;  %v2533_v22 = vadd.f32 %v2532_v12, %v2420_v10  ;;  %v2605_v16 = vmax.f32 %v2531_v18, 0.0 }
 0x1f2   : > { %v2423_v28 = vpop.f32.mrf.mxu0  ;;  %4186 = vmatprep.subr.bf16.mxu1 %v4639_v7  ;;  %v2329_v42 = vadd.f32 %v6234_v58, %v2216_v61 }
 0x1f3   : > { %v2536_v13 = vpop.f32.mrf.mxu1  ;;  %v2535_v45 = vadd.f32 %v2534_v44, %v2422_v57  ;;  %v2424_v30 = vadd.f32 %v2423_v28, %v2311_v29  ;;  %3236 = vmatprep.mubr.bf16.mxu1 %v2654_v56  ;;  %v2606_v35 = vmax.f32 %v2533_v22, 0.0  ;;  %v2226_v22 = vadd.f32 %v6246_v1, %v6153_v39 }
 0x1f4   : > { %v2427_v27 = vpop.f32.mrf.mxu0  ;;  %3237 = vmatmul.mubr.bf16.gmra.mxu1 %v2653_v55 }
 0x1f5   : > { %v2540_v9 = vpop.f32.mrf.mxu1  ;;  %v2537_v8 = vadd.f32 %v2536_v13, %v2424_v30  ;;  %v2609_v32 = vmax.f32 %v2535_v45, 0.0  ;;  %4194 = vmatpush3.bf16.msra.mxu1 %v4640_v23  ;;  %v2428_v52 = vadd.f32 %v2427_v27, %v6215_v47  ;;  %v2218_v47 = vadd.f32 %v6238_v63, %v6156_v5 }
 0x1f6   : > { %v2429_v48 = vpop.f32.mrf.mxu0 }
 0x1f7   : > { %v2542_v11 = vpop.f32.mrf.mxu1  ;;  %v2610_v2 = vmax.f32 %v2537_v8, 0.0  ;;  %v2430_v19 = vadd.f32 %v2429_v48, %v6222_v21  ;;  %v2657_v38 = vpack.c.bf16 %v2609_v32, %v2605_v16  ;;  %v2541_v21 = vadd.f32 %v2540_v9, %v2428_v52 }
 0x1f8   : > { %v2431_v6 = vpop.f32.mrf.mxu0  ;;  %v2331_v15 = vadd.f32 %v6240_v41, %v2218_v47  ;;  %v2339_v32 = vadd.f32 %v6248_v36, %v2226_v22 }
 0x1f9   : > { %v2544_v24 = vpop.f32.mrf.mxu1  ;;  %v2658_v60 = vpack.c.bf16 %v2610_v2, %v2606_v35  ;;  %v2432_v54 = vadd.f32 %v2431_v6, %v2319_v62  ;;  %v2543_v51 = vadd.f32 %v2542_v11, %v2430_v19  ;;  %v2613_v44 = vmax.f32 %v2541_v21, 0.0  ;;  %v6596_v21 = vld [vmem:[#allocation10_spill] sm:$0xff] }
 0x1fa   : > { %v2433_v3 = vpop.f32.mrf.mxu0 }
 0x1fb   : > { %v2546_v40 = vpop.f32.mrf.mxu1  ;;  %v2545_v12 = vadd.f32 %v2544_v24, %v2432_v54  ;;  %v2434_v33 = vadd.f32 %v2433_v3, %v2321_v20  ;;  %3246 = vmatprep.mubr.bf16.mxu1 %v2658_v60  ;;  %v2614_v46 = vmax.f32 %v2543_v51, 0.0  ;;  %v2236_v60 = vadd.f32 %v6260_v37, %v6153_v39  ;;  %v6597_v39 = vld [vmem:[#allocation6_spill] sm:$0xff] }
 0x1fc   : > { %v2437_v34 = vpop.f32.mrf.mxu0  ;;  %3247 = vmatmul.mubr.bf16.gmra.mxu1 %v2657_v38 }
 0x1fd   : > { %v2550_v59 = vpop.f32.mrf.mxu1  ;;  %v2547_v25 = vadd.f32 %v2546_v40, %v2434_v33  ;;  %v2617_v31 = vmax.f32 %v2545_v12, 0.0  ;;  %v2438_v29 = vadd.f32 %v2437_v34, %v6229_v53  ;;  %v2228_v53 = vadd.f32 %v6252_v4, %v6156_v5 }
 0x1fe   : > { %v2439_v10 = vpop.f32.mrf.mxu0  ;;  %v2349_v34 = vadd.f32 %v6596_v21, %v2236_v60  ;;  %v2739_v60 = vld [vmem:[%s6544_s4] sm:$0x3] }
 0x1ff   : > { %v2552_v7 = vpop.f32.mrf.mxu1  ;;  %v2618_v17 = vmax.f32 %v2547_v25, 0.0  ;;  %v2440_v26 = vadd.f32 %v2439_v10, %v6236_v0  ;;  %v2661_v63 = vpack.c.bf16 %v2617_v31, %v2613_v44  ;;  %v2551_v0 = vadd.f32 %v2550_v59, %v2438_v29  ;;  %v6598_v31 = vld [vmem:[#allocation9_spill] sm:$0xff] }
 0x200   : > { %v2441_v56 = vpop.f32.mrf.mxu0  ;;  %v2341_v16 = vadd.f32 %v6254_v43, %v2228_v53  ;;  %v4644_v53 = vld [vmem:[%s6545_s5 + $0x8] sm:$0xff]  }
 0x201   : > { %v2554_v57 = vpop.f32.mrf.mxu1  ;;  %v2662_v55 = vpack.c.bf16 %v2618_v17, %v2614_v46  ;;  %v2442_v28 = vadd.f32 %v2441_v56, %v2329_v42  ;;  %v2553_v58 = vadd.f32 %v2552_v7, %v2440_v26  ;;  %v2621_v62 = vmax.f32 %v2551_v0, 0.0  ;;  %v6599_v46 = vld [vmem:[#allocation5_spill] sm:$0xff]  ;;  %v4641_v0 = vld [vmem:[%s6545_s5 + $0x50] sm:$0xff]  }
 0x202   : > { %v2443_v13 = vpop.f32.mrf.mxu0  ;;  %4128 = vmatprep.subr.bf16.mxu0 %v4641_v0  ;;  %4187 = vmatprep.subr.bf16.mxu1 %v4641_v0 }
 0x203   : > { %v2556_v23 = vpop.f32.mrf.mxu1  ;;  %v2555_v45 = vadd.f32 %v2554_v57, %v2442_v28  ;;  %v2444_v30 = vadd.f32 %v2443_v13, %v2331_v15  ;;  %3256 = vmatprep.mubr.bf16.mxu1 %v2662_v55  ;;  %v2622_v48 = vmax.f32 %v2553_v58, 0.0 }
 0x204   : > { %v2447_v18 = vpop.f32.mrf.mxu0  ;;  %3257 = vmatmul.mubr.bf16.gmra.mxu1 %v2661_v63 }
 0x205   : > { %v2560_v27 = vpop.f32.mrf.mxu1  ;;  %v2557_v41 = vadd.f32 %v2556_v23, %v2444_v30  ;;  %v2625_v9 = vmax.f32 %v2555_v45, 0.0  ;;  %v2448_v35 = vadd.f32 %v2447_v18, %v6243_v14  ;;  %v6595_v14 = vld [vmem:[#allocation7_spill] sm:$0xff] }
 0x206   : > { %v2449_v49 = vpop.f32.mrf.mxu0  ;;  %v2238_v61 = vadd.f32 %v6595_v14, %v6156_v5  ;;  %v4642_v18 = vld [vmem:[%s6545_s5 + $0x10] sm:$0xff]  }
 0x207   : > { %v2562_v8 = vpop.f32.mrf.mxu1  ;;  %v2626_v11 = vmax.f32 %v2557_v41, 0.0  ;;  %v2450_v1 = vadd.f32 %v2449_v49, %v6250_v50  ;;  %v2665_v4 = vpack.c.bf16 %v2625_v9, %v2621_v62  ;;  %v2561_v50 = vadd.f32 %v2560_v27, %v2448_v35  ;;  %4129 = vmatpush3.bf16.msra.mxu0 %v4642_v18  ;;  %4195 = vmatpush3.bf16.msra.mxu1 %v4642_v18  ;;  %v4643_v27 = vld [vmem:[%s6545_s5 + $0x48] sm:$0xff]   ;;  %v4645_v41 = vld [vmem:[%s6545_s5 + $0x40] sm:$0xff]  }
 0x208   : > { %v2451_v2 = vpop.f32.mrf.mxu0  ;;  %v2351_v17 = vadd.f32 %v6599_v46, %v2238_v61  ;;  %4130 = vmatprep.subr.bf16.mxu0 %v4643_v27  ;;  %4188 = vmatprep.subr.bf16.mxu1 %v4643_v27  ;;  %v4646_v9 = vld [vmem:[%s6545_s5] sm:$0xff]  }
 0x209   : > { %v2564_v19 = vpop.f32.mrf.mxu1  ;;  %v2666_v52 = vpack.c.bf16 %v2626_v11, %v2622_v48  ;;  %v2452_v6 = vadd.f32 %v2451_v2, %v2339_v32  ;;  %v2563_v36 = vadd.f32 %v2562_v8, %v2450_v1  ;;  %v2629_v25 = vmax.f32 %v2561_v50, 0.0 }
 0x20a   : > { %v2453_v24 = vpop.f32.mrf.mxu0 }
 0x20b   : > { %v2566_v20 = vpop.f32.mrf.mxu1  ;;  %v2565_v54 = vadd.f32 %v2564_v19, %v2452_v6  ;;  %v2454_v38 = vadd.f32 %v2453_v24, %v2341_v16  ;;  %3266 = vmatprep.mubr.bf16.mxu1 %v2666_v52  ;;  %v2630_v59 = vmax.f32 %v2563_v36, 0.0  ;;  %4131 = vmatpush3.bf16.msra.mxu0 %v4644_v53 }
 0x20c   : > { %v2457_v3 = vpop.f32.mrf.mxu0  ;;  %3267 = vmatmul.mubr.bf16.gmra.mxu1 %v2665_v4  ;;  %4132 = vmatprep.subr.bf16.mxu0 %v4645_v41 }
 0x20d   : > { %v2570_v40 = vpop.f32.mrf.mxu1  ;;  %v2567_v43 = vadd.f32 %v2566_v20, %v2454_v38  ;;  %v2633_v51 = vmax.f32 %v2565_v54, 0.0  ;;  %v2458_v10 = vadd.f32 %v2457_v3, %v6598_v31  ;;  %4196 = vmatpush3.bf16.msra.mxu1 %v4644_v53  ;;  %v6600_v54 = vld [vmem:[#allocation11_spill] sm:$0xff] }
 0x20e   : > { %v2459_v12 = vpop.f32.mrf.mxu0  ;;  %4189 = vmatprep.subr.bf16.mxu1 %v4645_v41  ;;  %v6601_v38 = vsub.s32 1, %v6600_v54  ;;  %v6602_v3 = vsub.s32 0, %v6600_v54 }
 0x20f   : > { %v2572_v33 = vpop.f32.mrf.mxu1  ;;  %v2634_v47 = vmax.f32 %v2567_v43, 0.0  ;;  %v2460_v37 = vadd.f32 %v2459_v12, %v6597_v39  ;;  %v2669_v5 = vpack.c.bf16 %v2633_v51, %v2629_v25  ;;  %v2571_v55 = vadd.f32 %v2570_v40, %v2458_v10  ;;  %4133 = vmatpush3.bf16.msra.mxu0 %v4646_v9 }
 0x210   : > { %v2461_v7 = vpop.f32.mrf.mxu0  ;;  %v6397_v50 = vrot.slane %v2739_v60, %v6601_v38  ;;  %v6401_v40 = vrot.slane %v2739_v60, %v6602_v3 }
 0x211   : > { %v2574_v42 = vpop.f32.mrf.mxu1  ;;  %v2670_v26 = vpack.c.bf16 %v2634_v47, %v2630_v59  ;;  %v2462_v44 = vadd.f32 %v2461_v7, %v2349_v34  ;;  %v2573_v56 = vadd.f32 %v2572_v33, %v2460_v37  ;;  %v2637_v58 = vmax.f32 %v2571_v55, 0.0  ;;  %4197 = vmatpush3.bf16.msra.mxu1 %v4646_v9 }
 0x212   : > { %v2463_v29 = vpop.f32.mrf.mxu0 }
 0x213   : > { %v2575_v57 = vadd.f32 %v2574_v42, %v2462_v44  ;;  %v2464_v15 = vadd.f32 %v2463_v29, %v2351_v17  ;;  %3276 = vmatprep.mubr.bf16.mxu1 %v2670_v26  ;;  %v2576_v28 = vpop.f32.mrf.mxu1  ;;  %v2638_v23 = vmax.f32 %v2573_v56, 0.0 }
 0x214   : > { %3277 = vmatmul.mubr.bf16.gmra.mxu1 %v2669_v5 }
 0x215   : > { %v2577_v63 = vadd.f32 %v2576_v28, %v2464_v15  ;;  %v2641_v13 = vmax.f32 %v2575_v57, 0.0 }
 0x217   : > { %v2642_v22 = vmax.f32 %v2577_v63, 0.0  ;;  %v2673_v30 = vpack.c.bf16 %v2641_v13, %v2637_v58 }
 0x219   : > { %v2674_v45 = vpack.c.bf16 %v2642_v22, %v2638_v23 }
 0x21b   : > { %3286 = vmatprep.mubr.bf16.mxu1 %v2674_v45 }
 0x21c   : > { %3287 = vmatmul.mubr.bf16.gmra.mxu1 %v2673_v30 }
 0x224   : > { %v3105_v49 = vpop.f32.mrf.mxu0 }
 0x225   : > { %v3106_v33 = vadd.f32 %v3105_v49, %v6401_v40 }
 0x226   : > { %v3107_v8 = vpop.f32.mrf.mxu0 }
 0x227   : > { %v3108_v51 = vadd.f32 %v3107_v8, %v6397_v50 }
 0x228   : > { %v3109_v32 = vpop.f32.mrf.mxu0 }
 0x229   : > { %v3110_v12 = vadd.f32 %v3109_v32, %v6401_v40 }
 0x22a   : > { %v3111_v48 = vpop.f32.mrf.mxu0 }
 0x22b   : > { %v3112_v34 = vadd.f32 %v3111_v48, %v6397_v50 }
 0x22c   : > { %v3115_v11 = vpop.f32.mrf.mxu0 }
 0x22d   : > { %v3116_v57 = vadd.f32 %v3115_v11, %v6401_v40 }
 0x22e   : > { %v3117_v1 = vpop.f32.mrf.mxu0 }
 0x22f   : > { %v3118_v5 = vadd.f32 %v3117_v1, %v6397_v50 }
 0x230   : > { %v3119_v62 = vpop.f32.mrf.mxu0 }
 0x231   : > { %v3120_v29 = vadd.f32 %v3119_v62, %v6401_v40 }
 0x232   : > { %v3121_v35 = vpop.f32.mrf.mxu0 }
 0x233   : > { %v3122_v28 = vadd.f32 %v3121_v35, %v6397_v50 }
 0x234   : > { %v3125_v2 = vpop.f32.mrf.mxu0 }
 0x235   : > { %v3126_v48 = vadd.f32 %v3125_v2, %v6401_v40 }
 0x236   : > { %v3127_v19 = vpop.f32.mrf.mxu0 }
 0x237   : > { %v3128_v49 = vadd.f32 %v3127_v19, %v6397_v50 }
 0x238   : > { %v3129_v16 = vpop.f32.mrf.mxu0 }
 0x239   : > { %v3130_v8 = vadd.f32 %v3129_v16, %v6401_v40 }
 0x23a   : > { %v3131_v52 = vpop.f32.mrf.mxu0 }
 0x23b   : > { %v3132_v62 = vadd.f32 %v3131_v52, %v6397_v50 }
 0x23c   : > { %v6382_v6 = vpop.f32.mrf.mxu0 }
 0x23e   : > { %v6384_v4 = vpop.f32.mrf.mxu0 }
 0x23f   : > { %v3138_v2 = vadd.f32 %v6384_v4, %v6397_v50 }
 0x240   : > { %v6386_v24 = vpop.f32.mrf.mxu0 }
 0x241   : > { %v3140_v52 = vadd.f32 %v6386_v24, %v6401_v40 }
 0x242   : > { %v6388_v20 = vpop.f32.mrf.mxu0 }
 0x244   : > { %v6393_v36 = vpop.f32.mrf.mxu0 }
 0x246   : > { %v6403_v61 = vpop.f32.mrf.mxu0 }
 0x248   : > { %v6409_v39 = vpop.f32.mrf.mxu0 }
 0x24a   : > { %v6411_v17 = vpop.f32.mrf.mxu0 }
 0x24c   : > { %v6417_v23 = vpop.f32.mrf.mxu0 }
 0x24e   : > { %v6419_v53 = vpop.f32.mrf.mxu0 }
 0x250   : > { %v3159_v54 = vpop.f32.mrf.mxu0 }
 0x252   : > { %v3161_v16 = vpop.f32.mrf.mxu0 }
 0x2a4   : > { %v3218_v14 = vpop.f32.mrf.mxu1 }
 0x2a5   : > { %v3219_v37 = vadd.f32 %v3218_v14, %v3106_v33 }
 0x2a6   : > { %v3220_v43 = vpop.f32.mrf.mxu1 }
 0x2a7   : > { %v3221_v59 = vadd.f32 %v3220_v43, %v3108_v51  ;;  %v3297_v26 = vmax.f32 %v3219_v37, 0.0 }
 0x2a8   : > { %v3222_v21 = vpop.f32.mrf.mxu1 }
 0x2a9   : > { %v3223_v47 = vadd.f32 %v3222_v21, %v3110_v12  ;;  %v3298_v42 = vmax.f32 %v3221_v59, 0.0  ;;  %v3136_v59 = vadd.f32 %v6382_v6, %v6401_v40 }
 0x2aa   : > { %v3224_v25 = vpop.f32.mrf.mxu1 }
 0x2ab   : > { %v3225_v31 = vadd.f32 %v3224_v25, %v3112_v34  ;;  %v3299_v10 = vmax.f32 %v3223_v47, 0.0  ;;  %v3142_v25 = vadd.f32 %v6388_v20, %v6397_v50  ;;  %v3150_v20 = vadd.f32 %v6409_v39, %v6401_v40 }
 0x2ac   : > { %v3228_v7 = vpop.f32.mrf.mxu1 }
 0x2ad   : > { %v3300_v46 = vmax.f32 %v3225_v31, 0.0  ;;  %v3329_v15 = vpack.c.bf16 %v3299_v10, %v3297_v26  ;;  %v3229_v22 = vadd.f32 %v3228_v7, %v3116_v57  ;;  %v3165_v7 = vpop.f32.mrf.mxu0  ;;  %v3148_v57 = vadd.f32 %v6403_v61, %v6397_v50 }
 0x2ae   : > { %v3230_v44 = vpop.f32.mrf.mxu1 }
 0x2af   : > { %v3330_v56 = vpack.c.bf16 %v3300_v46, %v3298_v42  ;;  %v3231_v63 = vadd.f32 %v3230_v44, %v3118_v5  ;;  %v3301_v41 = vmax.f32 %v3229_v22, 0.0 }
 0x2b0   : > { %v3232_v55 = vpop.f32.mrf.mxu1 }
 0x2b1   : > { %v3233_v13 = vadd.f32 %v3232_v55, %v3120_v29  ;;  %3512 = vmatprep.mubr.bf16.mxu0 %v3330_v56  ;;  %v3302_v18 = vmax.f32 %v3231_v63, 0.0  ;;  %v3167_v29 = vpop.f32.mrf.mxu0  ;;  %v3146_v55 = vadd.f32 %v6393_v36, %v6401_v40 }
 0x2b2   : > { %v3234_v58 = vpop.f32.mrf.mxu1  ;;  %3513 = vmatmul.mubr.bf16.vlgmr.msra.gmra.mxu0 %v3329_v15 }
 0x2b3   : > { %v3235_v45 = vadd.f32 %v3234_v58, %v3122_v28  ;;  %v3303_v30 = vmax.f32 %v3233_v13, 0.0  ;;  %v3152_v13 = vadd.f32 %v6411_v17, %v6397_v50  ;;  %v3160_v17 = vadd.f32 %v3159_v54, %v6401_v40 }
 0x2b4   : > { %v3238_v0 = vpop.f32.mrf.mxu1 }
 0x2b5   : > { %v3304_v27 = vmax.f32 %v3235_v45, 0.0  ;;  %v3331_v11 = vpack.c.bf16 %v3303_v30, %v3301_v41  ;;  %v3239_v38 = vadd.f32 %v3238_v0, %v3126_v48  ;;  %v3169_v45 = vpop.f32.mrf.mxu0  ;;  %v3156_v48 = vadd.f32 %v6417_v23, %v6401_v40 }
 0x2b6   : > { %v3240_v9 = vpop.f32.mrf.mxu1  ;;  %v3168_v23 = vadd.f32 %v3167_v29, %v6397_v50 }
 0x2b7   : > { %v3332_v32 = vpack.c.bf16 %v3304_v27, %v3302_v18  ;;  %v3241_v35 = vadd.f32 %v3240_v9, %v3128_v49  ;;  %v3305_v33 = vmax.f32 %v3239_v38, 0.0  ;;  %v3171_v9 = vpop.f32.mrf.mxu0 }
 0x2b8   : > { %v3242_v1 = vpop.f32.mrf.mxu1 }
 0x2b9   : > { %v3243_v60 = vadd.f32 %v3242_v1, %v3130_v8  ;;  %3520 = vmatprep.mubr.bf16.mxu0 %v3332_v32  ;;  %v3306_v19 = vmax.f32 %v3241_v35, 0.0  ;;  %v3158_v8 = vadd.f32 %v6419_v53, %v6397_v50  ;;  %v3175_v38 = vpop.f32.mrf.mxu0 }
 0x2ba   : > { %v3244_v3 = vpop.f32.mrf.mxu1  ;;  %3521 = vmatmul.mubr.bf16.gmra.mxu0 %v3331_v11 }
 0x2bb   : > { %v3245_v14 = vadd.f32 %v3244_v3, %v3132_v62  ;;  %v3307_v43 = vmax.f32 %v3243_v60, 0.0  ;;  %v3162_v62 = vadd.f32 %v3161_v16, %v6397_v50 }
 0x2bc   : > { %v3248_v51 = vpop.f32.mrf.mxu1 }
 0x2bd   : > { %v3308_v12 = vmax.f32 %v3245_v14, 0.0  ;;  %v3333_v47 = vpack.c.bf16 %v3307_v43, %v3305_v33  ;;  %v3249_v42 = vadd.f32 %v3248_v51, %v3136_v59 }
 0x2be   : > { %v3250_v21 = vpop.f32.mrf.mxu1 }
 0x2bf   : > { %v3334_v34 = vpack.c.bf16 %v3308_v12, %v3306_v19  ;;  %v3251_v31 = vadd.f32 %v3250_v21, %v3138_v2  ;;  %v3309_v56 = vmax.f32 %v3249_v42, 0.0  ;;  %v3177_v12 = vpop.f32.mrf.mxu0  ;;  %v3170_v2 = vadd.f32 %v3169_v45, %v6401_v40 }
 0x2c0   : > { %v3252_v37 = vpop.f32.mrf.mxu1 }
 0x2c1   : > { %v3253_v10 = vadd.f32 %v3252_v37, %v3140_v52  ;;  %3528 = vmatprep.mubr.bf16.mxu0 %v3334_v34  ;;  %v3310_v24 = vmax.f32 %v3251_v31, 0.0  ;;  %v3166_v52 = vadd.f32 %v3165_v7, %v6401_v40  ;;  %v3179_v31 = vpop.f32.mrf.mxu0  ;;  %v3178_v7 = vadd.f32 %v3177_v12, %v6397_v50 }
 0x2c2   : > { %v3254_v46 = vpop.f32.mrf.mxu1  ;;  %3529 = vmatmul.mubr.bf16.gmra.mxu0 %v3333_v47  ;;  %v3172_v47 = vadd.f32 %v3171_v9, %v6397_v50 }
 0x2c3   : > { %v3255_v4 = vadd.f32 %v3254_v46, %v3142_v25  ;;  %v3311_v26 = vmax.f32 %v3253_v10, 0.0 }
 0x2c4   : > { %v3258_v44 = vpop.f32.mrf.mxu1 }
 0x2c5   : > { %v3312_v5 = vmax.f32 %v3255_v4, 0.0  ;;  %v3335_v28 = vpack.c.bf16 %v3311_v26, %v3309_v56  ;;  %v3259_v30 = vadd.f32 %v3258_v44, %v3146_v55 }
 0x2c6   : > { %v3260_v6 = vpop.f32.mrf.mxu1 }
 0x2c7   : > { %v3336_v15 = vpack.c.bf16 %v3312_v5, %v3310_v24  ;;  %v3261_v22 = vadd.f32 %v3260_v6, %v3148_v57  ;;  %v3313_v49 = vmax.f32 %v3259_v30, 0.0  ;;  %v3181_v5 = vpop.f32.mrf.mxu0  ;;  %v3180_v6 = vadd.f32 %v3179_v31, %v6401_v40 }
 0x2c8   : > { %v3262_v63 = vpop.f32.mrf.mxu1 }
 0x2c9   : > { %v3263_v58 = vadd.f32 %v3262_v63, %v3150_v20  ;;  %3536 = vmatprep.mubr.bf16.mxu0 %v3336_v15  ;;  %v3314_v39 = vmax.f32 %v3261_v22, 0.0  ;;  %v3176_v20 = vadd.f32 %v3175_v38, %v6401_v40 }
 0x2ca   : > { %v3264_v0 = vpop.f32.mrf.mxu1  ;;  %3537 = vmatmul.mubr.bf16.gmra.mxu0 %v3335_v28  ;;  %v3182_v28 = vadd.f32 %v3181_v5, %v6397_v50 }
 0x2cb   : > { %v3265_v61 = vadd.f32 %v3264_v0, %v3152_v13  ;;  %v3315_v18 = vmax.f32 %v3263_v58, 0.0 }
 0x2cc   : > { %v3268_v27 = vpop.f32.mrf.mxu1 }
 0x2cd   : > { %v3316_v41 = vmax.f32 %v3265_v61, 0.0  ;;  %v3337_v11 = vpack.c.bf16 %v3315_v18, %v3313_v49  ;;  %v3269_v3 = vadd.f32 %v3268_v27, %v3156_v48  ;;  %v6459_v49 = vld [vmem:[%s6546_s6] ss:$0 sm:$0xff] }
 0x2ce   : > { %v3270_v36 = vpop.f32.mrf.mxu1 }
 0x2cf   : > { %v3338_v32 = vpack.c.bf16 %v3316_v41, %v3314_v39  ;;  %v3271_v35 = vadd.f32 %v3270_v36, %v3158_v8  ;;  %v3317_v33 = vmax.f32 %v3269_v3, 0.0 }
 0x2d0   : > { %v3272_v1 = vpop.f32.mrf.mxu1 }
 0x2d1   : > { %v3273_v60 = vadd.f32 %v3272_v1, %v3160_v17  ;;  %3544 = vmatprep.mubr.bf16.mxu1 %v3338_v32  ;;  %v3318_v19 = vmax.f32 %v3271_v35, 0.0 }
 0x2d2   : > { %v3274_v14 = vpop.f32.mrf.mxu1  ;;  %3545 = vmatmul.mubr.bf16.vlgmr.msra.gmra.mxu1 %v3337_v11 }
 0x2d3   : > { %v3275_v43 = vadd.f32 %v3274_v14, %v3162_v62  ;;  %v3319_v51 = vmax.f32 %v3273_v60, 0.0 }
 0x2d4   : > { %v3278_v53 = vpop.f32.mrf.mxu1 }
 0x2d5   : > { %v3320_v54 = vmax.f32 %v3275_v43, 0.0  ;;  %v3339_v34 = vpack.c.bf16 %v3319_v51, %v3317_v33  ;;  %v3279_v10 = vadd.f32 %v3278_v53, %v3166_v52 }
 0x2d6   : > { %v3280_v21 = vpop.f32.mrf.mxu1 }
 0x2d7   : > { %v3340_v16 = vpack.c.bf16 %v3320_v54, %v3318_v19  ;;  %v3281_v37 = vadd.f32 %v3280_v21, %v3168_v23  ;;  %v3321_v29 = vmax.f32 %v3279_v10, 0.0 }
 0x2d8   : > { %v3282_v59 = vpop.f32.mrf.mxu1 }
 0x2d9   : > { %v3283_v25 = vadd.f32 %v3282_v59, %v3170_v2  ;;  %3552 = vmatprep.mubr.bf16.mxu1 %v3340_v16  ;;  %v3322_v44 = vmax.f32 %v3281_v37, 0.0 }
 0x2da   : > { %v3284_v42 = vpop.f32.mrf.mxu1  ;;  %3553 = vmatmul.mubr.bf16.gmra.mxu1 %v3339_v34 }
 0x2db   : > { %v3285_v46 = vadd.f32 %v3284_v42, %v3172_v47  ;;  %v3323_v4 = vmax.f32 %v3283_v25, 0.0 }
 0x2dc   : > { %v3288_v26 = vpop.f32.mrf.mxu1 }
 0x2dd   : > { %v3324_v24 = vmax.f32 %v3285_v46, 0.0  ;;  %v3341_v15 = vpack.c.bf16 %v3323_v4, %v3321_v29  ;;  %v3289_v22 = vadd.f32 %v3288_v26, %v3176_v20 }
 0x2de   : > { %v3290_v56 = vpop.f32.mrf.mxu1 }
 0x2df   : > { %v3342_v57 = vpack.c.bf16 %v3324_v24, %v3322_v44  ;;  %v3291_v63 = vadd.f32 %v3290_v56, %v3178_v7  ;;  %v3325_v18 = vmax.f32 %v3289_v22, 0.0 }
 0x2e0   : > { %v3292_v55 = vpop.f32.mrf.mxu1 }
 0x2e1   : > { %v3293_v13 = vadd.f32 %v3292_v55, %v3180_v6  ;;  %3560 = vmatprep.mubr.bf16.mxu1 %v3342_v57  ;;  %v3326_v0 = vmax.f32 %v3291_v63, 0.0 }
 0x2e2   : > { %v3294_v58 = vpop.f32.mrf.mxu1  ;;  %3561 = vmatmul.mubr.bf16.gmra.mxu1 %v3341_v15 }
 0x2e3   : > { %v3295_v45 = vadd.f32 %v3294_v58, %v3182_v28  ;;  %v3327_v30 = vmax.f32 %v3293_v13, 0.0 }
 0x2e5   : > { %v3328_v61 = vmax.f32 %v3295_v45, 0.0  ;;  %v3343_v39 = vpack.c.bf16 %v3327_v30, %v3325_v18 }
 0x2e7   : > { %v3344_v27 = vpack.c.bf16 %v3328_v61, %v3326_v0 }
 0x2e9   : > { %3568 = vmatprep.mubr.bf16.mxu1 %v3344_v27 }
 0x2ea   : > { %3569 = vmatmul.mubr.bf16.gmra.mxu1 %v3343_v39 }
 0x372   : > { %v4134_v40 = vpop.f32.mrf.mxu0 }
 0x374   : > { %v4135_v41 = vpop.f32.mrf.mxu0 }
 0x375   : > { %v4136_v9 = vadd.f32 %v4135_v41, %v4134_v40 }
 0x376   : > { %v4137_v50 = vpop.f32.mrf.mxu0 }
 0x377   : > { %v3515_v32 = vadd.f32 %v4136_v9, %v6459_v49 }
 0x378   : > { %v4138_v36 = vpop.f32.mrf.mxu0 }
 0x379   : > { %v4139_v8 = vadd.f32 %v4138_v36, %v4137_v50 }
 0x37a   : > { %v4140_v17 = vpop.f32.mrf.mxu0 }
 0x37b   : > { %v3518_v48 = vadd.f32 %v4139_v8, %v6459_v49 }
 0x37c   : > { %v4141_v11 = vpop.f32.mrf.mxu0 }
 0x37d   : > { %v4074_v1 = vpack.c.bf16 %v3518_v48, %v3515_v32  ;;  %v4142_v35 = vadd.f32 %v4141_v11, %v4140_v17 }
 0x37e   : > { %v4143_v62 = vpop.f32.mrf.mxu0 }
 0x37f   : > { %4075 = vst [vmem:[%s6465_s21] sm:$0xff] %v4074_v1   ;;  %v3523_v14 = vadd.f32 %v4142_v35, %v6459_v49 }
 0x380   : > { %v4144_v60 = vpop.f32.mrf.mxu0 }
 0x381   : > { %v4145_v38 = vadd.f32 %v4144_v60, %v4143_v62 }
 0x382   : > { %v4146_v3 = vpop.f32.mrf.mxu0 }
 0x383   : > { %v3526_v43 = vadd.f32 %v4145_v38, %v6459_v49 }
 0x384   : > { %v4147_v51 = vpop.f32.mrf.mxu0 }
 0x385   : > { %v4079_v53 = vpack.c.bf16 %v3526_v43, %v3523_v14  ;;  %v4148_v54 = vadd.f32 %v4147_v51, %v4146_v3 }
 0x386   : > { %v4149_v19 = vpop.f32.mrf.mxu0 }
 0x387   : > { %4111 = vst [vmem:[%s6465_s21 + $0x8] sm:$0xff] %v4079_v53   ;;  %v3531_v23 = vadd.f32 %v4148_v54, %v6459_v49 }
 0x388   : > { %v4150_v12 = vpop.f32.mrf.mxu0 }
 0x389   : > { %v4151_v33 = vadd.f32 %v4150_v12, %v4149_v19 }
 0x38a   : > { %v4152_v21 = vpop.f32.mrf.mxu0 }
 0x38b   : > { %v3534_v2 = vadd.f32 %v4151_v33, %v6459_v49 }
 0x38c   : > { %v4153_v16 = vpop.f32.mrf.mxu0 }
 0x38d   : > { %v4084_v52 = vpack.c.bf16 %v3534_v2, %v3531_v23  ;;  %v4154_v59 = vadd.f32 %v4153_v16, %v4152_v21 }
 0x38e   : > { %v4155_v34 = vpop.f32.mrf.mxu0 }
 0x38f   : > { %4112 = vst [vmem:[%s6465_s21 + $0x10] sm:$0xff] %v4084_v52   ;;  %v3539_v31 = vadd.f32 %v4154_v59, %v6459_v49 }
 0x390   : > { %v4156_v47 = vpop.f32.mrf.mxu0 }
 0x391   : > { %v4157_v37 = vadd.f32 %v4156_v47, %v4155_v34 }
 0x392   : > { %v4158_v25 = vpop.f32.mrf.mxu1 }
 0x393   : > { %v3542_v10 = vadd.f32 %v4157_v37, %v6459_v49 }
 0x394   : > { %v4159_v42 = vpop.f32.mrf.mxu1 }
 0x395   : > { %v4089_v46 = vpack.c.bf16 %v3542_v10, %v3539_v31  ;;  %v4160_v26 = vadd.f32 %v4159_v42, %v4158_v25 }
 0x396   : > { %v4161_v4 = vpop.f32.mrf.mxu1 }
 0x397   : > { %4113 = vst [vmem:[%s6465_s21 + $0x18] sm:$0xff] %v4089_v46   ;;  %v3547_v29 = vadd.f32 %v4160_v26, %v6459_v49 }
 0x398   : > { %v4162_v44 = vpop.f32.mrf.mxu1 }
 0x399   : > { %v4163_v24 = vadd.f32 %v4162_v44, %v4161_v4 }
 0x39a   : > { %v4164_v5 = vpop.f32.mrf.mxu1 }
 0x39b   : > { %v3550_v56 = vadd.f32 %v4163_v24, %v6459_v49 }
 0x39c   : > { %v4165_v7 = vpop.f32.mrf.mxu1 }
 0x39d   : > { %v4094_v6 = vpack.c.bf16 %v3550_v56, %v3547_v29  ;;  %v4166_v20 = vadd.f32 %v4165_v7, %v4164_v5 }
 0x39e   : > { %v4167_v57 = vpop.f32.mrf.mxu1 }
 0x39f   : > { %4114 = vst [vmem:[%s6465_s21 + $0x20] sm:$0xff] %v4094_v6   ;;  %v3555_v63 = vadd.f32 %v4166_v20, %v6459_v49 }
 0x3a0   : > { %v4168_v15 = vpop.f32.mrf.mxu1 }
 0x3a1   : > { %v4169_v55 = vadd.f32 %v4168_v15, %v4167_v57 }
 0x3a2   : > { %v4170_v28 = vpop.f32.mrf.mxu1 }
 0x3a3   : > { %v3558_v13 = vadd.f32 %v4169_v55, %v6459_v49 }
 0x3a4   : > { %v4171_v22 = vpop.f32.mrf.mxu1 }
 0x3a5   : > { %v4099_v58 = vpack.c.bf16 %v3558_v13, %v3555_v63  ;;  %v4172_v30 = vadd.f32 %v4171_v22, %v4170_v28 }
 0x3a6   : > { %v4173_v45 = vpop.f32.mrf.mxu1 }
 0x3a7   : > { %4115 = vst [vmem:[%s6465_s21 + $0x28] sm:$0xff] %v4099_v58   ;;  %v3563_v27 = vadd.f32 %v4172_v30, %v6459_v49 }
 0x3a8   : > { %v4174_v0 = vpop.f32.mrf.mxu1 }
 0x3a9   : > { %v4175_v61 = vadd.f32 %v4174_v0, %v4173_v45 }
 0x3aa   : > { %v4176_v18 = vpop.f32.mrf.mxu1 }
 0x3ab   : > { %v3566_v39 = vadd.f32 %v4175_v61, %v6459_v49 }
 0x3ac   : > { %v4177_v40 = vpop.f32.mrf.mxu1 }
 0x3ad   : > { %v4104_v41 = vpack.c.bf16 %v3566_v39, %v3563_v27  ;;  %v4178_v9 = vadd.f32 %v4177_v40, %v4176_v18 }
 0x3ae   : > { %v4179_v50 = vpop.f32.mrf.mxu1 }
 0x3af   : > { %4116 = vst [vmem:[%s6465_s21 + $0x30] sm:$0xff] %v4104_v41   ;;  %v3571_v17 = vadd.f32 %v4178_v9, %v6459_v49 }
 0x3b0   : > { %v4180_v36 = vpop.f32.mrf.mxu1 }
 0x3b1   : > { %v4181_v8 = vadd.f32 %v4180_v36, %v4179_v50 }
 0x3b3   : > { %v3574_v32 = vadd.f32 %v4181_v8, %v6459_v49 }
 0x3b5   : > { %v4109_v48 = vpack.c.bf16 %v3574_v32, %v3571_v17 }
 0x3b7   : > { %4117 = vst [vmem:[%s6465_s21 + $0x38] sm:$0xff] %v4109_v48  }
 0x3b8   : > { %4660 = shalt.err (!%p4657_p3)
}
 0x3b9   : > { %s4661_s18 = scalar_lea.hbm %s6493_s23, 1024  ;;  %s4665_s20 = scalar_lea.hbm %s6547_s7, 2048 }
 0x3ba   : > { %p4662_p4 = scmp.ne.s32.totalorder %s6493_s23, %s4661_s18  ;;  %p4666_p9 = scmp.lt.s32.totalorder %s6493_s23, %s6547_s7 }
 0x3bb   : > { %p4667_p10 = scmp.lt.s32.totalorder %s4665_s20, %s4661_s18 }
 0x3bc   : > { %p4663_p7 = pnand %p4662_p4, %p4791_p5 }
 0x3bd   : > { %p4668_p11 = por %p4667_p10, %p4666_p9 }
 0x3be   : > { %p4664_p8 = pneg %p4663_p7 }
 0x3c0   : > { %p4669_p12 = pnand %p4668_p11, %p4664_p8 }
 0x3c2   : > { %4672 = shalt.err (!%p4669_p12)
}
 0x3c3   : > { %s4711_s9 = smov 64   ;;  %s4712_s13 = smov 4  }
 0x3c4   : > { %4199 = dma.vmem_to_hbm [thread:$0]  (%p4791_p5), %s6495_s8, 1024, %s6493_s23, %s6500_s22, %s4711_s9, %s4711_s9, %s4712_s13  }
 0x3c5 PF: > { %p4205_p13 = scmp.ge.s32.totalorder %s4707_s27, 2  ;;  %s3686_s28 = sand.u32 1, %s4695_s24  }
 0x3c6   : > { %s3687_s14 = scalar_lea.sflag [#allocation3], %s3686_s28 }
 0x3c7   : > { %p4202_p0 = pnand %p4205_p13, %p4795_p6 }
 0x3c9   : > { %p4203_p1 = pneg %p4202_p0 }
 0x3cb   : > { %4690 = dma.done.wait (%p4203_p1), %s3687_s14, 1024  }
 0x3cc   : > { %4692 = vsyncadd (%p4203_p1), %s3687_s14, 4294966272  ;;  %p17_p2 = scmp.ge.s32.totalorder %s4778_s30, 4   ;;  %s6603_s24 = smov %s4699_s25 }
 0x3cd   : > { %s6604_s25 = smov %s4703_s26  ;;  %s6605_s26 = smov %s4789_s10 }
 0x3ce   : > { %s6606_s27 = smov %s4778_s30  ;;  %19 = sbr.rel (!%p17_p2) target bundleno = 3 (0x3), region = 83 }
 0x3d3   :  { %3692 = vsyncpa [#allocation3], 1 }
 0x3d4   :  { %3694 = vsyncpa [#allocation3 + $0x1], 1 }

</bundles_post_ra>
